<compile_context>
chip_gen: v7x
topology: tpu7x:2x2x1
jax: 0.10.0
libtpu: 0.0.40
codegen_flags: <defaults>
</compile_context>

<pallas_src>
import functools

import numpy as np
import jax
import jax.numpy as jnp
from jax import lax
from jax.experimental import pallas as pl
from jax.experimental.pallas import tpu as pltpu


def _fcn_head_kernel(x_ref, w1_ref, scale_ref, shift_ref, w2t_ref, b2_ref,
                     out_ref, xp_scr, col_scr, *, H, W):
    # x_ref:     (1, H, W, C)  bf16 NHWC tile for one image
    # w1_ref:    (9*C, C)      bf16 3x3 conv weights, im2col layout
    # scale_ref: (1, C)        f32 folded BatchNorm scale
    # shift_ref: (1, C)        f32 folded BatchNorm shift
    # w2t_ref:   (NC, C)       f32 1x1 conv weights, transposed
    # b2_ref:    (NC, 1)       f32 1x1 conv bias
    # out_ref:   (1, NC, H*W)  f32 (transposed / NCHW-flat output)
    # xp_scr:    VMEM (H+2, W+2, C) bf16  zero-padded input
    # col_scr:   VMEM (H*W, 9*C)    bf16  im2col matrix
    C = x_ref.shape[-1]

    # In-kernel zero padding for the 3x3 halo (replaces wrapper jnp.pad).
    xp_scr[...] = jnp.zeros_like(xp_scr)
    xp_scr[1:H + 1, 1:W + 1, :] = x_ref[0]

    # im2col: 9 shifted (H*W, C) slices laid side by side -> (H*W, 9*C).
    for k in range(9):
        dy, dx = k // 3, k % 3
        col_scr[:, k * C:(k + 1) * C] = (
            xp_scr[dy:dy + H, dx:dx + W, :].reshape(H * W, C))

    # 3x3 conv as ONE MXU matmul: (H*W, 9C) @ (9C, C), bf16 in / f32 acc.
    acc = jnp.dot(col_scr[...], w1_ref[...],
                  preferred_element_type=jnp.float32)           # (H*W, C) f32

    # Folded BatchNorm (eval) + ReLU.  Dropout(0.1) is identity in eval mode.
    y = jnp.maximum(acc * scale_ref[...] + shift_ref[...], 0.0)

    # 1x1 conv computed transposed so the stored last dim is lane-dense
    # (H*W lanes) instead of NC=1 masked lanes:
    #   out.T (NC, H*W) = w2.T (NC, C) @ y.T (C, H*W)
    yt = jnp.transpose(y)                                        # XLU transpose
    out = jnp.dot(w2t_ref[...], yt,
                  preferred_element_type=jnp.float32) + b2_ref[...]
    out_ref[0] = out.astype(out_ref.dtype)


def fcn_head_forward(x_nchw, params):
    """FCNHead classifier on the 'feat0' feature map.  x_nchw: (B, C, H, W)."""
    x = jnp.transpose(x_nchw, (0, 2, 3, 1)).astype(jnp.bfloat16)   # NHWC bf16
    B, H, W, C = x.shape
    NC = params["w2"].shape[-1]

    w1 = params["w1"].reshape(9 * C, C).astype(jnp.bfloat16)   # (ky,kx,Cin)->rows
    scale = params["bn_scale"].reshape(1, C).astype(jnp.float32)
    shift = params["bn_shift"].reshape(1, C).astype(jnp.float32)
    w2t = params["w2"].T.astype(jnp.float32)                   # (NC, C)
    b2 = params["b2"].reshape(NC, 1).astype(jnp.float32)

    kernel = functools.partial(_fcn_head_kernel, H=H, W=W)
    out_t = pl.pallas_call(
        kernel,
        out_shape=jax.ShapeDtypeStruct((B, NC, H * W), jnp.float32),
        grid=(B,),
        in_specs=[
            pl.BlockSpec((1, H, W, C), lambda b: (b, 0, 0, 0)),
            pl.BlockSpec((9 * C, C), lambda b: (0, 0)),
            pl.BlockSpec((1, C), lambda b: (0, 0)),
            pl.BlockSpec((1, C), lambda b: (0, 0)),
            pl.BlockSpec((NC, C), lambda b: (0, 0)),
            pl.BlockSpec((NC, 1), lambda b: (0, 0)),
        ],
        out_specs=pl.BlockSpec((1, NC, H * W), lambda b: (b, 0, 0)),
        scratch_shapes=[
            pltpu.VMEM((H + 2, W + 2, C), jnp.bfloat16),   # padded input
            pltpu.VMEM((H * W, 9 * C), jnp.bfloat16),      # im2col matrix
        ],
        compiler_params=pltpu.CompilerParams(
            dimension_semantics=("parallel",)),
    )(x, w1, scale, shift, w2t, b2)

    # Output was computed transposed, so this is already NCHW.
    return out_t.reshape(B, NC, H, W)


def fcn_head_reference(x_nchw, params):
    """Pure-JAX (f32) reference for correctness checking."""
    x = jnp.transpose(x_nchw, (0, 2, 3, 1)).astype(jnp.float32)
    y = lax.conv_general_dilated(
        x, params["w1"], window_strides=(1, 1), padding="SAME",
        dimension_numbers=("NHWC", "HWIO", "NHWC"),
        preferred_element_type=jnp.float32)
    y = jnp.maximum(y * params["bn_scale"] + params["bn_shift"], 0.0)
    out = jnp.einsum("bhwc,cn->bhwn", y, params["w2"],
                     preferred_element_type=jnp.float32) + params["b2"]
    return jnp.transpose(out, (0, 3, 1, 2))


def make_params(key, C, num_classes):
    k_w1, k_g, k_b, k_m, k_v, k_w2, k_b2 = jax.random.split(key, 7)
    eps = 1e-5
    w1 = 0.05 * jax.random.normal(k_w1, (3, 3, C, C), jnp.float32)    # HWIO
    gamma = jax.random.uniform(k_g, (C,), jnp.float32, 0.5, 1.5)
    beta = 0.1 * jax.random.normal(k_b, (C,), jnp.float32)
    running_mean = 0.1 * jax.random.normal(k_m, (C,), jnp.float32)
    running_var = jax.random.uniform(k_v, (C,), jnp.float32, 0.5, 1.5)
    bn_scale = gamma * lax.rsqrt(running_var + eps)
    bn_shift = beta - running_mean * bn_scale
    w2 = 0.05 * jax.random.normal(k_w2, (C, num_classes), jnp.float32)
    b2 = 0.05 * jax.random.normal(k_b2, (num_classes,), jnp.float32)
    return {"w1": w1, "bn_scale": bn_scale, "bn_shift": bn_shift,
            "w2": w2, "b2": b2}


if __name__ == "__main__":
    B, C, H, W = 2, 256, 16, 16          # small 'feat0' feature map (FPN C=256)
    NUM_CLASSES = 1

    key = jax.random.PRNGKey(0)
    k_x, k_p = jax.random.split(key)
    x_feat0 = jax.random.normal(k_x, (B, C, H, W), jnp.float32)   # NCHW
    params = make_params(k_p, C, NUM_CLASSES)

    out = fcn_head_forward(x_feat0, params)
    out = jax.block_until_ready(out)
    assert out.shape == (B, NUM_CLASSES, H, W)

    ref = fcn_head_reference(x_feat0, params)
    # bf16 MXU inputs vs f32 reference: allow ~1% tolerance (f32 accumulation
    # keeps the error well inside this).
    np.testing.assert_allclose(np.asarray(out), np.asarray(ref),
                               rtol=2e-2, atol=2e-2)
    print("KERNEL_OK")
</pallas_src>

<mosaic_0001>
module attributes {stable_mosaic.version = 11 : i64} {
  func.func @_fcn_head_kernel(%arg0: i32, %arg1: memref<1x16x16x256xbf16, #tpu.memory_space<vmem>>, %arg2: memref<2304x256xbf16, #tpu.memory_space<vmem>>, %arg3: memref<1x256xf32, #tpu.memory_space<vmem>>, %arg4: memref<1x256xf32, #tpu.memory_space<vmem>>, %arg5: memref<1x256xf32, #tpu.memory_space<vmem>>, %arg6: memref<1x1xf32, #tpu.memory_space<vmem>>, %arg7: memref<1x1x256xf32, #tpu.memory_space<vmem>>, %arg8: memref<18x18x256xbf16, #tpu.memory_space<vmem>>, %arg9: memref<256x2304xbf16, #tpu.memory_space<vmem>>) attributes {dimension_semantics = [#tpu.dimension_semantics<parallel>], iteration_bounds = array<i64: 2>, scalar_prefetch = 0 : i64, scratch_operands = 2 : i64, tpu.core_type = #tpu.core_type<tc>, window_params = [{transform_indices = @transform_0, window_bounds = array<i64: 1, 16, 16, 256>}, {pipeline_mode = #tpu.pipeline_mode<synchronous>, transform_indices = @transform_1, window_bounds = array<i64: 2304, 256>}, {pipeline_mode = #tpu.pipeline_mode<synchronous>, transform_indices = @transform_2, window_bounds = array<i64: 1, 256>}, {pipeline_mode = #tpu.pipeline_mode<synchronous>, transform_indices = @transform_3, window_bounds = array<i64: 1, 256>}, {pipeline_mode = #tpu.pipeline_mode<synchronous>, transform_indices = @transform_4, window_bounds = array<i64: 1, 256>}, {pipeline_mode = #tpu.pipeline_mode<synchronous>, transform_indices = @transform_5, window_bounds = array<i64: 1, 1>}, {transform_indices = @transform_6, window_bounds = array<i64: 1, 1, 256>}]} {
    %cst = arith.constant 0.000000e+00 : bf16
    %0 = vector.broadcast %cst : bf16 to vector<18x18x256xbf16>
    %c0 = arith.constant 0 : index
    %c0_0 = arith.constant 0 : index
    %c0_1 = arith.constant 0 : index
    %1 = vector.load %arg8[%c0, %c0_0, %c0_1] : memref<18x18x256xbf16, #tpu.memory_space<vmem>>, vector<18x18x256xbf16>
    tpu.vector_store %arg8[%c0, %c0_0, %c0_1], %0 {strides = array<i32>} : memref<18x18x256xbf16, #tpu.memory_space<vmem>>, vector<18x18x256xbf16>,
    %c0_2 = arith.constant 0 : index
    %c0_3 = arith.constant 0 : index
    %c0_4 = arith.constant 0 : index
    %c0_5 = arith.constant 0 : index
    %2 = vector.load %arg1[%c0_2, %c0_3, %c0_4, %c0_5] : memref<1x16x16x256xbf16, #tpu.memory_space<vmem>>, vector<1x16x16x256xbf16>
    %3 = vector.shape_cast %2 : vector<1x16x16x256xbf16> to vector<16x16x256xbf16>
    %c1 = arith.constant 1 : index
    %c1_6 = arith.constant 1 : index
    %c0_7 = arith.constant 0 : index
    %4 = vector.load %arg8[%c1, %c1_6, %c0_7] : memref<18x18x256xbf16, #tpu.memory_space<vmem>>, vector<16x16x256xbf16>
    tpu.vector_store %arg8[%c1, %c1_6, %c0_7], %3 {strides = array<i32>} : memref<18x18x256xbf16, #tpu.memory_space<vmem>>, vector<16x16x256xbf16>,
    %c0_8 = arith.constant 0 : index
    %c0_9 = arith.constant 0 : index
    %c0_10 = arith.constant 0 : index
    %5 = vector.load %arg8[%c0_8, %c0_9, %c0_10] : memref<18x18x256xbf16, #tpu.memory_space<vmem>>, vector<16x16x256xbf16>
    %6 = vector.shape_cast %5 : vector<16x16x256xbf16> to vector<256x256xbf16>
    %c0_11 = arith.constant 0 : index
    %c0_12 = arith.constant 0 : index
    %7 = vector.load %arg9[%c0_11, %c0_12] : memref<256x2304xbf16, #tpu.memory_space<vmem>>, vector<256x256xbf16>
    tpu.vector_store %arg9[%c0_11, %c0_12], %6 {strides = array<i32>} : memref<256x2304xbf16, #tpu.memory_space<vmem>>, vector<256x256xbf16>,
    %c0_13 = arith.constant 0 : index
    %c1_14 = arith.constant 1 : index
    %c0_15 = arith.constant 0 : index
    %8 = vector.load %arg8[%c0_13, %c1_14, %c0_15] : memref<18x18x256xbf16, #tpu.memory_space<vmem>>, vector<16x16x256xbf16>
    %9 = vector.shape_cast %8 : vector<16x16x256xbf16> to vector<256x256xbf16>
    %c0_16 = arith.constant 0 : index
    %c256 = arith.constant 256 : index
    %10 = vector.load %arg9[%c0_16, %c256] : memref<256x2304xbf16, #tpu.memory_space<vmem>>, vector<256x256xbf16>
    tpu.vector_store %arg9[%c0_16, %c256], %9 {strides = array<i32>} : memref<256x2304xbf16, #tpu.memory_space<vmem>>, vector<256x256xbf16>,
    %c0_17 = arith.constant 0 : index
    %c2 = arith.constant 2 : index
    %c0_18 = arith.constant 0 : index
    %11 = vector.load %arg8[%c0_17, %c2, %c0_18] : memref<18x18x256xbf16, #tpu.memory_space<vmem>>, vector<16x16x256xbf16>
    %12 = vector.shape_cast %11 : vector<16x16x256xbf16> to vector<256x256xbf16>
    %c0_19 = arith.constant 0 : index
    %c512 = arith.constant 512 : index
    %13 = vector.load %arg9[%c0_19, %c512] : memref<256x2304xbf16, #tpu.memory_space<vmem>>, vector<256x256xbf16>
    tpu.vector_store %arg9[%c0_19, %c512], %12 {strides = array<i32>} : memref<256x2304xbf16, #tpu.memory_space<vmem>>, vector<256x256xbf16>,
    %c1_20 = arith.constant 1 : index
    %c0_21 = arith.constant 0 : index
    %c0_22 = arith.constant 0 : index
    %14 = vector.load %arg8[%c1_20, %c0_21, %c0_22] : memref<18x18x256xbf16, #tpu.memory_space<vmem>>, vector<16x16x256xbf16>
    %15 = vector.shape_cast %14 : vector<16x16x256xbf16> to vector<256x256xbf16>
    %c0_23 = arith.constant 0 : index
    %c768 = arith.constant 768 : index
    %16 = vector.load %arg9[%c0_23, %c768] : memref<256x2304xbf16, #tpu.memory_space<vmem>>, vector<256x256xbf16>
    tpu.vector_store %arg9[%c0_23, %c768], %15 {strides = array<i32>} : memref<256x2304xbf16, #tpu.memory_space<vmem>>, vector<256x256xbf16>,
    %c1_24 = arith.constant 1 : index
    %c1_25 = arith.constant 1 : index
    %c0_26 = arith.constant 0 : index
    %17 = vector.load %arg8[%c1_24, %c1_25, %c0_26] : memref<18x18x256xbf16, #tpu.memory_space<vmem>>, vector<16x16x256xbf16>
    %18 = vector.shape_cast %17 : vector<16x16x256xbf16> to vector<256x256xbf16>
    %c0_27 = arith.constant 0 : index
    %c1024 = arith.constant 1024 : index
    %19 = vector.load %arg9[%c0_27, %c1024] : memref<256x2304xbf16, #tpu.memory_space<vmem>>, vector<256x256xbf16>
    tpu.vector_store %arg9[%c0_27, %c1024], %18 {strides = array<i32>} : memref<256x2304xbf16, #tpu.memory_space<vmem>>, vector<256x256xbf16>,
    %c1_28 = arith.constant 1 : index
    %c2_29 = arith.constant 2 : index
    %c0_30 = arith.constant 0 : index
    %20 = vector.load %arg8[%c1_28, %c2_29, %c0_30] : memref<18x18x256xbf16, #tpu.memory_space<vmem>>, vector<16x16x256xbf16>
    %21 = vector.shape_cast %20 : vector<16x16x256xbf16> to vector<256x256xbf16>
    %c0_31 = arith.constant 0 : index
    %c1280 = arith.constant 1280 : index
    %22 = vector.load %arg9[%c0_31, %c1280] : memref<256x2304xbf16, #tpu.memory_space<vmem>>, vector<256x256xbf16>
    tpu.vector_store %arg9[%c0_31, %c1280], %21 {strides = array<i32>} : memref<256x2304xbf16, #tpu.memory_space<vmem>>, vector<256x256xbf16>,
    %c2_32 = arith.constant 2 : index
    %c0_33 = arith.constant 0 : index
    %c0_34 = arith.constant 0 : index
    %23 = vector.load %arg8[%c2_32, %c0_33, %c0_34] : memref<18x18x256xbf16, #tpu.memory_space<vmem>>, vector<16x16x256xbf16>
    %24 = vector.shape_cast %23 : vector<16x16x256xbf16> to vector<256x256xbf16>
    %c0_35 = arith.constant 0 : index
    %c1536 = arith.constant 1536 : index
    %25 = vector.load %arg9[%c0_35, %c1536] : memref<256x2304xbf16, #tpu.memory_space<vmem>>, vector<256x256xbf16>
    tpu.vector_store %arg9[%c0_35, %c1536], %24 {strides = array<i32>} : memref<256x2304xbf16, #tpu.memory_space<vmem>>, vector<256x256xbf16>,
    %c2_36 = arith.constant 2 : index
    %c1_37 = arith.constant 1 : index
    %c0_38 = arith.constant 0 : index
    %26 = vector.load %arg8[%c2_36, %c1_37, %c0_38] : memref<18x18x256xbf16, #tpu.memory_space<vmem>>, vector<16x16x256xbf16>
    %27 = vector.shape_cast %26 : vector<16x16x256xbf16> to vector<256x256xbf16>
    %c0_39 = arith.constant 0 : index
    %c1792 = arith.constant 1792 : index
    %28 = vector.load %arg9[%c0_39, %c1792] : memref<256x2304xbf16, #tpu.memory_space<vmem>>, vector<256x256xbf16>
    tpu.vector_store %arg9[%c0_39, %c1792], %27 {strides = array<i32>} : memref<256x2304xbf16, #tpu.memory_space<vmem>>, vector<256x256xbf16>,
    %c2_40 = arith.constant 2 : index
    %c2_41 = arith.constant 2 : index
    %c0_42 = arith.constant 0 : index
    %29 = vector.load %arg8[%c2_40, %c2_41, %c0_42] : memref<18x18x256xbf16, #tpu.memory_space<vmem>>, vector<16x16x256xbf16>
    %30 = vector.shape_cast %29 : vector<16x16x256xbf16> to vector<256x256xbf16>
    %c0_43 = arith.constant 0 : index
    %c2048 = arith.constant 2048 : index
    %31 = vector.load %arg9[%c0_43, %c2048] : memref<256x2304xbf16, #tpu.memory_space<vmem>>, vector<256x256xbf16>
    tpu.vector_store %arg9[%c0_43, %c2048], %30 {strides = array<i32>} : memref<256x2304xbf16, #tpu.memory_space<vmem>>, vector<256x256xbf16>,
    %c0_44 = arith.constant 0 : index
    %c0_45 = arith.constant 0 : index
    %32 = vector.load %arg9[%c0_44, %c0_45] : memref<256x2304xbf16, #tpu.memory_space<vmem>>, vector<256x2304xbf16>
    %c0_46 = arith.constant 0 : index
    %c0_47 = arith.constant 0 : index
    %33 = vector.load %arg2[%c0_46, %c0_47] : memref<2304x256xbf16, #tpu.memory_space<vmem>>, vector<2304x256xbf16>
    %cst_48 = arith.constant dense<0.000000e+00> : vector<256x256xf32>
    %34 = tpu.matmul %32, %33, %cst_48 {dimension_numbers = #tpu.dot_dimension_numbers<[1], [0], [0], [1], [0, 0, 1, 1], [], []>} : vector<256x2304xbf16>, vector<2304x256xbf16>, vector<256x256xf32> -> vector<256x256xf32>
    %c0_49 = arith.constant 0 : index
    %c0_50 = arith.constant 0 : index
    %35 = vector.load %arg3[%c0_49, %c0_50] : memref<1x256xf32, #tpu.memory_space<vmem>>, vector<1x256xf32>
    %36 = vector.broadcast %35 : vector<1x256xf32> to vector<256x256xf32>
    %37 = arith.mulf %34, %36 : vector<256x256xf32>
    %c0_51 = arith.constant 0 : index
    %c0_52 = arith.constant 0 : index
    %38 = vector.load %arg4[%c0_51, %c0_52] : memref<1x256xf32, #tpu.memory_space<vmem>>, vector<1x256xf32>
    %39 = vector.broadcast %38 : vector<1x256xf32> to vector<256x256xf32>
    %40 = arith.addf %37, %39 : vector<256x256xf32>
    %cst_53 = arith.constant 0.000000e+00 : f32
    %41 = vector.broadcast %cst_53 : f32 to vector<256x256xf32>
    %42 = arith.maximumf %40, %41 : vector<256x256xf32>
    %43 = tpu.transpose %42, [1, 0] : vector<256x256xf32> -> vector<256x256xf32>
    %c0_54 = arith.constant 0 : index
    %c0_55 = arith.constant 0 : index
    %44 = vector.load %arg5[%c0_54, %c0_55] : memref<1x256xf32, #tpu.memory_space<vmem>>, vector<1x256xf32>
    %cst_56 = arith.constant dense<0.000000e+00> : vector<1x256xf32>
    %45 = tpu.matmul %44, %43, %cst_56 {dimension_numbers = #tpu.dot_dimension_numbers<[1], [0], [0], [1], [0, 0, 1, 1], [], []>} : vector<1x256xf32>, vector<256x256xf32>, vector<1x256xf32> -> vector<1x256xf32>
    %c0_57 = arith.constant 0 : index
    %c0_58 = arith.constant 0 : index
    %46 = vector.load %arg6[%c0_57, %c0_58] : memref<1x1xf32, #tpu.memory_space<vmem>>, vector<1x1xf32>
    %47 = vector.broadcast %46 : vector<1x1xf32> to vector<1x256xf32>
    %48 = arith.addf %45, %47 : vector<1x256xf32>
    %c0_59 = arith.constant 0 : index
    %c0_60 = arith.constant 0 : index
    %c0_61 = arith.constant 0 : index
    %49 = vector.load %arg7[%c0_59, %c0_60, %c0_61] : memref<1x1x256xf32, #tpu.memory_space<vmem>>, vector<1x1x256xf32>
    %50 = vector.shape_cast %49 : vector<1x1x256xf32> to vector<1x256xf32>
    %51 = vector.shape_cast %48 : vector<1x256xf32> to vector<1x1x256xf32>
    tpu.vector_store %arg7[%c0_59, %c0_60, %c0_61], %51 {strides = array<i32>} : memref<1x1x256xf32, #tpu.memory_space<vmem>>, vector<1x1x256xf32>,
    return
  }
  func.func @transform_0(%arg0: i32) -> (i32, i32, i32, i32) {
    %c0_i32 = arith.constant 0 : i32
    %c0_i32_0 = arith.constant 0 : i32
    %c0_i32_1 = arith.constant 0 : i32
    %c0_i32_2 = arith.constant 0 : i32
    return %arg0, %c0_i32, %c0_i32_0, %c0_i32_1 : i32, i32, i32, i32
  }
  func.func @transform_1(%arg0: i32) -> (i32, i32) {
    %c0_i32 = arith.constant 0 : i32
    %c0_i32_0 = arith.constant 0 : i32
    %c0_i32_1 = arith.constant 0 : i32
    return %c0_i32, %c0_i32_0 : i32, i32
  }
  func.func @transform_2(%arg0: i32) -> (i32, i32) {
    %c0_i32 = arith.constant 0 : i32
    %c0_i32_0 = arith.constant 0 : i32
    %c0_i32_1 = arith.constant 0 : i32
    return %c0_i32, %c0_i32_0 : i32, i32
  }
  func.func @transform_3(%arg0: i32) -> (i32, i32) {
    %c0_i32 = arith.constant 0 : i32
    %c0_i32_0 = arith.constant 0 : i32
    %c0_i32_1 = arith.constant 0 : i32
    return %c0_i32, %c0_i32_0 : i32, i32
  }
  func.func @transform_4(%arg0: i32) -> (i32, i32) {
    %c0_i32 = arith.constant 0 : i32
    %c0_i32_0 = arith.constant 0 : i32
    %c0_i32_1 = arith.constant 0 : i32
    return %c0_i32, %c0_i32_0 : i32, i32
  }
  func.func @transform_5(%arg0: i32) -> (i32, i32) {
    %c0_i32 = arith.constant 0 : i32
    %c0_i32_0 = arith.constant 0 : i32
    %c0_i32_1 = arith.constant 0 : i32
    return %c0_i32, %c0_i32_0 : i32, i32
  }
  func.func @transform_6(%arg0: i32) -> (i32, i32, i32) {
    %c0_i32 = arith.constant 0 : i32
    %c0_i32_0 = arith.constant 0 : i32
    %c0_i32_1 = arith.constant 0 : i32
    return %arg0, %c0_i32, %c0_i32_0 : i32, i32, i32
  }
}

</mosaic_0001>

<bundles_post_ra>
// kernel: tpu_custom_call.1
= control target key start
LH: loop header
LB: loop body
LE: loop exit
PB: predicated region body
PF: predicated region fallthrough
CT: control target
= control target key end

     0   :  { %s12964_s0 = inlined_call_operand.hbm [shape: bf16[2,16,16,256], index: 0, kind: input, shape index: {}]   ;;  %s12965_s1 = inlined_call_operand.hbm [shape: bf16[2304,256], index: 1, kind: input, shape index: {}]   ;;  %s12966_s2 = inlined_call_operand.hbm [shape: f32[1,256], index: 2, kind: input, shape index: {}]   ;;  %s12967_s3 = inlined_call_operand.hbm [shape: f32[1,256], index: 3, kind: input, shape index: {}]   ;;  %s12968_s4 = inlined_call_operand.hbm [shape: f32[1,256], index: 4, kind: input, shape index: {}]   ;;  %s12969_s5 = inlined_call_operand.<no memory space> [shape: f32[1,1], index: 5, kind: input, shape index: {}]   ;;  %s12970_s6 = inlined_call_operand.hbm [shape: f32[2,1,256], index: 6, kind: output, shape index: {}]  }
   0x1   :  { %v11_v0 = vstv %s12969_s5 }
   0x2   :  { %12 = vst [vmem:[#allocation4] sm:$0x1] %v11_v0 }
   0x3   :  { %13 = vsyncpa [#allocation6], 0 }
   0x4   :  { %15 = vsyncpa [#allocation6 + $0x1], 0 }
   0x5   :  { %16 = vsyncpa [#allocation9], 0 }
   0x6   :  { %17 = vsyncpa [#allocation12], 0 }
   0x7   :  { %18 = vsyncpa [#allocation7], 0 }
   0x8   :  { %20 = vsyncpa [#allocation7 + $0x1], 0  ;;  %s10711_s23 = smov 0   ;;  %s10713_s24 = smov 0  }
   0x9   :  { %s10715_s25 = smov 0   ;;  %s10717_s26 = smov 0  }
   0xa LB: > { %s10732_s5 = sadd.s32 4294967295, %s10661_s26   ;;  %s8627_s27 = sadd.s32 4294967294, %s10661_s26   ;;  %s10661_s26 = sphi %s10717_s26, %s13062_s26   ;;  %s10657_s25 = sphi %s10715_s25, %s13061_s25   ;;  %s10653_s24 = sphi %s10713_s24, %s13060_s24   ;;  %s10649_s23 = sphi %s10711_s23, %s13059_s23  }
   0xb   : > { %p46_p0 = scmp.ne.s32.totalorder %s10653_s24, %s10649_s23  ;;  %p12971_p1 = scmp.eq.s32.totalorder %s10732_s5, 0 }
   0xc   : > { %p181_p3 = scmp.eq.s32.totalorder %s8627_s27, 1  ;;  %p8628_p5 = scmp.ge.s32.totalorder %s10661_s26, 1 }
   0xd   : > { %p10741_p4 = por %p12971_p1, %p46_p0  ;;  %p188_p7 = scmp.lt.s32.totalorder %s10661_s26, 3 }
   0xe   : > { %p10746_p6 = por %p181_p3, %p46_p0  ;;  %s10663_s7 = smov [#allocation8]  }
   0xf   : > { %s12978_s28 = scalar_select %p10741_p4, 1, 0 }
  0x10   : > { %s12979_s29 = scalar_select %p10746_p6, 1, 0 }
  0x11   : > { %p10751_p8 = pnand %p8628_p5, %p188_p7  ;;  %s200_s8 = sshll.u32 %s10663_s7, 4  ;;  %s10755_s8 = int_to_ptr.vmem [resolvable:$true] %s200_s8 }
  0x12   : > { %s10664_s10 = smov [#allocation11]   ;;  %s10665_s12 = smov [#allocation10]  }
  0x13   : > { %s12980_s30 = scalar_select %p10751_p8, 1, 0 }
  0x14   : > { %p9871_p9 = pneg %p10751_p8  ;;  %s225_s11 = sshll.u32 %s10664_s10, 4  ;;  %s10766_s11 = int_to_ptr.vmem [resolvable:$true] %s225_s11 }
  0x15   : > { %s10768_s13 = sshll.u32 %s10665_s12, 4  ;;  %s10445_s16 = scalar_lea.hbm %s12965_s1, 36864  ;;  %s215_s13 = int_to_ptr.vmem [resolvable:$true] %s10768_s13 }
  0x16   : > { %p10762_p11 = pnand %p9871_p9, %p12971_p1  ;;  %p10446_p12 = scmp.ne.s32.totalorder %s12965_s1, %s10445_s16 }
  0x17   : > { %p10452_p5 = scmp.lt.u32.totalorder %s10445_s16, %s12965_s1 }
  0x18   : > { %p10778_p13 = pneg %p10762_p11 }
  0x1a   : > { %p10448_p0 = pnand %p10778_p13, %p10446_p12 }
  0x1c   : > { %p10449_p3 = pneg %p10448_p0 }
  0x1e   : > { %p10454_p7 = pnand %p10452_p5, %p10449_p3 }
  0x20   : > { %10457 = shalt.err (!%p10454_p7)
}
  0x21   : > { %s10458_s22 = scalar_lea.vmem %s10755_s8, 36864  ;;  %p10466_p2 = scmp.lt.s32.totalorder %s10755_s8, %s10755_s8 }
  0x22   : > { %p10459_p9 = scmp.ne.s32.totalorder %s10755_s8, %s10458_s22  ;;  %p10467_p6 = scmp.lt.s32.totalorder %s10458_s22, %s10458_s22 }
  0x24   : > { %p10461_p10 = pnand %p10459_p9, %p10778_p13  ;;  %p10468_p12 = por %p10467_p6, %p10466_p2 }
  0x26   : > { %p10462_p1 = pneg %p10461_p10 }
  0x28   : > { %p10469_p0 = pnand %p10468_p12, %p10462_p1 }
  0x2a   : > { %10472 = shalt.err (!%p10469_p0)
}
  0x2b   : > { %s10666_s27 = smov 128   ;;  %s10667_s7 = smov 8  }
  0x2c   : > { %9874 = dma.hbm_to_vmem [thread:$0]  (!%p10762_p11), %s12965_s1, 36864, %s10755_s8, [#allocation9], %s10666_s27, %s10666_s27, %s10667_s7  }
  0x2d   : > { %s10473_s16 = scalar_lea.hbm %s12967_s3, 32 }
  0x2e   : > { %p10474_p1 = scmp.ne.s32.totalorder %s12967_s3, %s10473_s16  ;;  %p10480_p10 = scmp.lt.u32.totalorder %s10473_s16, %s12967_s3 }
  0x30   : > { %p10476_p2 = pnand %p10474_p1, %p10778_p13 }
  0x32   : > { %p10477_p6 = pneg %p10476_p2 }
  0x34   : > { %p10482_p3 = pnand %p10480_p10, %p10477_p6 }
  0x36   : > { %10485 = shalt.err (!%p10482_p3)
}
  0x37   : > { %s10486_s8 = scalar_lea.vmem %s10766_s11, 32  ;;  %p10494_p12 = scmp.lt.s32.totalorder %s10766_s11, %s10766_s11 }
  0x38   : > { %p10487_p5 = scmp.ne.s32.totalorder %s10766_s11, %s10486_s8  ;;  %p10495_p0 = scmp.lt.s32.totalorder %s10486_s8, %s10486_s8 }
  0x3a   : > { %p10489_p7 = pnand %p10487_p5, %p10778_p13  ;;  %p10496_p1 = por %p10495_p0, %p10494_p12 }
  0x3c   : > { %p10490_p9 = pneg %p10489_p7 }
  0x3e   : > { %p10497_p2 = pnand %p10496_p1, %p10490_p9 }
  0x40   : > { %10500 = shalt.err (!%p10497_p2)
}
  0x41   : > { %9880 = dma.hbm_to_vmem [thread:$0]  (!%p10762_p11), %s12967_s3, 32, %s10766_s11, [#allocation12]  }
  0x42   : > { %s10501_s15 = scalar_lea.hbm %s12966_s2, 32 }
  0x43   : > { %p10502_p6 = scmp.ne.s32.totalorder %s12966_s2, %s10501_s15  ;;  %p10508_p5 = scmp.lt.u32.totalorder %s10501_s15, %s12966_s2 }
  0x45   : > { %p10504_p10 = pnand %p10502_p6, %p10778_p13 }
  0x47   : > { %p10505_p3 = pneg %p10504_p10 }
  0x49   : > { %p10510_p7 = pnand %p10508_p5, %p10505_p3 }
  0x4b   : > { %10513 = shalt.err (!%p10510_p7)
}
  0x4c   : > { %s10514_s21 = scalar_lea.vmem %s215_s13, 32  ;;  %p10522_p1 = scmp.lt.s32.totalorder %s215_s13, %s215_s13 }
  0x4d   : > { %p10515_p9 = scmp.ne.s32.totalorder %s215_s13, %s10514_s21  ;;  %p10523_p2 = scmp.lt.s32.totalorder %s10514_s21, %s10514_s21 }
  0x4f   : > { %p10517_p12 = pnand %p10515_p9, %p10778_p13  ;;  %p10524_p4 = por %p10523_p2, %p10522_p1 }
  0x51   : > { %p10518_p0 = pneg %p10517_p12 }
  0x53   : > { %p10525_p8 = pnand %p10524_p4, %p10518_p0 }
  0x55   : > { %10528 = shalt.err (!%p10525_p8)
}
  0x56   : > { %9877 = dma.hbm_to_vmem [thread:$0]  (!%p10762_p11), %s12966_s2, 32, %s215_s13, [#allocation9]  }
  0x57   : > { %s10668_s22 = smov [#allocation13]   ;;  %s10529_s15 = scalar_lea.hbm %s12968_s4, 32 }
  0x58   : > { %s236_s10 = sshll.u32 %s10668_s22, 4  ;;  %p10530_p6 = scmp.ne.s32.totalorder %s12968_s4, %s10529_s15  ;;  %s237_s10 = int_to_ptr.vmem [resolvable:$true] %s236_s10 }
  0x59   : > { %p10536_p10 = scmp.lt.u32.totalorder %s10529_s15, %s12968_s4 }
  0x5a   : > { %p10532_p4 = pnand %p10530_p6, %p10778_p13 }
  0x5c   : > { %p10533_p8 = pneg %p10532_p4 }
  0x5e   : > { %p10538_p3 = pnand %p10536_p10, %p10533_p8 }
  0x60   : > { %10541 = shalt.err (!%p10538_p3)
}
  0x61   : > { %s10542_s13 = scalar_lea.vmem %s237_s10, 32  ;;  %p10550_p12 = scmp.lt.s32.totalorder %s237_s10, %s237_s10 }
  0x62   : > { %p10543_p5 = scmp.ne.s32.totalorder %s237_s10, %s10542_s13  ;;  %p10551_p0 = scmp.lt.s32.totalorder %s10542_s13, %s10542_s13 }
  0x64   : > { %p10545_p7 = pnand %p10543_p5, %p10778_p13  ;;  %p10552_p1 = por %p10551_p0, %p10550_p12 }
  0x66   : > { %p10546_p9 = pneg %p10545_p7 }
  0x68   : > { %p10553_p2 = pnand %p10552_p1, %p10546_p9 }
  0x6a   : > { %10556 = shalt.err (!%p10553_p2)
}
  0x6b   : > { %9883 = dma.hbm_to_vmem [thread:$0]  (!%p10762_p11), %s12968_s4, 32, %s237_s10, [#allocation12]  }
  0x6c   : > { %s10863_s19 = sadd.s32 1, %s10661_s26   ;;  %s33_s8 = sadd.s32 1, %s10657_s25 }
  0x6d   : > { %s30_s9 = ssub.s32 %s10661_s26, %s10863_s19  ;;  %p40_p13 = scmp.ne.s32.totalorder %s10657_s25, %s10653_s24 }
  0x6e   : > { %p31_p6 = scmp.eq.s32.totalorder %s30_s9, 0  ;;  %p41_p4 = scmp.eq.s32.totalorder %s10661_s26, 0 }
  0x6f   : > { %p12983_p8 = scmp.eq.s32.totalorder %s10732_s5, 1  ;;  %p9896_p3 = scmp.lt.s32.totalorder %s10661_s26, 2 }
  0x70   : > { %s10879_s12 = scalar_select %p31_p6, %s10657_s25, %s33_s8  }
  0x71   : > { %p10873_p10 = por %p12983_p8, %p40_p13  ;;  %p42_p5 = por %p41_p4, %p40_p13 }
  0x72   : > { %s250_s14 = sand.u32 1, %s10657_s25   ;;  %s9273_s10 = sshll.u32 %s10661_s26, 12 }
  0x73   : > { %s8634_s15 = sshll.u32 %s250_s14, 8  ;;  %s10886_s18 = scalar_lea.hbm %s12964_s0, %s9273_s10 }
  0x74   : > { %s254_s20 = scalar_lea.vmem [#allocation5], %s8634_s15  ;;  %p10890_p11 = pnand %p9896_p3, %p42_p5 }
  0x75   : > { %s261_s13 = sshll.u32 %s254_s20, 4  ;;  %s10894_s11 = scalar_lea.sflag [#allocation6], %s250_s14  ;;  %s10888_s13 = int_to_ptr.vmem [resolvable:$true] %s261_s13 }
  0x76   : > { %s10557_s8 = scalar_lea.hbm %s10886_s18, 4096  ;;  %p10559_p9 = pneg %p10890_p11 }
  0x77   : > { %p10558_p7 = scmp.ne.s32.totalorder %s10886_s18, %s10557_s8  ;;  %s10562_s10 = scalar_lea.hbm %s12964_s0, 8192 }
  0x78   : > { %p10563_p1 = scmp.lt.u32.totalorder %s10886_s18, %s12964_s0  ;;  %p10564_p2 = scmp.lt.u32.totalorder %s10562_s10, %s10557_s8 }
  0x79   : > { %p10560_p12 = pnand %p10559_p9, %p10558_p7  ;;  %p10566_p6 = scmp.lt.u32.totalorder %s10557_s8, %s10886_s18 }
  0x7a   : > { %p10565_p13 = por %p10564_p2, %p10563_p1 }
  0x7b   : > { %p10561_p0 = pneg %p10560_p12 }
  0x7c   : > { %p10567_p4 = por %p10566_p6, %p10565_p13 }
  0x7e   : > { %p10568_p8 = pnand %p10567_p4, %p10561_p0 }
  0x80   : > { %10571 = shalt.err (!%p10568_p8)
}
  0x81   : > { %s10572_s14 = scalar_lea.vmem %s10888_s13, 4096  ;;  %s10669_s20 = smov [#allocation5]  }
  0x82   : > { %p10573_p3 = scmp.ne.s32.totalorder %s10888_s13, %s10572_s14  ;;  %s10577_s9 = sshll.u32 %s10669_s20, 4  ;;  %s10578_s9 = int_to_ptr.vmem [resolvable:$false] %s10577_s9 }
  0x83   : > { %s10579_s15 = scalar_lea.vmem %s10578_s9, 8192  ;;  %p10580_p12 = scmp.lt.s32.totalorder %s10888_s13, %s10578_s9 }
  0x84   : > { %p10575_p5 = pnand %p10573_p3, %p10559_p9  ;;  %p10581_p1 = scmp.lt.s32.totalorder %s10579_s15, %s10572_s14 }
  0x86   : > { %p10576_p7 = pneg %p10575_p5  ;;  %p10582_p2 = por %p10581_p1, %p10580_p12 }
  0x88   : > { %p10583_p13 = pnand %p10582_p2, %p10576_p7 }
  0x8a   : > { %10586 = shalt.err (!%p10583_p13)
}
  0x8b   : > { %9887 = dma.hbm_to_vmem [thread:$0]  (!%p10890_p11), %s10886_s18, 4096, %s10888_s13, %s10894_s11, %s10666_s27, %s10666_s27, %s10667_s7  }
  0x8c   : > { %p12986_p9 = scmp.ne.s32.totalorder %s12980_s30, 0 }
  0x8e   : > { %273 = sbr.rel (%p12986_p9) target bundleno = 1327 (0x52f), region = 44 }
  0x95   : > { %s10928_s8 = sand.u32 1, %s10653_s24   ;;  %p12987_p0 = scmp.ne.s32.totalorder %s12978_s28, 0 }
  0x96   : > { %s8638_s10 = sshll.u32 %s10928_s8, 8  ;;  %s276_s16 = scalar_lea.sflag [#allocation6], %s10928_s8 }
  0x97   : > { %s10932_s17 = scalar_lea.vmem [#allocation5], %s8638_s10 }
  0x98   : > { %10632 = dma.done.wait (%p12987_p0), %s276_s16, 4096  }
  0x99   : > { %10634 = vsyncadd (%p12987_p0), %s276_s16, 4294963200  ;;  %p12988_p11 = scmp.eq.s32.totalorder %s10732_s5, 0 }
  0x9b   : > { %10636 = dma.done.wait (%p12988_p11), [#allocation9], 36896   ;;  %p12989_p6 = pmov %p12988_p11 }
  0x9d   : > { %10638 = vsyncadd (%p12989_p6), [#allocation9], 4294930400  ;;  %p12990_p4 = pmov %p12989_p6 }
  0x9f   : > { %10640 = dma.done.wait (%p12990_p4), [#allocation12], 64   ;;  %p12991_p8 = pmov %p12990_p4 }
  0xa0   : > { %v10670_v1 = vmov 0   ;;  %v9943_v3 = vld [vmem:[#allocation8 + $0x4] ss:$8 sps:$4 sm:$0xff]   ;;  %v9947_v5 = vld [vmem:[#allocation8] ss:$8 sps:$4 sm:$0xff]   ;;  %vm735_vm1 = vcmask 1043456  }
  0xa1   : > { %10642 = vsyncadd (%p12991_p8), [#allocation12], 4294967232  ;;  %325 = vst [vmem:[#allocation2] sm:$0xff] %v10670_v1  ;;  %v8645_v2 = vcombine.high %v10670_v1, %v10670_v1  ;;  %9942 = vset.pattern.permute.xlu0 %v10670_v1  ;;  %v9945_v4 = vld [vmem:[#allocation8 + $0x404] ss:$8 sps:$4 sm:$0xff]   ;;  %6435 = vmatprep.subr.bf16.mxu1 %v9943_v3  ;;  %vm738_vm4 = vcmask 1047556  }
  0xa2   : > { %327 = vst [vmem:[#allocation2 + $0x10] sm:$0x11] %v10670_v1  ;;  %330 = vst [vmem:[#allocation2 + $0x28] sm:$0x11] %v10670_v1  ;;  %v9948_v6 = vld [vmem:[#allocation8 + $0x400] ss:$8 sps:$4 sm:$0xff]   ;;  %7207 = vmatprep.subr.bf16.mxu0 %v9945_v4  ;;  %6436 = vmatpush1.bf16.msra.mxu1 %v9947_v5 }
  0xa3   : > { %333 = vst [vmem:[#allocation2 + $0x40] sm:$0x11] %v10670_v1  ;;  %336 = vst [vmem:[#allocation2 + $0x58] sm:$0x11] %v10670_v1  ;;  %6467 = vmatprep.mubr.bf16.mxu1 %v8645_v2  ;;  %v9949_v7 = vld [vmem:[#allocation8 + $0x14] ss:$8 sps:$4 sm:$0xff]   ;;  %7208 = vmatpush1.bf16.msra.mxu0 %v9948_v6  ;;  %v11005_v6 = vcombine.low %v10670_v1, %v10670_v1 }
  0xa4   : > { %339 = vst [vmem:[#allocation2 + $0x70] sm:$0x11] %v10670_v1  ;;  %342 = vst [vmem:[#allocation2 + $0x88] sm:$0x11] %v10670_v1  ;;  %v9951_v8 = vld [vmem:[#allocation8 + $0x414] ss:$8 sps:$4 sm:$0xff]   ;;  %6437 = vmatprep.subr.bf16.mxu1 %v9949_v7 }
  0xa5   : > { %345 = vst [vmem:[#allocation2 + $0xa0] sm:$0x11] %v10670_v1  ;;  %348 = vst [vmem:[#allocation2 + $0xb8] sm:$0x11] %v10670_v1  ;;  %v9953_v9 = vld [vmem:[#allocation8 + $0x10] ss:$8 sps:$4 sm:$0xff]   ;;  %7209 = vmatprep.subr.bf16.mxu0 %v9951_v8 }
  0xa6   : > { %351 = vst [vmem:[#allocation2 + $0xd0] sm:$0x11] %v10670_v1  ;;  %354 = vst [vmem:[#allocation2 + $0xe8] sm:$0x11] %v10670_v1  ;;  %v9954_v10 = vld [vmem:[#allocation8 + $0x410] ss:$8 sps:$4 sm:$0xff]   ;;  %6438 = vmatpush1.bf16.msra.mxu1 %v9953_v9 }
  0xa7   : > { %357 = vst [vmem:[#allocation2 + $0x100] sm:$0x11] %v10670_v1  ;;  %360 = vst [vmem:[#allocation2 + $0x118] sm:$0x11] %v10670_v1  ;;  %v9955_v11 = vld [vmem:[#allocation8 + $0x24] ss:$8 sps:$4 sm:$0xff]   ;;  %7210 = vmatpush1.bf16.msra.mxu0 %v9954_v10 }
  0xa8   : > { %363 = vst [vmem:[#allocation2 + $0x130] sm:$0x11] %v10670_v1  ;;  %366 = vst [vmem:[#allocation2 + $0x148] sm:$0x11] %v10670_v1  ;;  %v9957_v12 = vld [vmem:[#allocation8 + $0x424] ss:$8 sps:$4 sm:$0xff]   ;;  %6439 = vmatprep.subr.bf16.mxu1 %v9955_v11 }
  0xa9   : > { %369 = vst [vmem:[#allocation2 + $0x160] sm:$0x11] %v10670_v1  ;;  %372 = vst [vmem:[#allocation2 + $0x178] sm:$0x11] %v10670_v1  ;;  %v9959_v13 = vld [vmem:[#allocation8 + $0x20] ss:$8 sps:$4 sm:$0xff]   ;;  %7211 = vmatprep.subr.bf16.mxu0 %v9957_v12 }
  0xaa   : > { %375 = vst [vmem:[#allocation2 + $0x190] sm:$0x11] %v10670_v1  ;;  %376 = vst [vmem:[#allocation2 + $0x198] sm:$0xff] %v10670_v1  ;;  %v9960_v14 = vld [vmem:[#allocation8 + $0x420] ss:$8 sps:$4 sm:$0xff]   ;;  %6440 = vmatpush1.bf16.msra.mxu1 %v9959_v13  ;;  %vm746_vm9 = vcmask 1040384  }
  0xab   : > { %378 = vst [vmem:[#allocation2 + $0x1a8] sm:$0x11] %v10670_v1  ;;  %v9961_v15 = vld [vmem:[#allocation8 + $0x34] ss:$8 sps:$4 sm:$0xff]   ;;  %v9965_v17 = vld [vmem:[#allocation8 + $0x30] ss:$8 sps:$4 sm:$0xff]   ;;  %7212 = vmatpush1.bf16.msra.mxu0 %v9960_v14 }
  0xac   : > { %v9963_v16 = vld [vmem:[#allocation8 + $0x434] ss:$8 sps:$4 sm:$0xff]   ;;  %v9966_v18 = vld [vmem:[#allocation8 + $0x430] ss:$8 sps:$4 sm:$0xff]   ;;  %v9967_v19 = vld [vmem:[#allocation8 + $0x44] ss:$8 sps:$4 sm:$0xff]   ;;  %6441 = vmatprep.subr.bf16.mxu1 %v9961_v15 }
  0xad   : > { %7213 = vmatprep.subr.bf16.mxu0 %v9963_v16  ;;  %v9969_v20 = vld [vmem:[#allocation8 + $0x444] ss:$8 sps:$4 sm:$0xff]   ;;  %v9971_v21 = vld [vmem:[#allocation8 + $0x40] ss:$8 sps:$4 sm:$0xff]   ;;  %v9973_v23 = vld [vmem:[#allocation8 + $0x54] ss:$8 sps:$4 sm:$0xff]  }
  0xae   : > { %v9972_v22 = vld [vmem:[#allocation8 + $0x440] ss:$8 sps:$4 sm:$0xff]   ;;  %6442 = vmatpush1.bf16.msra.mxu1 %v9965_v17  ;;  %v9975_v24 = vld [vmem:[#allocation8 + $0x454] ss:$8 sps:$4 sm:$0xff]   ;;  %v9977_v25 = vld [vmem:[#allocation8 + $0x50] ss:$8 sps:$4 sm:$0xff]  }
  0xaf   : > { %7214 = vmatpush1.bf16.msra.mxu0 %v9966_v18  ;;  %6443 = vmatprep.subr.bf16.mxu1 %v9967_v19  ;;  %v9978_v26 = vld [vmem:[#allocation8 + $0x450] ss:$8 sps:$4 sm:$0xff]   ;;  %v9979_v27 = vld [vmem:[#allocation8 + $0x64] ss:$8 sps:$4 sm:$0xff]   ;;  %v9983_v29 = vld [vmem:[#allocation8 + $0x60] ss:$8 sps:$4 sm:$0xff]  }
  0xb0   : > { %7215 = vmatprep.subr.bf16.mxu0 %v9969_v20  ;;  %v9981_v28 = vld [vmem:[#allocation8 + $0x464] ss:$8 sps:$4 sm:$0xff]   ;;  %v9984_v30 = vld [vmem:[#allocation8 + $0x460] ss:$8 sps:$4 sm:$0xff]   ;;  %v9985_v31 = vld [vmem:[#allocation8 + $0x74] ss:$8 sps:$4 sm:$0xff]  }
  0xb1   : > { %v9987_v32 = vld [vmem:[#allocation8 + $0x474] ss:$8 sps:$4 sm:$0xff]   ;;  %v9989_v33 = vld [vmem:[#allocation8 + $0x70] ss:$8 sps:$4 sm:$0xff]   ;;  %v9991_v35 = vld [vmem:[#allocation8 + $0x84] ss:$8 sps:$4 sm:$0xff]  }
  0xb2   : > { %6444 = vmatpush1.bf16.msra.mxu1 %v9971_v21  ;;  %v9990_v34 = vld [vmem:[#allocation8 + $0x470] ss:$8 sps:$4 sm:$0xff]   ;;  %v9993_v36 = vld [vmem:[#allocation8 + $0x484] ss:$8 sps:$4 sm:$0xff]   ;;  %v9995_v37 = vld [vmem:[#allocation8 + $0x80] ss:$8 sps:$4 sm:$0xff]  }
  0xb3   : > { %7216 = vmatpush1.bf16.msra.mxu0 %v9972_v22  ;;  %6445 = vmatprep.subr.bf16.mxu1 %v9973_v23  ;;  %v9996_v38 = vld [vmem:[#allocation8 + $0x480] ss:$8 sps:$4 sm:$0xff]   ;;  %v9997_v39 = vld [vmem:[#allocation8 + $0x94] ss:$8 sps:$4 sm:$0xff]   ;;  %vm412_vm0 = vsmask.f32 4368 }
  0xb4   : > { %7217 = vmatprep.subr.bf16.mxu0 %v9975_v24  ;;  %v9999_v40 = vld [vmem:[#allocation8 + $0x494] ss:$8 sps:$4 sm:$0xff]   ;;  %vm736_vm2 = vsmask.f32 7938  ;;  %v10001_v41 = vld [vmem:[#allocation8 + $0x90] ss:$8 sps:$4 sm:$0xff]  }
  0xb5   : > { %vm739_vm3 = vsmask.f32 7954  ;;  %v10002_v42 = vld [vmem:[#allocation8 + $0x490] ss:$8 sps:$4 sm:$0xff]   ;;  %v10003_v43 = vld [vmem:[#allocation8 + $0xa4] ss:$8 sps:$4 sm:$0xff]   ;;  %vm10969_vm6 = vmand %vm735_vm1, %vm736_vm2 }
  0xb6   : > { %6446 = vmatpush1.bf16.msra.mxu1 %v9977_v25  ;;  %v10005_v44 = vld [vmem:[#allocation8 + $0x4a4] ss:$8 sps:$4 sm:$0xff]   ;;  %vm411_vm5 = vsmask.f32 256  ;;  %v10007_v46 = vld [vmem:[#allocation8 + $0xa0] ss:$8 sps:$4 sm:$0xff]   ;;  %vm10979_vm8 = vmand %vm738_vm4, %vm739_vm3 }
  0xb7   : > { %7218 = vmatpush1.bf16.msra.mxu0 %v9978_v26  ;;  %6447 = vmatprep.subr.bf16.mxu1 %v9979_v27  ;;  %v10008_v47 = vld [vmem:[#allocation8 + $0x4a0] ss:$8 sps:$4 sm:$0xff]   ;;  %vm10975_vm7 = vmor %vm411_vm5, %vm412_vm0  ;;  %vm748_vm10 = vcmask 1044484   ;;  %v10009_v50 = vld [vmem:[#allocation8 + $0xb4] ss:$8 sps:$4 sm:$0xff]   ;;  %vm1775_vm3 = vcmask 1042432  }
  0xb8   : > { %7219 = vmatprep.subr.bf16.mxu0 %v9981_v28  ;;  %vm749_vm11 = vsmask.f32 4352  ;;  %v10011_v51 = vld [vmem:[#allocation8 + $0x4b4] ss:$8 sps:$4 sm:$0xff]   ;;  %v10013_v52 = vld [vmem:[#allocation8 + $0xb0] ss:$8 sps:$4 sm:$0xff]   ;;  %vm10985_vm12 = vmand %vm746_vm9, %vm411_vm5 }
  0xb9   : > { %v379_v53 = vld [vmem:[%s10932_s17] sm:$0xff]  ;;  %v10014_v55 = vld [vmem:[#allocation8 + $0x4b0] ss:$8 sps:$4 sm:$0xff]   ;;  %v380_v56 = vld [vmem:[%s10932_s17 + $0x8] sm:$0xff]  ;;  %vm1132_vm14 = vsmask.f32 3328 }
  0xba   : > { %6448 = vmatpush1.bf16.msra.mxu1 %v9983_v29  ;;  %v415_v57 = vshrl.u32 %v379_v53, 16  ;;  %v418_v58 = vshll.u32 %v379_v53, 16  ;;  %vm10991_vm13 = vmand %vm748_vm10, %vm749_vm11  ;;  %v10015_v60 = vld [vmem:[#allocation8 + $0xc4] ss:$8 sps:$4 sm:$0xff]   ;;  %v423_v61 = vshrl.u32 %v380_v56, 16  ;;  %v426_v62 = vshll.u32 %v380_v56, 16 }
  0xbb   : > { %7220 = vmatpush1.bf16.msra.mxu0 %v9984_v30  ;;  %6449 = vmatprep.subr.bf16.mxu1 %v9985_v31  ;;  %v10017_v63 = vld [vmem:[#allocation8 + $0x4c4] ss:$8 sps:$4 sm:$0xff]   ;;  %vm10999_vm15 = vmor %vm10979_vm8, %vm10969_vm6  ;;  %v752_v3 = vld [vmem:[#allocation2 + $0x28] sm:$0x11]  ;;  %vm1133_vm1 = vsmask.f32 7440 }
  0xbc   : > { %7221 = vmatprep.subr.bf16.mxu0 %v9987_v32  ;;  %v417_v0 = vrot.slane %v415_v57, 7  ;;  %v10019_v4 = vld [vmem:[#allocation8 + $0xc0] ss:$8 sps:$4 sm:$0xff]   ;;  %v425_v7 = vrot.slane %v423_v61, 7  ;;  %vm11011_vm0 = vmor %vm10991_vm13, %vm10985_vm12  ;;  %v381_v9 = vld [vmem:[%s10932_s17 + $0x10] sm:$0xff]  ;;  %vm1776_vm4 = vcmask 1046532  }
  0xbd   : > { %v10020_v5 = vld [vmem:[#allocation8 + $0x4c0] ss:$8 sps:$4 sm:$0xff]   ;;  %v382_v10 = vld [vmem:[%s10932_s17 + $0x18] sm:$0xff]  ;;  %v432_v13 = vshrl.u32 %v381_v9, 16  ;;  %v435_v14 = vshll.u32 %v381_v9, 16  ;;  %vm11053_vm2 = vmor %vm1132_vm14, %vm1133_vm1  ;;  %s8643_s28 = sshll.u32 %s10928_s8, 1 }
  0xbe   : > { %6450 = vmatpush1.bf16.msra.mxu1 %v9989_v33  ;;  %v420_v11 = vor.u32 %v418_v58, %v417_v0  ;;  %v421_v12 = vrot.slane %v417_v0, 4  ;;  %v11018_v15 = vld [vmem:[%s10932_s17 + $0x20] sm:$0xff]  ;;  %v10021_v1 = vld [vmem:[#allocation8 + $0xd4] ss:$8 sps:$4 sm:$0xff]   ;;  %v428_v16 = vor.u32 %v426_v62, %v425_v7  ;;  %v430_v17 = vrot.slane %v425_v7, 4  ;;  %vm11589_vm5 = vmor %vm1775_vm3, %vm1776_vm4  ;;  %s9274_s30 = sshll.u32 %s10732_s5, 5 }
  0xbf   : > { %7222 = vmatpush1.bf16.msra.mxu0 %v9990_v34  ;;  %6451 = vmatprep.subr.bf16.mxu1 %v9991_v35  ;;  %v440_v18 = vshrl.u32 %v382_v10, 16  ;;  %v443_v19 = vshll.u32 %v382_v10, 16  ;;  %v10023_v20 = vld [vmem:[#allocation8 + $0x4d4] ss:$8 sps:$4 sm:$0xff]   ;;  %v434_v22 = vrot.slane %v432_v13, 7  ;;  %v449_v23 = vshrl.u32 %v11018_v15, 16  ;;  %s12920_s21 = scalar_lea.hbm %s12970_s6, %s9274_s30 }
  0xc0   : > { %7223 = vmatprep.subr.bf16.mxu0 %v9993_v36  ;;  %v11022_v21 = vsel %vm10999_vm15, %v420_v11, 0  ;;  %v452_v24 = vshll.u32 %v11018_v15, 16  ;;  %v10025_v25 = vld [vmem:[#allocation8 + $0xd0] ss:$8 sps:$4 sm:$0xff]   ;;  %v11028_v27 = vsel %vm10975_vm7, %v421_v12, %v428_v16  ;;  %v753_v28 = vsel %vm11011_vm0, %v430_v17, %v752_v3  ;;  %v10027_v31 = vld [vmem:[#allocation8 + $0xe4] ss:$8 sps:$4 sm:$0xff]  }
  0xc1   : > { %v10026_v26 = vld [vmem:[#allocation8 + $0x4d0] ss:$8 sps:$4 sm:$0xff]   ;;  %744 = vst [vmem:[#allocation2 + $0x18] sm:$0xff] %v11022_v21  ;;  %v2323_v29 = vshrl.u32 %v11022_v21, 16  ;;  %v2326_v30 = vshll.u32 %v11022_v21, 16  ;;  %745 = vst [vmem:[#allocation2 + $0x20] sm:$0xff] %v11028_v27  ;;  %v8647_v35 = vcombine.high %v11022_v21, %v11028_v27  ;;  %v437_v36 = vor.u32 %v435_v14, %v434_v22 }
  0xc2   : > { %6452 = vmatpush1.bf16.msra.mxu1 %v9995_v37  ;;  %v10029_v32 = vld [vmem:[#allocation8 + $0x4e4] ss:$8 sps:$4 sm:$0xff]   ;;  %754 = vst [vmem:[#allocation2 + $0x28] sm:$0x11] %v753_v28  ;;  %v2332_v33 = vshll.u32 %v11028_v27, 16  ;;  %v2336_v34 = vshrl.u32 %v11028_v27, 16 }
  0xc3   : > { %7224 = vmatpush1.bf16.msra.mxu0 %v9996_v38  ;;  %6453 = vmatprep.subr.bf16.mxu1 %v9997_v39  ;;  %v2325_v37 = vrot.slane %v2323_v29, 4  ;;  %v2328_v38 = vrot.slane %v2326_v30, 5  ;;  %v438_v39 = vrot.slane %v434_v22, 4  ;;  %v759_v45 = vld [vmem:[#allocation2 + $0x40] sm:$0x11]  ;;  %v451_v57 = vrot.slane %v449_v23, 7 }
  0xc4   : > { %7225 = vmatprep.subr.bf16.mxu0 %v9999_v40  ;;  %v442_v40 = vrot.slane %v440_v18, 7  ;;  %v10032_v53 = vld [vmem:[#allocation8 + $0x4e0] ss:$8 sps:$4 sm:$0xff]   ;;  %v10033_v59 = vld [vmem:[#allocation8 + $0xf4] ss:$8 sps:$4 sm:$0xff]   ;;  %s323_s27 = scalar_lea.vmem [#allocation14], %s8643_s28 }
  0xc5   : > { %v2329_v49 = vor.u32 %v2328_v38, %v2325_v37  ;;  %v10035_v0 = vld [vmem:[#allocation8 + $0x4f4] ss:$8 sps:$4 sm:$0xff]   ;;  %v10037_v9 = vld [vmem:[#allocation8 + $0xf0] ss:$8 sps:$4 sm:$0xff]   ;;  %v454_v13 = vor.u32 %v452_v24, %v451_v57  ;;  %v455_v14 = vrot.slane %v451_v57, 4  ;;  %s8519_s7 = sshll.u32 %s323_s27, 4  ;;  %s12922_s7 = int_to_ptr.vmem [resolvable:$true] %s8519_s7 }
  0xc6   : > { %6454 = vmatpush1.bf16.msra.mxu1 %v10001_v41  ;;  %v11041_v41 = vld [vmem:[%s10932_s17 + $0x28] sm:$0xff]  ;;  %v385_v18 = vld [vmem:[%s10932_s17 + $0x30] sm:$0xff]  ;;  %v1086_v2 = vld [vmem:[#allocation2 + $0x10] sm:$0x11]  ;;  %s8505_s11 = scalar_lea.sflag [#allocation7], %s10928_s8  ;;  %s10587_s14 = scalar_lea.vmem %s12922_s7, 32 }
  0xc7   : > { %7226 = vmatpush1.bf16.msra.mxu0 %v10002_v42  ;;  %6455 = vmatprep.subr.bf16.mxu1 %v10003_v43  ;;  %v2334_v42 = vrot.slane %v2332_v33, 5  ;;  %v2338_v43 = vrot.slane %v2336_v34, 4  ;;  %v457_v58 = vshrl.u32 %v11041_v41, 16  ;;  %v460_v22 = vshll.u32 %v11041_v41, 16  ;;  %v766_v33 = vld [vmem:[#allocation2 + $0x58] sm:$0x11]  ;;  %p10588_p3 = scmp.ne.s32.totalorder %s12922_s7, %s10587_s14 }
  0xc8   : > { %7227 = vmatprep.subr.bf16.mxu0 %v10005_v44  ;;  %v11045_v44 = vsel %vm10999_vm15, %v437_v36, 0  ;;  %v11076_v23 = vsel %vm10999_vm15, %v454_v13, 0  ;;  %v466_v36 = vshrl.u32 %v385_v18, 16  ;;  %v10042_v57 = vld [vmem:[#allocation8 + $0x510] ss:$8 sps:$4 sm:$0xff]   ;;  %s10672_s5 = smov [#allocation14]  }
  0xc9   : > { %757 = vst [vmem:[#allocation2 + $0x30] sm:$0xff] %v11045_v44  ;;  %v2350_v56 = vshll.u32 %v11045_v44, 16  ;;  %v2276_v10 = vld [vmem:[#allocation2 + $0x28] sm:$0x11]  ;;  %764 = vst [vmem:[#allocation2 + $0x48] sm:$0xff] %v11076_v23  ;;  %v2371_v30 = vshrl.u32 %v11076_v23, 16  ;;  %p10589_p5 = pnand %p10588_p3, %p10873_p10 }
  0xca   : > { %6456 = vmatpush1.bf16.msra.mxu1 %v10007_v46  ;;  %v8646_v46 = vcombine.low %v11022_v21, %v11028_v27  ;;  %v2342_v15 = vshll.u32 %v2276_v10, 16  ;;  %v2374_v34 = vshll.u32 %v11076_v23, 16  ;;  %v773_v13 = vld [vmem:[#allocation2 + $0x70] sm:$0x11]  ;;  %s10591_s20 = sshll.u32 %s10672_s5, 4  ;;  %s10592_s20 = int_to_ptr.vmem [resolvable:$false] %s10591_s20 }
  0xcb   : > { %7228 = vmatpush1.bf16.msra.mxu0 %v10008_v47  ;;  %6457 = vmatprep.subr.bf16.mxu1 %v10009_v50  ;;  %v10031_v47 = vld [vmem:[#allocation8 + $0xe0] ss:$8 sps:$4 sm:$0xff]   ;;  %v445_v50 = vor.u32 %v443_v19, %v442_v40  ;;  %v10038_v19 = vld [vmem:[#allocation8 + $0x4f0] ss:$8 sps:$4 sm:$0xff]   ;;  %p10590_p7 = pneg %p10589_p5  ;;  %s10593_s9 = scalar_lea.vmem %s10592_s20, 64 }
  0xcc   : > { %7229 = vmatprep.subr.bf16.mxu0 %v10011_v51  ;;  %v447_v51 = vrot.slane %v442_v40, 4  ;;  %v2344_v24 = vrot.slane %v2342_v15, 5  ;;  %v2373_v40 = vrot.slane %v2371_v30, 4  ;;  %v388_v15 = vld [vmem:[%s10932_s17 + $0x48] sm:$0xff]  ;;  %p10594_p12 = scmp.lt.s32.totalorder %s12922_s7, %s10592_s20  ;;  %p10595_p1 = scmp.lt.s32.totalorder %s10593_s9, %s10587_s14 }
  0xcd   : > { %v11061_v61 = vsel %vm10975_vm7, %v438_v39, %v445_v50  ;;  %v386_v50 = vld [vmem:[%s10932_s17 + $0x38] sm:$0xff] }
  0xce   : > { %6458 = vmatpush1.bf16.msra.mxu1 %v10013_v52  ;;  %v2347_v52 = vshrl.u32 %v11045_v44, 16  ;;  %v760_v62 = vsel %vm11011_vm0, %v447_v51, %v759_v45  ;;  %758 = vst [vmem:[#allocation2 + $0x38] sm:$0xff] %v11061_v61  ;;  %v2360_v7 = vshrl.u32 %v11061_v61, 16  ;;  %v8649_v12 = vcombine.high %v11045_v44, %v11061_v61  ;;  %p10596_p2 = por %p10595_p1, %p10594_p12 }
  0xcf   : > { %7230 = vmatpush1.bf16.msra.mxu0 %v10014_v55  ;;  %6459 = vmatprep.subr.bf16.mxu1 %v10015_v60  ;;  %v2339_v55 = vor.u32 %v2338_v43, %v2334_v42  ;;  %v2330_v60 = vrot.slane %v2329_v49, 4  ;;  %761 = vst [vmem:[#allocation2 + $0x40] sm:$0x11] %v760_v62  ;;  %v10039_v43 = vld [vmem:[#allocation8 + $0x500] ss:$8 sps:$4 sm:$0xff]   ;;  %v2376_v49 = vrot.slane %v2374_v34, 5 }
  0xd0   : > { %7231 = vmatprep.subr.bf16.mxu0 %v10017_v63  ;;  %v2349_v63 = vrot.slane %v2347_v52, 4  ;;  %v2362_v17 = vrot.slane %v2360_v7, 4  ;;  %v10044_v52 = vld [vmem:[#allocation8 + $0x514] ss:$8 sps:$4 sm:$0xff]   ;;  %v469_v62 = vshll.u32 %v385_v18, 16  ;;  %p10597_p13 = pnand %p10596_p2, %p10590_p7 }
  0xd1   : > { %v2340_v3 = vrot.slane %v2339_v55, 4  ;;  %v2335_v11 = vsel %vm11053_vm2, %v2330_v60, %v2334_v42  ;;  %v468_v60 = vrot.slane %v466_v36, 7  ;;  %v10063_v18 = vld [vmem:[#allocation8 + $0x100] ss:$8 sps:$4 sm:$0xff]  }
  0xd2   : > { %6460 = vmatpush1.bf16.msra.mxu1 %v10019_v4  ;;  %v2352_v4 = vrot.slane %v2350_v56, 5 }
  0xd3   : > { %7232 = vmatpush1.bf16.msra.mxu0 %v10020_v5  ;;  %6461 = vmatprep.subr.bf16.mxu1 %v10021_v1  ;;  %v2356_v5 = vshll.u32 %v11061_v61, 16  ;;  %v2345_v37 = vsel %vm11053_vm2, %v2340_v3, %v2344_v24  ;;  %v472_v10 = vrot.slane %v468_v60, 4  ;;  %v10065_v24 = vld [vmem:[#allocation8 + $0x104] ss:$8 sps:$4 sm:$0xff]  }
  0xd4   : > { %7233 = vmatprep.subr.bf16.mxu0 %v10023_v20  ;;  %v2353_v1 = vor.u32 %v2352_v4, %v2349_v63  ;;  %v459_v20 = vrot.slane %v457_v58, 7  ;;  %v8788_v41 = vcombine.low %v2335_v11, %v2345_v37  ;;  %v8789_v42 = vcombine.high %v2335_v11, %v2345_v37  ;;  %v10047_v4 = vld [vmem:[#allocation8 + $0x524] ss:$8 sps:$4 sm:$0xff]  }
  0xd5   : > { %v2358_v16 = vrot.slane %v2356_v5, 5  ;;  %v2377_v58 = vor.u32 %v2376_v49, %v2373_v40  ;;  %v474_v5 = vshrl.u32 %v386_v50, 16  ;;  %v477_v11 = vshll.u32 %v386_v50, 16 }
  0xd6   : > { %6462 = vmatpush1.bf16.msra.mxu1 %v10025_v25  ;;  %v8648_v25 = vcombine.low %v11045_v44, %v11061_v61  ;;  %v2354_v28 = vrot.slane %v2353_v1, 4  ;;  %v2279_v45 = vld [vmem:[#allocation2 + $0x40] sm:$0x11]  ;;  %7239 = vmatprep.mubr.bf16.mxu0 %v8789_v42  ;;  %v491_v37 = vshrl.u32 %v388_v15, 16  ;;  %v494_v42 = vshll.u32 %v388_v15, 16 }
  0xd7   : > { %7234 = vmatpush1.bf16.msra.mxu0 %v10026_v26  ;;  %6463 = vmatprep.subr.bf16.mxu1 %v10027_v31  ;;  %v10041_v26 = vld [vmem:[#allocation8 + $0x504] ss:$8 sps:$4 sm:$0xff]   ;;  %v2363_v29 = vor.u32 %v2362_v17, %v2358_v16  ;;  %v462_v31 = vor.u32 %v460_v22, %v459_v20  ;;  %v2366_v51 = vshll.u32 %v2279_v45, 16  ;;  %v2378_v7 = vrot.slane %v2377_v58, 4  ;;  %v11141_v58 = vld [vmem:[%s10932_s17 + $0x50] sm:$0xff] }
  0xd8   : > { %7235 = vmatprep.subr.bf16.mxu0 %v10029_v32  ;;  %v464_v32 = vrot.slane %v459_v20, 4  ;;  %v11087_v38 = vsel %vm11053_vm2, %v2354_v28, %v2358_v16  ;;  %v476_v16 = vrot.slane %v474_v5, 7  ;;  %v10045_v28 = vld [vmem:[#allocation8 + $0x520] ss:$8 sps:$4 sm:$0xff]   ;;  %v500_v15 = vshrl.u32 %v11141_v58, 16 }
  0xd9   : > { %v2364_v39 = vrot.slane %v2363_v29, 4  ;;  %v2368_v63 = vrot.slane %v2366_v51, 5  ;;  %v10048_v51 = vld [vmem:[#allocation8 + $0x530] ss:$8 sps:$4 sm:$0xff]   ;;  %v11189_v44 = vld [vmem:[%s10932_s17 + $0x68] sm:$0xff] }
  0xda   : > { %6464 = vmatpush1.bf16.msra.mxu1 %v10031_v47  ;;  %v11091_v47 = vsel %vm10975_vm7, %v455_v14, %v462_v31  ;;  %v387_v14 = vld [vmem:[%s10932_s17 + $0x40] sm:$0xff]  ;;  %v479_v29 = vor.u32 %v477_v11, %v476_v16  ;;  %v481_v30 = vrot.slane %v476_v16, 4 }
  0xdb   : > { %7236 = vmatpush1.bf16.msra.mxu0 %v10032_v53  ;;  %6465 = vmatprep.subr.bf16.mxu1 %v10033_v59  ;;  %765 = vst [vmem:[#allocation2 + $0x50] sm:$0xff] %v11091_v47  ;;  %v767_v53 = vsel %vm11011_vm0, %v464_v32, %v766_v33  ;;  %v2380_v55 = vshll.u32 %v11091_v47, 16  ;;  %v2384_v56 = vshrl.u32 %v11091_v47, 16  ;;  %v8651_v59 = vcombine.high %v11076_v23, %v11091_v47  ;;  %v10050_v33 = vld [vmem:[#allocation8 + $0x534] ss:$8 sps:$4 sm:$0xff]  }
  0xdc   : > { %7237 = vmatprep.subr.bf16.mxu0 %v10035_v0  ;;  %768 = vst [vmem:[#allocation2 + $0x58] sm:$0x11] %v767_v53  ;;  %v8650_v17 = vcombine.low %v11076_v23, %v11091_v47  ;;  %v483_v34 = vshrl.u32 %v387_v14, 16  ;;  %v486_v36 = vshll.u32 %v387_v14, 16  ;;  %v774_v40 = vsel %vm11011_vm0, %v481_v30, %v773_v13  ;;  %v10051_v13 = vld [vmem:[#allocation8 + $0x540] ss:$8 sps:$4 sm:$0xff]  }
  0xdd   : > { %v2382_v0 = vrot.slane %v2380_v55, 5  ;;  %v2386_v3 = vrot.slane %v2384_v56, 4  ;;  %775 = vst [vmem:[#allocation2 + $0x70] sm:$0x11] %v774_v40  ;;  %v493_v56 = vrot.slane %v491_v37, 7  ;;  %v11149_v14 = vld [vmem:[%s10932_s17 + $0x58] sm:$0xff] }
  0xde   : > { %6466 = vmatpush1.bf16.msra.mxu1 %v10037_v9  ;;  %v471_v9 = vor.u32 %v469_v62, %v468_v60  ;;  %v485_v55 = vrot.slane %v483_v34, 7  ;;  %v10071_v60 = vld [vmem:[#allocation8 + $0x114] ss:$8 sps:$4 sm:$0xff]   ;;  %v502_v40 = vrot.slane %v500_v15, 7  ;;  %v10059_v61 = vld [vmem:[#allocation8 + $0x564] ss:$8 sps:$4 sm:$0xff]  }
  0xdf   : > { %7238 = vmatpush1.bf16.msra.mxu0 %v10038_v19  ;;  %v2387_v1 = vor.u32 %v2386_v3, %v2382_v0  ;;  %v11115_v20 = vsel %vm11053_vm2, %v2378_v7, %v2382_v0  ;;  %6628 = vmatprep.subr.bf16.mxu1 %v10065_v24  ;;  %v498_v5 = vrot.slane %v493_v56, 4  ;;  %v10053_v7 = vld [vmem:[#allocation8 + $0x544] ss:$8 sps:$4 sm:$0xff]   ;;  %v10080_v30 = vld [vmem:[#allocation8 + $0x134] ss:$8 sps:$4 sm:$0xff]  }
  0xe0   : > { %7400 = vmatprep.subr.bf16.mxu0 %v10041_v26  ;;  %v11119_v22 = vsel %vm10999_vm15, %v471_v9, 0  ;;  %v488_v0 = vor.u32 %v486_v36, %v485_v55  ;;  %v489_v3 = vrot.slane %v485_v55, 4  ;;  %v10074_v9 = vld [vmem:[#allocation8 + $0x124] ss:$8 sps:$4 sm:$0xff]  }
  0xe1   : > { %6468 = vmatmul.mubr.bf16.vlgmr.msra.gmra.mrb[0].mxu1 %v11005_v6  ;;  %v2369_v6 = vsel %vm11053_vm2, %v2364_v39, %v2368_v63  ;;  %v2388_v26 = vrot.slane %v2387_v1, 4  ;;  %771 = vst [vmem:[#allocation2 + $0x60] sm:$0xff] %v11119_v22  ;;  %v2395_v31 = vshrl.u32 %v11119_v22, 16  ;;  %v2398_v32 = vshll.u32 %v11119_v22, 16  ;;  %v780_v63 = vld [vmem:[#allocation2 + $0x88] sm:$0x11] }
  0xe2   : > { %7240 = vmatmul.mubr.bf16.vlgmr.msra.gmra.mrb[0].mxu0 %v8788_v41  ;;  %6477 = vmatprep.mubr.bf16.mxu1 %v8647_v35  ;;  %v8791_v19 = vcombine.high %v11087_v38, %v2369_v6  ;;  %v8790_v35 = vcombine.low %v11087_v38, %v2369_v6  ;;  %v11126_v39 = vsel %vm10975_vm7, %v472_v10, %v479_v29  ;;  %v10072_v6 = vld [vmem:[#allocation8 + $0x120] ss:$8 sps:$4 sm:$0xff]   ;;  %v10078_v29 = vld [vmem:[#allocation8 + $0x130] ss:$8 sps:$4 sm:$0xff]  }
  0xe3   : > { %7401 = vmatpush1.bf16.msra.mxu0 %v10039_v43  ;;  %v2282_v38 = vld [vmem:[#allocation2 + $0x58] sm:$0x11]  ;;  %v2397_v41 = vrot.slane %v2395_v31, 4  ;;  %772 = vst [vmem:[#allocation2 + $0x68] sm:$0xff] %v11126_v39  ;;  %v2400_v45 = vrot.slane %v2398_v32, 5  ;;  %v2404_v49 = vshll.u32 %v11126_v39, 16  ;;  %6629 = vmatpush1.bf16.msra.mxu1 %v10063_v18  ;;  %v8653_v53 = vcombine.high %v11119_v22, %v11126_v39 }
  0xe4   : > { %7402 = vmatprep.subr.bf16.mxu0 %v10044_v52  ;;  %7249 = vmatprep.mubr.bf16.mxu0 %v8791_v19  ;;  %v2390_v43 = vshll.u32 %v2282_v38, 16  ;;  %v2408_v50 = vshrl.u32 %v11126_v39, 16  ;;  %v10069_v52 = vld [vmem:[#allocation8 + $0x110] ss:$8 sps:$4 sm:$0xff]   ;;  %v11160_v19 = vsel %vm10999_vm15, %v488_v0, 0 }
  0xe5   : > { %v2401_v21 = vor.u32 %v2400_v45, %v2397_v41  ;;  %v2406_v27 = vrot.slane %v2404_v49, 5  ;;  %6630 = vmatprep.subr.bf16.mxu1 %v10071_v60  ;;  %778 = vst [vmem:[#allocation2 + $0x78] sm:$0xff] %v11160_v19  ;;  %v2285_v31 = vld [vmem:[#allocation2 + $0x70] sm:$0x11]  ;;  %v2422_v32 = vshll.u32 %v11160_v19, 16  ;;  %v503_v41 = vshll.u32 %v11141_v58, 16 }
  0xe6   : > { %v2392_v62 = vrot.slane %v2390_v43, 5  ;;  %v2414_v37 = vshll.u32 %v2285_v31, 16  ;;  %v511_v58 = vshll.u32 %v11149_v14, 16 }
  0xe7   : > { %7403 = vmatpush1.bf16.msra.mxu0 %v10042_v57  ;;  %v8652_v57 = vcombine.low %v11119_v22, %v11126_v39  ;;  %v2402_v11 = vrot.slane %v2401_v21, 4  ;;  %6631 = vmatpush1.bf16.msra.mxu1 %v10069_v52  ;;  %v2424_v43 = vrot.slane %v2422_v32, 5  ;;  %v505_v55 = vor.u32 %v503_v41, %v502_v40  ;;  %v787_v21 = vld [vmem:[#allocation2 + $0xa0] sm:$0x11]  ;;  %v794_v41 = vld [vmem:[#allocation2 + $0xb8] sm:$0x11] }
  0xe8   : > { %7404 = vmatprep.subr.bf16.mxu0 %v10047_v4  ;;  %v496_v4 = vor.u32 %v494_v42, %v493_v56  ;;  %v2393_v10 = vsel %vm11053_vm2, %v2388_v26, %v2392_v62  ;;  %6632 = vmatprep.subr.bf16.mxu1 %v10074_v9  ;;  %v10054_v42 = vld [vmem:[#allocation8 + $0x550] ss:$8 sps:$4 sm:$0xff]   ;;  %v2416_v52 = vrot.slane %v2414_v37, 5  ;;  %v506_v56 = vrot.slane %v502_v40, 4 }
  0xe9   : > { %6478 = vmatmul.mubr.bf16.gmra.mrb[4].mxu1 %v8646_v46  ;;  %v2410_v46 = vrot.slane %v2408_v50, 4  ;;  %v8793_v1 = vcombine.high %v11115_v20, %v2393_v10  ;;  %v8792_v16 = vcombine.low %v11115_v20, %v2393_v10  ;;  %v11164_v24 = vsel %vm11053_vm2, %v2402_v11, %v2406_v27 }
  0xea   : > { %7250 = vmatmul.mubr.bf16.gmra.mrb[4].mxu0 %v8790_v35  ;;  %6487 = vmatprep.mubr.bf16.mxu1 %v8649_v12  ;;  %v11156_v18 = vsel %vm10975_vm7, %v489_v3, %v496_v4  ;;  %v10056_v35 = vld [vmem:[#allocation8 + $0x554] ss:$8 sps:$4 sm:$0xff]   ;;  %v781_v20 = vsel %vm11011_vm0, %v498_v5, %v780_v63  ;;  %v508_v50 = vshrl.u32 %v11149_v14, 16  ;;  %v10057_v5 = vld [vmem:[#allocation8 + $0x560] ss:$8 sps:$4 sm:$0xff]  }
  0xeb   : > { %7405 = vmatpush1.bf16.msra.mxu0 %v10045_v28  ;;  %v2411_v12 = vor.u32 %v2410_v46, %v2406_v27  ;;  %779 = vst [vmem:[#allocation2 + $0x80] sm:$0xff] %v11156_v18  ;;  %v2419_v28 = vshrl.u32 %v11160_v19, 16  ;;  %7259 = vmatprep.mubr.bf16.mxu0 %v8793_v1  ;;  %782 = vst [vmem:[#allocation2 + $0x88] sm:$0x11] %v781_v20  ;;  %v2432_v34 = vshrl.u32 %v11156_v18, 16  ;;  %v11195_v63 = vld [vmem:[#allocation2] sm:$0xff] }
  0xec   : > { %7406 = vmatprep.subr.bf16.mxu0 %v10050_v33  ;;  %v2428_v33 = vshll.u32 %v11156_v18, 16  ;;  %v8655_v36 = vcombine.high %v11160_v19, %v11156_v18  ;;  %6633 = vmatpush1.bf16.msra.mxu1 %v10072_v6  ;;  %v510_v62 = vrot.slane %v508_v50, 7  ;;  %v8654_v27 = vcombine.low %v11160_v19, %v11156_v18  ;;  %v10083_v46 = vld [vmem:[#allocation8 + $0x144] ss:$8 sps:$4 sm:$0xff]  }
  0xed   : > { %v2412_v26 = vrot.slane %v2411_v12, 4  ;;  %v2421_v38 = vrot.slane %v2419_v28, 4  ;;  %v2434_v49 = vrot.slane %v2432_v34, 4  ;;  %6634 = vmatprep.subr.bf16.mxu1 %v10080_v30  ;;  %v11200_v0 = vsel %vm10999_vm15, %v505_v55, %v11195_v63  ;;  %v10089_v28 = vld [vmem:[#allocation8 + $0x154] ss:$8 sps:$4 sm:$0xff]  }
  0xee   : > { %v2430_v45 = vrot.slane %v2428_v33, 5  ;;  %785 = vst [vmem:[#allocation2 + $0x90] sm:$0xff] %v11200_v0  ;;  %v513_v15 = vor.u32 %v511_v58, %v510_v62  ;;  %v515_v6 = vrot.slane %v510_v62, 4  ;;  %v2443_v1 = vshrl.u32 %v11200_v0, 16  ;;  %v10087_v33 = vld [vmem:[#allocation8 + $0x150] ss:$8 sps:$4 sm:$0xff]  }
  0xef   : > { %7407 = vmatpush1.bf16.msra.mxu0 %v10048_v51  ;;  %v11182_v51 = vld [vmem:[%s10932_s17 + $0x60] sm:$0xff]  ;;  %v525_v20 = vshrl.u32 %v11189_v44, 16 }
  0xf0   : > { %7408 = vmatprep.subr.bf16.mxu0 %v10053_v7  ;;  %v2435_v60 = vor.u32 %v2434_v49, %v2430_v45  ;;  %v517_v3 = vshrl.u32 %v11182_v51, 16  ;;  %v520_v4 = vshll.u32 %v11182_v51, 16  ;;  %6635 = vmatpush1.bf16.msra.mxu1 %v10078_v29  ;;  %v10081_v7 = vld [vmem:[#allocation8 + $0x140] ss:$8 sps:$4 sm:$0xff]   ;;  %v11216_v29 = vsel %vm10975_vm7, %v506_v56, %v513_v15  ;;  %v10068_v55 = vld [vmem:[#allocation8 + $0x584] ss:$8 sps:$4 sm:$0xff]  }
  0xf1   : > { %6488 = vmatmul.mubr.bf16.gmra.mrb[8].mxu1 %v8648_v25  ;;  %v2425_v25 = vor.u32 %v2424_v43, %v2421_v38  ;;  %6636 = vmatprep.subr.bf16.mxu1 %v10083_v46  ;;  %v788_v30 = vsel %vm11011_vm0, %v515_v6, %v787_v21  ;;  %v2445_v31 = vrot.slane %v2443_v1, 4  ;;  %786 = vst [vmem:[#allocation2 + $0x98] sm:$0xff] %v11216_v29  ;;  %v2452_v37 = vshll.u32 %v11216_v29, 16  ;;  %v11259_v6 = vld [vmem:[%s10932_s17 + $0x80] sm:$0xff]  ;;  %v10098_v1 = vld [vmem:[#allocation8 + $0x174] ss:$8 sps:$4 sm:$0xff]  }
  0xf2   : > { %7260 = vmatmul.mubr.bf16.gmra.mrb[8].mxu0 %v8792_v16  ;;  %6497 = vmatprep.mubr.bf16.mxu1 %v8651_v59  ;;  %v2417_v59 = vsel %vm11053_vm2, %v2412_v26, %v2416_v52  ;;  %v2436_v12 = vrot.slane %v2435_v60, 4  ;;  %v2288_v14 = vld [vmem:[#allocation2 + $0x88] sm:$0x11]  ;;  %v2446_v16 = vshll.u32 %v11200_v0, 16  ;;  %v519_v26 = vrot.slane %v517_v3, 7 }
  0xf3   : > { %7409 = vmatpush1.bf16.msra.mxu0 %v10051_v13  ;;  %v8795_v9 = vcombine.high %v11164_v24, %v2417_v59  ;;  %v8794_v10 = vcombine.low %v11164_v24, %v2417_v59  ;;  %v2426_v11 = vrot.slane %v2425_v25, 4  ;;  %v10062_v13 = vld [vmem:[#allocation8 + $0x574] ss:$8 sps:$4 sm:$0xff]   ;;  %v2438_v24 = vshll.u32 %v2288_v14, 16  ;;  %789 = vst [vmem:[#allocation2 + $0xa0] sm:$0x11] %v788_v30 }
  0xf4   : > { %7410 = vmatprep.subr.bf16.mxu0 %v10056_v35  ;;  %v2448_v32 = vrot.slane %v2446_v16, 5  ;;  %6637 = vmatpush1.bf16.msra.mxu1 %v10081_v7  ;;  %v2456_v38 = vshrl.u32 %v11216_v29, 16  ;;  %v8657_v40 = vcombine.high %v11200_v0, %v11216_v29  ;;  %v522_v47 = vor.u32 %v520_v4, %v519_v26  ;;  %v393_v25 = vld [vmem:[%s10932_s17 + $0x70] sm:$0xff]  ;;  %v10090_v60 = vld [vmem:[#allocation8 + $0x160] ss:$8 sps:$4 sm:$0xff]   ;;  %v394_v59 = vld [vmem:[%s10932_s17 + $0x78] sm:$0xff] }
  0xf5   : > { %7269 = vmatprep.mubr.bf16.mxu0 %v8795_v9  ;;  %v11211_v35 = vsel %vm11053_vm2, %v2426_v11, %v2430_v45  ;;  %v2440_v34 = vrot.slane %v2438_v24, 5  ;;  %v527_v43 = vrot.slane %v525_v20, 7  ;;  %v10092_v45 = vld [vmem:[#allocation8 + $0x164] ss:$8 sps:$4 sm:$0xff]   ;;  %v2454_v50 = vrot.slane %v2452_v37, 5  ;;  %6638 = vmatprep.subr.bf16.mxu1 %v10089_v28 }
  0xf6   : > { %v2449_v23 = vor.u32 %v2448_v32, %v2445_v31  ;;  %v2458_v51 = vrot.slane %v2456_v38, 4  ;;  %v528_v52 = vshll.u32 %v11189_v44, 16  ;;  %v11240_v46 = vsel %vm10999_vm15, %v522_v47, %v11195_v63  ;;  %v10066_v3 = vld [vmem:[#allocation8 + $0x580] ss:$8 sps:$4 sm:$0xff]   ;;  %v10077_v4 = vld [vmem:[#allocation8 + $0x594] ss:$8 sps:$4 sm:$0xff]  }
  0xf7   : > { %7411 = vmatpush1.bf16.msra.mxu0 %v10054_v42  ;;  %v10060_v42 = vld [vmem:[#allocation8 + $0x570] ss:$8 sps:$4 sm:$0xff]   ;;  %v2441_v49 = vsel %vm11053_vm2, %v2436_v12, %v2440_v34  ;;  %v8656_v44 = vcombine.low %v11200_v0, %v11216_v29  ;;  %792 = vst [vmem:[#allocation2 + $0xa8] sm:$0xff] %v11240_v46  ;;  %v2467_v9 = vshrl.u32 %v11240_v46, 16  ;;  %v534_v14 = vshrl.u32 %v393_v25, 16 }
  0xf8   : > { %7412 = vmatprep.subr.bf16.mxu0 %v10059_v61  ;;  %v8796_v56 = vcombine.low %v11211_v35, %v2441_v49  ;;  %v2450_v58 = vrot.slane %v2449_v23, 4  ;;  %v532_v61 = vrot.slane %v527_v43, 4  ;;  %6639 = vmatpush1.bf16.msra.mxu1 %v10087_v33  ;;  %v2459_v62 = vor.u32 %v2458_v51, %v2454_v50  ;;  %v10096_v11 = vld [vmem:[#allocation8 + $0x170] ss:$8 sps:$4 sm:$0xff]   ;;  %v10101_v33 = vld [vmem:[#allocation8 + $0x184] ss:$8 sps:$4 sm:$0xff]  }
  0xf9   : > { %6498 = vmatmul.mubr.bf16.gmra.mrb[12].mxu1 %v8650_v17  ;;  %v523_v17 = vrot.slane %v519_v26, 4  ;;  %v530_v21 = vor.u32 %v528_v52, %v527_v43  ;;  %6640 = vmatprep.subr.bf16.mxu1 %v10092_v45  ;;  %v537_v15 = vshll.u32 %v393_v25, 16  ;;  %v536_v31 = vrot.slane %v534_v14, 7  ;;  %v10086_v47 = vld [vmem:[#allocation8 + $0x5a4] ss:$8 sps:$4 sm:$0xff]  }
  0xfa   : > { %7270 = vmatmul.mubr.bf16.gmra.mrb[12].mxu0 %v8794_v10  ;;  %6507 = vmatprep.mubr.bf16.mxu1 %v8653_v53  ;;  %v8797_v53 = vcombine.high %v11211_v35, %v2441_v49  ;;  %v795_v7 = vsel %vm11011_vm0, %v532_v61, %v794_v41  ;;  %v2470_v10 = vshll.u32 %v11240_v46, 16  ;;  %v2460_v12 = vrot.slane %v2459_v62, 4  ;;  %v2291_v16 = vld [vmem:[#allocation2 + $0xa0] sm:$0x11]  ;;  %v801_v45 = vld [vmem:[#allocation2 + $0xd0] sm:$0x11] }
  0xfb   : > { %7413 = vmatpush1.bf16.msra.mxu0 %v10057_v5  ;;  %v11247_v5 = vsel %vm11053_vm2, %v2450_v58, %v2454_v50  ;;  %796 = vst [vmem:[#allocation2 + $0xb8] sm:$0x11] %v795_v7  ;;  %v2469_v35 = vrot.slane %v2467_v9, 4  ;;  %v2462_v28 = vshll.u32 %v2291_v16, 16  ;;  %v542_v32 = vshrl.u32 %v394_v59, 16 }
  0xfc   : > { %7414 = vmatprep.subr.bf16.mxu0 %v10062_v13  ;;  %7279 = vmatprep.mubr.bf16.mxu0 %v8797_v53  ;;  %v11256_v13 = vsel %vm10975_vm7, %v523_v17, %v530_v21  ;;  %v2472_v24 = vrot.slane %v2470_v10, 5  ;;  %v545_v41 = vshll.u32 %v394_v59, 16  ;;  %v539_v39 = vor.u32 %v537_v15, %v536_v31  ;;  %v10099_v50 = vld [vmem:[#allocation8 + $0x180] ss:$8 sps:$4 sm:$0xff]   ;;  %v10095_v61 = vld [vmem:[#allocation8 + $0x5b4] ss:$8 sps:$4 sm:$0xff]  }
  0xfd   : > { %793 = vst [vmem:[#allocation2 + $0xb0] sm:$0xff] %v11256_v13  ;;  %v2476_v26 = vshll.u32 %v11256_v13, 16  ;;  %v2480_v20 = vshrl.u32 %v11256_v13, 16  ;;  %6641 = vmatpush1.bf16.msra.mxu1 %v10090_v60  ;;  %v8659_v30 = vcombine.high %v11240_v46, %v11256_v13  ;;  %v2464_v22 = vrot.slane %v2462_v28, 5  ;;  %v10084_v58 = vld [vmem:[#allocation8 + $0x5a0] ss:$8 sps:$4 sm:$0xff]  }
  0xfe   : > { %v2473_v34 = vor.u32 %v2472_v24, %v2469_v35  ;;  %v544_v23 = vrot.slane %v542_v32, 7  ;;  %6642 = vmatprep.subr.bf16.mxu1 %v10098_v1  ;;  %v551_v49 = vshrl.u32 %v11259_v6, 16  ;;  %v11280_v53 = vsel %vm10999_vm15, %v539_v39, %v11195_v63  ;;  %v10105_v9 = vld [vmem:[#allocation8 + $0x190] ss:$8 sps:$4 sm:$0xff]   ;;  %v10107_v10 = vld [vmem:[#allocation8 + $0x194] ss:$8 sps:$4 sm:$0xff]  }
  0xff   : > { %7415 = vmatpush1.bf16.msra.mxu0 %v10060_v42  ;;  %v2478_v37 = vrot.slane %v2476_v26, 5  ;;  %v2482_v38 = vrot.slane %v2480_v20, 4  ;;  %v10075_v42 = vld [vmem:[#allocation8 + $0x590] ss:$8 sps:$4 sm:$0xff]   ;;  %v2465_v51 = vsel %vm11053_vm2, %v2460_v12, %v2464_v22  ;;  %799 = vst [vmem:[#allocation2 + $0xc0] sm:$0xff] %v11280_v53  ;;  %v554_v26 = vshll.u32 %v11259_v6, 16 }
 0x100   : > { %7416 = vmatprep.subr.bf16.mxu0 %v10068_v55  ;;  %v2474_v17 = vrot.slane %v2473_v34, 4  ;;  %v547_v52 = vor.u32 %v545_v41, %v544_v23  ;;  %v549_v55 = vrot.slane %v544_v23, 4  ;;  %v8799_v25 = vcombine.high %v11247_v5, %v2465_v51  ;;  %v11306_v1 = vld [vmem:[%s10932_s17 + $0x90] sm:$0xff]  ;;  %v10110_v20 = vld [vmem:[#allocation8 + $0x1a4] ss:$8 sps:$4 sm:$0xff]  }
 0x101   : > { %6508 = vmatmul.mubr.bf16.gmra.mrb[16].mxu1 %v8652_v57  ;;  %v540_v57 = vrot.slane %v536_v31, 4  ;;  %v2483_v43 = vor.u32 %v2482_v38, %v2478_v37  ;;  %v8798_v60 = vcombine.low %v11247_v5, %v2465_v51  ;;  %v2491_v5 = vshrl.u32 %v11280_v53, 16  ;;  %v10093_v34 = vld [vmem:[#allocation8 + $0x5b0] ss:$8 sps:$4 sm:$0xff]   ;;  %v10104_v6 = vld [vmem:[#allocation8 + $0x5c4] ss:$8 sps:$4 sm:$0xff]  }
 0x102   : > { %7280 = vmatmul.mubr.bf16.gmra.mrb[16].mxu0 %v8796_v56  ;;  %6517 = vmatprep.mubr.bf16.mxu1 %v8655_v36  ;;  %v8658_v36 = vcombine.low %v11240_v46, %v11256_v13  ;;  %v11283_v56 = vld [vmem:[%s10932_s17 + $0x88] sm:$0xff]  ;;  %v11289_v21 = vsel %vm11053_vm2, %v2474_v17, %v2478_v37  ;;  %v802_v7 = vsel %vm11011_vm0, %v549_v55, %v801_v45  ;;  %v553_v24 = vrot.slane %v551_v49, 7  ;;  %v808_v22 = vld [vmem:[#allocation2 + $0xe8] sm:$0x11] }
 0x103   : > { %7417 = vmatpush1.bf16.msra.mxu0 %v10066_v3  ;;  %6643 = vmatpush1.bf16.msra.mxu1 %v10096_v11  ;;  %v2294_v62 = vld [vmem:[#allocation2 + $0xb8] sm:$0x11]  ;;  %v2484_v59 = vrot.slane %v2483_v43, 4  ;;  %803 = vst [vmem:[#allocation2 + $0xd0] sm:$0x11] %v802_v7  ;;  %v2494_v11 = vshll.u32 %v11280_v53, 16 }
 0x104   : > { %7418 = vmatprep.subr.bf16.mxu0 %v10077_v4  ;;  %6644 = vmatprep.subr.bf16.mxu1 %v10101_v33  ;;  %v2486_v3 = vshll.u32 %v2294_v62, 16  ;;  %v11294_v4 = vsel %vm10975_vm7, %v540_v57, %v547_v52  ;;  %v2493_v35 = vrot.slane %v2491_v5, 4  ;;  %v559_v33 = vshrl.u32 %v11283_v56, 16  ;;  %v10102_v39 = vld [vmem:[#allocation8 + $0x5c0] ss:$8 sps:$4 sm:$0xff]   ;;  %v398_v55 = vld [vmem:[%s10932_s17 + $0x98] sm:$0xff] }
 0x105   : > { %7289 = vmatprep.mubr.bf16.mxu0 %v8799_v25  ;;  %800 = vst [vmem:[#allocation2 + $0xc8] sm:$0xff] %v11294_v4  ;;  %v2500_v12 = vshll.u32 %v11294_v4, 16  ;;  %v2504_v14 = vshrl.u32 %v11294_v4, 16  ;;  %v8661_v15 = vcombine.high %v11280_v53, %v11294_v4  ;;  %v2496_v28 = vrot.slane %v2494_v11, 5  ;;  %v10108_v57 = vld [vmem:[#allocation8 + $0x1a0] ss:$8 sps:$4 sm:$0xff]  }
 0x106   : > { %v2488_v16 = vrot.slane %v2486_v3, 5  ;;  %v556_v19 = vor.u32 %v554_v26, %v553_v24  ;;  %v562_v37 = vshll.u32 %v11283_v56, 16  ;;  %v561_v23 = vrot.slane %v559_v33, 7  ;;  %v10113_v45 = vld [vmem:[#allocation8 + $0x5d4] ss:$8 sps:$4 sm:$0xff]  }
 0x107   : > { %7419 = vmatpush1.bf16.msra.mxu0 %v10075_v42  ;;  %6645 = vmatpush1.bf16.msra.mxu1 %v10099_v50  ;;  %v2502_v31 = vrot.slane %v2500_v12, 5  ;;  %v2506_v32 = vrot.slane %v2504_v14, 4  ;;  %v2497_v41 = vor.u32 %v2496_v28, %v2493_v35  ;;  %v8660_v17 = vcombine.low %v11280_v53, %v11294_v4  ;;  %v10116_v56 = vld [vmem:[#allocation8 + $0x1b4] ss:$8 sps:$4 sm:$0xff]   ;;  %v10114_v5 = vld [vmem:[#allocation8 + $0x1b0] ss:$8 sps:$4 sm:$0xff]  }
 0x108   : > { %7420 = vmatprep.subr.bf16.mxu0 %v10086_v47  ;;  %v2489_v18 = vsel %vm11053_vm2, %v2484_v59, %v2488_v16  ;;  %6646 = vmatprep.subr.bf16.mxu1 %v10107_v10  ;;  %v11324_v47 = vsel %vm10999_vm15, %v556_v19, %v11195_v63  ;;  %v568_v43 = vshrl.u32 %v11306_v1, 16  ;;  %v566_v25 = vrot.slane %v561_v23, 4  ;;  %v10119_v12 = vld [vmem:[#allocation8 + $0x1c4] ss:$8 sps:$4 sm:$0xff]   ;;  %v10111_v16 = vld [vmem:[#allocation8 + $0x5d0] ss:$8 sps:$4 sm:$0xff]  }
 0x109   : > { %6518 = vmatmul.mubr.bf16.gmra.mrb[20].mxu1 %v8654_v27  ;;  %v557_v27 = vrot.slane %v553_v24, 4  ;;  %v8801_v38 = vcombine.high %v11289_v21, %v2489_v18  ;;  %v2507_v42 = vor.u32 %v2506_v32, %v2502_v31  ;;  %v2498_v49 = vrot.slane %v2497_v41, 4  ;;  %806 = vst [vmem:[#allocation2 + $0xd8] sm:$0xff] %v11324_v47 }
 0x10a   : > { %7290 = vmatmul.mubr.bf16.gmra.mrb[20].mxu0 %v8798_v60  ;;  %6527 = vmatprep.mubr.bf16.mxu1 %v8657_v40  ;;  %v8800_v40 = vcombine.low %v11289_v21, %v2489_v18  ;;  %v2515_v51 = vshrl.u32 %v11324_v47, 16  ;;  %v2518_v52 = vshll.u32 %v11324_v47, 16  ;;  %v11333_v60 = vrot.slane %v568_v43, 7  ;;  %v10117_v18 = vld [vmem:[#allocation8 + $0x1c0] ss:$8 sps:$4 sm:$0xff]  }
 0x10b   : > { %7421 = vmatpush1.bf16.msra.mxu0 %v10084_v58  ;;  %6647 = vmatpush1.bf16.msra.mxu1 %v10105_v9  ;;  %v2508_v50 = vrot.slane %v2507_v42, 4  ;;  %v2297_v58 = vld [vmem:[#allocation2 + $0xd0] sm:$0x11]  ;;  %v571_v62 = vshll.u32 %v11306_v1, 16  ;;  %v11338_v21 = vsel %vm11053_vm2, %v2498_v49, %v2502_v31  ;;  %v809_v10 = vsel %vm11011_vm0, %v566_v25, %v808_v22 }
 0x10c   : > { %7422 = vmatprep.subr.bf16.mxu0 %v10095_v61  ;;  %6648 = vmatprep.subr.bf16.mxu1 %v10110_v20  ;;  %v564_v61 = vor.u32 %v562_v37, %v561_v23  ;;  %v2510_v59 = vshll.u32 %v2297_v58, 16  ;;  %v2517_v3 = vrot.slane %v2515_v51, 4  ;;  %v2520_v7 = vrot.slane %v2518_v52, 5  ;;  %810 = vst [vmem:[#allocation2 + $0xe8] sm:$0x11] %v809_v10  ;;  %v11357_v1 = vld [vmem:[%s10932_s17 + $0xa0] sm:$0xff] }
 0x10d   : > { %7299 = vmatprep.mubr.bf16.mxu0 %v8801_v38  ;;  %v573_v11 = vor.u32 %v571_v62, %v11333_v60  ;;  %v574_v35 = vrot.slane %v11333_v60, 4  ;;  %v576_v24 = vshrl.u32 %v398_v55, 16  ;;  %v579_v26 = vshll.u32 %v398_v55, 16  ;;  %v10122_v20 = vld [vmem:[#allocation8 + $0x5e4] ss:$8 sps:$4 sm:$0xff]  }
 0x10e   : > { %v11345_v9 = vsel %vm10975_vm7, %v557_v27, %v564_v61  ;;  %v2512_v14 = vrot.slane %v2510_v59, 5  ;;  %v2521_v0 = vor.u32 %v2520_v7, %v2517_v3  ;;  %v400_v38 = vld [vmem:[%s10932_s17 + $0xa8] sm:$0xff]  ;;  %v10125_v23 = vld [vmem:[#allocation8 + $0x1d4] ss:$8 sps:$4 sm:$0xff]   ;;  %v10129_v7 = vld [vmem:[#allocation8 + $0x5f0] ss:$8 sps:$4 sm:$0xff]  }
 0x10f   : > { %7423 = vmatpush1.bf16.msra.mxu0 %v10093_v34  ;;  %6649 = vmatpush1.bf16.msra.mxu1 %v10108_v57  ;;  %807 = vst [vmem:[#allocation2 + $0xe0] sm:$0xff] %v11345_v9  ;;  %v2524_v29 = vshll.u32 %v11345_v9, 16  ;;  %v815_v34 = vld [vmem:[#allocation2 + $0x100] sm:$0x11]  ;;  %v578_v37 = vrot.slane %v576_v24, 7  ;;  %v8663_v22 = vcombine.high %v11324_v47, %v11345_v9  ;;  %v593_v58 = vshrl.u32 %v400_v38, 16 }
 0x110   : > { %7424 = vmatprep.subr.bf16.mxu0 %v10104_v6  ;;  %6650 = vmatprep.subr.bf16.mxu1 %v10116_v56  ;;  %v2513_v28 = vsel %vm11053_vm2, %v2508_v50, %v2512_v14  ;;  %v2522_v31 = vrot.slane %v2521_v0, 4  ;;  %v10123_v57 = vld [vmem:[#allocation8 + $0x1d0] ss:$8 sps:$4 sm:$0xff]   ;;  %v585_v50 = vshrl.u32 %v11357_v1, 16  ;;  %v10131_v51 = vld [vmem:[#allocation8 + $0x5f4] ss:$8 sps:$4 sm:$0xff]  }
 0x111   : > { %6528 = vmatmul.mubr.bf16.gmra.mrb[24].mxu1 %v8656_v44  ;;  %v2528_v44 = vshrl.u32 %v11345_v9, 16  ;;  %v2526_v32 = vrot.slane %v2524_v29, 5  ;;  %v8803_v19 = vcombine.high %v11338_v21, %v2513_v28  ;;  %v8802_v27 = vcombine.low %v11338_v21, %v2513_v28  ;;  %v10128_v59 = vld [vmem:[#allocation8 + $0x1e4] ss:$8 sps:$4 sm:$0xff]  }
 0x112   : > { %7300 = vmatmul.mubr.bf16.gmra.mrb[24].mxu0 %v8800_v40  ;;  %6537 = vmatprep.mubr.bf16.mxu1 %v8659_v30  ;;  %v11363_v30 = vsel %vm10999_vm15, %v573_v11, %v11195_v63  ;;  %v10120_v40 = vld [vmem:[#allocation8 + $0x5e0] ss:$8 sps:$4 sm:$0xff]   ;;  %v581_v43 = vor.u32 %v579_v26, %v578_v37  ;;  %v588_v56 = vshll.u32 %v11357_v1, 16  ;;  %v587_v62 = vrot.slane %v585_v50, 7 }
 0x113   : > { %7425 = vmatpush1.bf16.msra.mxu0 %v10102_v39  ;;  %v2530_v33 = vrot.slane %v2528_v44, 4  ;;  %813 = vst [vmem:[#allocation2 + $0xf0] sm:$0xff] %v11363_v30  ;;  %6651 = vmatpush1.bf16.msra.mxu1 %v10114_v5  ;;  %v2539_v6 = vshrl.u32 %v11363_v30, 16  ;;  %v11374_v41 = vsel %vm11053_vm2, %v2522_v31, %v2526_v32  ;;  %v2542_v39 = vshll.u32 %v11363_v30, 16  ;;  %v2300_v61 = vld [vmem:[#allocation2 + $0xe8] sm:$0x11] }
 0x114   : > { %7426 = vmatprep.subr.bf16.mxu0 %v10113_v45  ;;  %6652 = vmatprep.subr.bf16.mxu1 %v10119_v12  ;;  %v583_v45 = vrot.slane %v578_v37, 4  ;;  %v11386_v25 = vsel %vm10975_vm7, %v574_v35, %v581_v43  ;;  %v596_v21 = vshll.u32 %v400_v38, 16  ;;  %v2534_v3 = vshll.u32 %v2300_v61, 16  ;;  %v822_v14 = vld [vmem:[#allocation2 + $0x118] sm:$0x11] }
 0x115   : > { %v2531_v42 = vor.u32 %v2530_v33, %v2526_v32  ;;  %7309 = vmatprep.mubr.bf16.mxu0 %v8803_v19  ;;  %v2541_v49 = vrot.slane %v2539_v6, 4  ;;  %v2544_v55 = vrot.slane %v2542_v39, 5  ;;  %814 = vst [vmem:[#allocation2 + $0xf8] sm:$0xff] %v11386_v25  ;;  %v2548_v13 = vshll.u32 %v11386_v25, 16  ;;  %v10126_v1 = vld [vmem:[#allocation8 + $0x1e0] ss:$8 sps:$4 sm:$0xff]  }
 0x116   : > { %v816_v60 = vsel %vm11011_vm0, %v583_v45, %v815_v34  ;;  %v8662_v5 = vcombine.low %v11324_v47, %v11345_v9  ;;  %v590_v10 = vor.u32 %v588_v56, %v587_v62  ;;  %v591_v11 = vrot.slane %v587_v62, 4  ;;  %v401_v34 = vld [vmem:[%s10932_s17 + $0xb0] sm:$0xff]  ;;  %v402_v6 = vld [vmem:[%s10932_s17 + $0xb8] sm:$0xff] }
 0x117   : > { %7427 = vmatpush1.bf16.msra.mxu0 %v10111_v16  ;;  %v2532_v52 = vrot.slane %v2531_v42, 4  ;;  %6653 = vmatpush1.bf16.msra.mxu1 %v10117_v18  ;;  %817 = vst [vmem:[#allocation2 + $0x100] sm:$0x11] %v816_v60  ;;  %v2545_v46 = vor.u32 %v2544_v55, %v2541_v49  ;;  %v595_v12 = vrot.slane %v593_v58, 7  ;;  %v2550_v29 = vrot.slane %v2548_v13, 5  ;;  %v403_v58 = vld [vmem:[%s10932_s17 + $0xc0] sm:$0xff] }
 0x118   : > { %7428 = vmatprep.subr.bf16.mxu0 %v10122_v20  ;;  %6654 = vmatprep.subr.bf16.mxu1 %v10125_v23  ;;  %v8665_v16 = vcombine.high %v11363_v30, %v11386_v25  ;;  %v11403_v26 = vsel %vm10999_vm15, %v590_v10, %v11195_v63  ;;  %v10137_v20 = vld [vmem:[#allocation8 + $0x604] ss:$8 sps:$4 sm:$0xff]   ;;  %v8664_v33 = vcombine.low %v11363_v30, %v11386_v25  ;;  %v10134_v38 = vld [vmem:[#allocation8 + $0x1f4] ss:$8 sps:$4 sm:$0xff]   ;;  %v602_v49 = vshrl.u32 %v401_v34, 16 }
 0x119   : > { %6538 = vmatmul.mubr.bf16.gmra.mrb[28].mxu1 %v8658_v36  ;;  %v2552_v36 = vshrl.u32 %v11386_v25, 16  ;;  %v2546_v0 = vrot.slane %v2545_v46, 4  ;;  %v598_v35 = vor.u32 %v596_v21, %v595_v12  ;;  %v600_v24 = vrot.slane %v595_v12, 4  ;;  %820 = vst [vmem:[#allocation2 + $0x108] sm:$0xff] %v11403_v26  ;;  %v829_v13 = vld [vmem:[#allocation2 + $0x130] sm:$0x11] }
 0x11a   : > { %7310 = vmatmul.mubr.bf16.gmra.mrb[28].mxu0 %v8802_v27  ;;  %6547 = vmatprep.mubr.bf16.mxu1 %v8661_v15  ;;  %v2536_v15 = vrot.slane %v2534_v3, 5  ;;  %v2563_v32 = vshrl.u32 %v11403_v26, 16  ;;  %v2566_v39 = vshll.u32 %v11403_v26, 16  ;;  %v605_v50 = vshll.u32 %v401_v34, 16 }
 0x11b   : > { %7429 = vmatpush1.bf16.msra.mxu0 %v10120_v40  ;;  %v2554_v44 = vrot.slane %v2552_v36, 4  ;;  %6655 = vmatpush1.bf16.msra.mxu1 %v10123_v57  ;;  %v11416_v27 = vsel %vm10975_vm7, %v591_v11, %v598_v35  ;;  %v823_v37 = vsel %vm11011_vm0, %v600_v24, %v822_v14  ;;  %v2551_v40 = vsel %vm11053_vm2, %v2546_v0, %v2550_v29  ;;  %v10132_v57 = vld [vmem:[#allocation8 + $0x1f0] ss:$8 sps:$4 sm:$0xff]  }
 0x11c   : > { %7430 = vmatprep.subr.bf16.mxu0 %v10131_v51  ;;  %6656 = vmatprep.subr.bf16.mxu1 %v10128_v59  ;;  %v2537_v28 = vsel %vm11053_vm2, %v2532_v52, %v2536_v15  ;;  %821 = vst [vmem:[#allocation2 + $0x110] sm:$0xff] %v11416_v27  ;;  %824 = vst [vmem:[#allocation2 + $0x118] sm:$0x11] %v823_v37  ;;  %v2565_v42 = vrot.slane %v2563_v32, 4  ;;  %v2576_v45 = vshrl.u32 %v11416_v27, 16  ;;  %v2568_v52 = vrot.slane %v2566_v39, 5 }
 0x11d   : > { %v2555_v31 = vor.u32 %v2554_v44, %v2550_v29  ;;  %v8805_v18 = vcombine.high %v11374_v41, %v2537_v28  ;;  %v8804_v19 = vcombine.low %v11374_v41, %v2537_v28  ;;  %v2572_v41 = vshll.u32 %v11416_v27, 16  ;;  %v404_v44 = vld [vmem:[%s10932_s17 + $0xc8] sm:$0xff] }
 0x11e   : > { %v2303_v23 = vld [vmem:[#allocation2 + $0x100] sm:$0x11]  ;;  %v610_v56 = vshrl.u32 %v402_v6, 16  ;;  %v2578_v61 = vrot.slane %v2576_v45, 4  ;;  %v8667_v53 = vcombine.high %v11403_v26, %v11416_v27  ;;  %v604_v4 = vrot.slane %v602_v49, 7 }
 0x11f   : > { %7431 = vmatpush1.bf16.msra.mxu0 %v10129_v7  ;;  %6657 = vmatpush1.bf16.msra.mxu1 %v10126_v1  ;;  %v2556_v43 = vrot.slane %v2555_v31, 4  ;;  %v2558_v51 = vshll.u32 %v2303_v23, 16  ;;  %v2574_v55 = vrot.slane %v2572_v41, 5  ;;  %v2569_v62 = vor.u32 %v2568_v52, %v2565_v42  ;;  %v836_v49 = vld [vmem:[#allocation2 + $0x148] sm:$0x11] }
 0x120   : > { %7593 = vmatprep.subr.bf16.mxu0 %v10137_v20  ;;  %7319 = vmatprep.mubr.bf16.mxu0 %v8805_v18  ;;  %v612_v21 = vrot.slane %v610_v56, 7  ;;  %v8666_v59 = vcombine.low %v11403_v26, %v11416_v27  ;;  %v607_v3 = vor.u32 %v605_v50, %v604_v4  ;;  %v608_v46 = vrot.slane %v604_v4, 4  ;;  %v405_v50 = vld [vmem:[%s10932_s17 + $0xd0] sm:$0xff] }
 0x121   : > { %6548 = vmatmul.mubr.bf16.gmra.mrb[32].mxu1 %v8660_v17  ;;  %v613_v17 = vshll.u32 %v402_v6, 16  ;;  %6658 = vmatprep.subr.bf16.mxu1 %v10134_v38  ;;  %v2560_v60 = vrot.slane %v2558_v51, 5  ;;  %v619_v36 = vshrl.u32 %v403_v58, 16  ;;  %v2570_v10 = vrot.slane %v2569_v62, 4 }
 0x122   : > { %7320 = vmatmul.mubr.bf16.gmra.mrb[32].mxu0 %v8804_v19  ;;  %6557 = vmatprep.mubr.bf16.mxu1 %v8663_v22  ;;  %v2579_v22 = vor.u32 %v2578_v61, %v2574_v55  ;;  %v617_v12 = vrot.slane %v612_v21, 4  ;;  %v11443_v29 = vsel %vm10999_vm15, %v607_v3, %v11195_v63  ;;  %v622_v1 = vshll.u32 %v403_v58, 16 }
 0x123   : > { %6659 = vmatpush1.bf16.msra.mxu1 %v10132_v57  ;;  %v2561_v7 = vsel %vm11053_vm2, %v2556_v43, %v2560_v60  ;;  %v615_v11 = vor.u32 %v613_v17, %v612_v21  ;;  %v2306_v0 = vld [vmem:[#allocation2 + $0x118] sm:$0x11]  ;;  %827 = vst [vmem:[#allocation2 + $0x120] sm:$0xff] %v11443_v29  ;;  %v2587_v31 = vshrl.u32 %v11443_v29, 16  ;;  %v2590_v32 = vshll.u32 %v11443_v29, 16  ;;  %v406_v60 = vld [vmem:[%s10932_s17 + $0xd8] sm:$0xff] }
 0x124   : > { %v8807_v14 = vcombine.high %v2551_v40, %v2561_v7  ;;  %v8806_v15 = vcombine.low %v2551_v40, %v2561_v7  ;;  %v2580_v35 = vrot.slane %v2579_v22, 4  ;;  %v2582_v24 = vshll.u32 %v2306_v0, 16 }
 0x125   : > { %v11448_v20 = vsel %vm10975_vm7, %v608_v46, %v615_v11  ;;  %v830_v28 = vsel %vm11011_vm0, %v617_v12, %v829_v13  ;;  %v2575_v47 = vsel %vm11053_vm2, %v2570_v10, %v2574_v55  ;;  %v627_v19 = vshrl.u32 %v404_v44, 16 }
 0x126   : > { %7329 = vmatprep.mubr.bf16.mxu0 %v8807_v14  ;;  %828 = vst [vmem:[#allocation2 + $0x128] sm:$0xff] %v11448_v20  ;;  %831 = vst [vmem:[#allocation2 + $0x130] sm:$0x11] %v830_v28  ;;  %v2596_v34 = vshll.u32 %v11448_v20, 16  ;;  %v2600_v18 = vshrl.u32 %v11448_v20, 16  ;;  %v2584_v9 = vrot.slane %v2582_v24, 5  ;;  %v8669_v39 = vcombine.high %v11443_v29, %v11448_v20 }
 0x127   : > { %v2589_v37 = vrot.slane %v2587_v31, 4  ;;  %v2592_v6 = vrot.slane %v2590_v32, 5  ;;  %v629_v57 = vrot.slane %v627_v19, 7  ;;  %v630_v52 = vshll.u32 %v404_v44, 16 }
 0x128   : > { %v2598_v38 = vrot.slane %v2596_v34, 5  ;;  %v2602_v40 = vrot.slane %v2600_v18, 4  ;;  %v2585_v42 = vsel %vm11053_vm2, %v2580_v35, %v2584_v9  ;;  %v636_v3 = vshrl.u32 %v405_v50, 16  ;;  %v843_v34 = vld [vmem:[#allocation2 + $0x160] sm:$0x11] }
 0x129   : > { %6558 = vmatmul.mubr.bf16.gmra.mrb[36].mxu1 %v8662_v5  ;;  %v621_v5 = vrot.slane %v619_v36, 7  ;;  %v2593_v23 = vor.u32 %v2592_v6, %v2589_v37  ;;  %v8808_v51 = vcombine.low %v2575_v47, %v2585_v42  ;;  %v634_v55 = vrot.slane %v629_v57, 4 }
 0x12a   : > { %7330 = vmatmul.mubr.bf16.gmra.mrb[36].mxu0 %v8806_v15  ;;  %6567 = vmatprep.mubr.bf16.mxu1 %v8665_v16  ;;  %v8809_v16 = vcombine.high %v2575_v47, %v2585_v42  ;;  %v2603_v43 = vor.u32 %v2602_v40, %v2598_v38  ;;  %v632_v21 = vor.u32 %v630_v52, %v629_v57  ;;  %v639_v46 = vshll.u32 %v405_v50, 16  ;;  %v407_v40 = vld [vmem:[%s10932_s17 + $0xe0] sm:$0xff]  ;;  %v408_v50 = vld [vmem:[%s10932_s17 + $0xe8] sm:$0xff] }
 0x12b   : > { %v624_v41 = vor.u32 %v622_v1, %v621_v5  ;;  %v625_v45 = vrot.slane %v621_v5, 4  ;;  %v2594_v58 = vrot.slane %v2593_v23, 4  ;;  %v837_v22 = vsel %vm11011_vm0, %v634_v55, %v836_v49 }
 0x12c   : > { %7339 = vmatprep.mubr.bf16.mxu0 %v8809_v16  ;;  %v2604_v61 = vrot.slane %v2603_v43, 4  ;;  %838 = vst [vmem:[#allocation2 + $0x148] sm:$0x11] %v837_v22  ;;  %v638_v12 = vrot.slane %v636_v3, 7  ;;  %v644_v14 = vshrl.u32 %v406_v60, 16  ;;  %v647_v30 = vshll.u32 %v406_v60, 16 }
 0x12d   : > { %v11474_v56 = vsel %vm10999_vm15, %v624_v41, %v11195_v63  ;;  %v2309_v62 = vld [vmem:[#allocation2 + $0x130] sm:$0x11]  ;;  %v2599_v13 = vsel %vm11053_vm2, %v2594_v58, %v2598_v38  ;;  %v11492_v11 = vsel %vm10975_vm7, %v625_v45, %v632_v21  ;;  %v8668_v44 = vcombine.low %v11443_v29, %v11448_v20 }
 0x12e   : > { %834 = vst [vmem:[#allocation2 + $0x138] sm:$0xff] %v11474_v56  ;;  %v2611_v4 = vshrl.u32 %v11474_v56, 16  ;;  %v2614_v17 = vshll.u32 %v11474_v56, 16  ;;  %v2606_v36 = vshll.u32 %v2309_v62, 16  ;;  %835 = vst [vmem:[#allocation2 + $0x140] sm:$0xff] %v11492_v11  ;;  %v2620_v15 = vshll.u32 %v11492_v11, 16 }
 0x12f   : > { %v2624_v0 = vshrl.u32 %v11492_v11, 16  ;;  %v641_v1 = vor.u32 %v639_v46, %v638_v12  ;;  %v646_v35 = vrot.slane %v644_v14, 7  ;;  %v8671_v6 = vcombine.high %v11474_v56, %v11492_v11  ;;  %v410_v46 = vld [vmem:[%s10932_s17 + $0xf8] sm:$0xff]  ;;  %v850_v14 = vld [vmem:[#allocation2 + $0x178] sm:$0x11] }
 0x130   : > { %v2613_v7 = vrot.slane %v2611_v4, 4  ;;  %v2616_v10 = vrot.slane %v2614_v17, 5  ;;  %v2608_v25 = vrot.slane %v2606_v36, 5  ;;  %v2622_v31 = vrot.slane %v2620_v15, 5 }
 0x131   : > { %6568 = vmatmul.mubr.bf16.gmra.mrb[40].mxu1 %v8664_v33  ;;  %v2626_v32 = vrot.slane %v2624_v0, 4  ;;  %v649_v9 = vor.u32 %v647_v30, %v646_v35  ;;  %v651_v5 = vrot.slane %v646_v35, 4  ;;  %v11510_v38 = vsel %vm10999_vm15, %v641_v1, %v11195_v63 }
 0x132   : > { %7340 = vmatmul.mubr.bf16.gmra.mrb[40].mxu0 %v8808_v51  ;;  %6577 = vmatprep.mubr.bf16.mxu1 %v8667_v53  ;;  %v2617_v33 = vor.u32 %v2616_v10, %v2613_v7  ;;  %v642_v53 = vrot.slane %v638_v12, 4  ;;  %v2609_v24 = vsel %vm11053_vm2, %v2604_v61, %v2608_v25  ;;  %841 = vst [vmem:[#allocation2 + $0x150] sm:$0xff] %v11510_v38  ;;  %v2635_v16 = vshrl.u32 %v11510_v38, 16 }
 0x133   : > { %v8811_v18 = vcombine.high %v2599_v13, %v2609_v24  ;;  %v8810_v47 = vcombine.low %v2599_v13, %v2609_v24  ;;  %v2627_v37 = vor.u32 %v2626_v32, %v2622_v31  ;;  %v2312_v42 = vld [vmem:[#allocation2 + $0x148] sm:$0x11]  ;;  %v844_v57 = vsel %vm11011_vm0, %v651_v5, %v843_v34 }
 0x134   : > { %v2618_v28 = vrot.slane %v2617_v33, 4  ;;  %v11515_v41 = vsel %vm10975_vm7, %v642_v53, %v649_v9  ;;  %v2638_v23 = vshll.u32 %v11510_v38, 16  ;;  %v2630_v43 = vshll.u32 %v2312_v42, 16  ;;  %845 = vst [vmem:[#allocation2 + $0x160] sm:$0x11] %v844_v57  ;;  %v11544_v53 = vld [vmem:[#allocation2] sm:$0xff] }
 0x135   : > { %7349 = vmatprep.mubr.bf16.mxu0 %v8811_v18  ;;  %v2628_v63 = vrot.slane %v2627_v37, 4  ;;  %842 = vst [vmem:[#allocation2 + $0x158] sm:$0xff] %v11515_v41  ;;  %v2644_v45 = vshll.u32 %v11515_v41, 16  ;;  %v2648_v49 = vshrl.u32 %v11515_v41, 16  ;;  %v2637_v51 = vrot.slane %v2635_v16, 4 }
 0x136   : > { %v11503_v19 = vsel %vm11053_vm2, %v2618_v28, %v2622_v31  ;;  %v2640_v52 = vrot.slane %v2638_v23, 5  ;;  %v8670_v26 = vcombine.low %v11474_v56, %v11492_v11  ;;  %v653_v27 = vshrl.u32 %v407_v40, 16  ;;  %v857_v23 = vld [vmem:[#allocation2 + $0x190] sm:$0x11] }
 0x137   : > { %v2632_v55 = vrot.slane %v2630_v43, 5  ;;  %v2646_v58 = vrot.slane %v2644_v45, 5  ;;  %v2650_v61 = vrot.slane %v2648_v49, 4  ;;  %v656_v4 = vshll.u32 %v407_v40, 16 }
 0x138   : > { %v2641_v17 = vor.u32 %v2640_v52, %v2637_v51  ;;  %v8673_v60 = vcombine.high %v11510_v38, %v11515_v41  ;;  %v655_v62 = vrot.slane %v653_v27, 7  ;;  %v661_v21 = vshrl.u32 %v408_v50, 16 }
 0x139   : > { %6578 = vmatmul.mubr.bf16.gmra.mrb[44].mxu1 %v8666_v59  ;;  %v409_v59 = vld [vmem:[%s10932_s17 + $0xf0] sm:$0xff]  ;;  %v2651_v22 = vor.u32 %v2650_v61, %v2646_v58  ;;  %v664_v3 = vshll.u32 %v408_v50, 16  ;;  %v8672_v33 = vcombine.low %v11510_v38, %v11515_v41  ;;  %v678_v28 = vshrl.u32 %v410_v46, 16 }
 0x13a   : > { %7350 = vmatmul.mubr.bf16.gmra.mrb[44].mxu0 %v8810_v47  ;;  %6587 = vmatprep.mubr.bf16.mxu1 %v8669_v39  ;;  %v2633_v39 = vsel %vm11053_vm2, %v2628_v63, %v2632_v55  ;;  %v670_v13 = vshrl.u32 %v409_v59, 16  ;;  %v2642_v10 = vrot.slane %v2641_v17, 4  ;;  %v658_v12 = vor.u32 %v656_v4, %v655_v62  ;;  %v10161_v47 = vld [vmem:[#allocation8 + $0x204] ss:$8 sps:$4 sm:$0xff]  }
 0x13b   : > { %v8813_v36 = vcombine.high %v11503_v19, %v2633_v39  ;;  %v8812_v7 = vcombine.low %v11503_v19, %v2633_v39  ;;  %v659_v30 = vrot.slane %v655_v62, 4  ;;  %v663_v25 = vrot.slane %v661_v21, 7  ;;  %v2315_v0 = vld [vmem:[#allocation2 + $0x160] sm:$0x11]  ;;  %6821 = vmatprep.subr.bf16.mxu1 %v10161_v47 }
 0x13c   : > { %v672_v15 = vrot.slane %v670_v13, 7  ;;  %v2652_v1 = vrot.slane %v2651_v22, 4  ;;  %v11549_v35 = vsel %vm10999_vm15, %v658_v12, %v11544_v53  ;;  %v673_v24 = vshll.u32 %v409_v59, 16 }
 0x13d   : > { %7359 = vmatprep.mubr.bf16.mxu0 %v8813_v36  ;;  %v2654_v31 = vshll.u32 %v2315_v0, 16  ;;  %v666_v32 = vor.u32 %v664_v3, %v663_v25  ;;  %v668_v34 = vrot.slane %v663_v25, 4  ;;  %848 = vst [vmem:[#allocation2 + $0x168] sm:$0xff] %v11549_v35  ;;  %v2659_v18 = vshrl.u32 %v11549_v35, 16  ;;  %v2867_v0 = vld [vmem:[#allocation2 + $0x20] sm:$0xff] }
 0x13e   : > { %v2647_v9 = vsel %vm11053_vm2, %v2642_v10, %v2646_v58  ;;  %v2662_v5 = vshll.u32 %v11549_v35, 16  ;;  %v675_v19 = vor.u32 %v673_v24, %v672_v15  ;;  %v680_v37 = vrot.slane %v678_v28, 7 }
 0x13f   : > { %v2656_v40 = vrot.slane %v2654_v31, 5  ;;  %v11561_v29 = vsel %vm10975_vm7, %v659_v30, %v666_v32  ;;  %v851_v20 = vsel %vm11011_vm0, %v668_v34, %v850_v14  ;;  %v676_v16 = vrot.slane %v672_v15, 4  ;;  %v2866_v15 = vld [vmem:[#allocation2 + $0x18] sm:$0xee]  ;;  %v2868_v31 = vld [vmem:[#allocation2 + $0x28] sm:$0x11] }
 0x140   : > { %849 = vst [vmem:[#allocation2 + $0x170] sm:$0xff] %v11561_v29  ;;  %852 = vst [vmem:[#allocation2 + $0x178] sm:$0x11] %v851_v20  ;;  %v2668_v42 = vshll.u32 %v11561_v29, 16  ;;  %v2672_v57 = vshrl.u32 %v11561_v29, 16  ;;  %v681_v43 = vshll.u32 %v410_v46, 16  ;;  %v854_v49 = vsel %vm10999_vm15, %v675_v19, %v11544_v53 }
 0x141   : > { %6588 = vmatmul.mubr.bf16.gmra.mrb[48].mxu1 %v8668_v44  ;;  %v2661_v44 = vrot.slane %v2659_v18, 4  ;;  %v2657_v63 = vsel %vm11053_vm2, %v2652_v1, %v2656_v40  ;;  %v685_v45 = vrot.slane %v680_v37, 4  ;;  %855 = vst [vmem:[#allocation2 + $0x180] sm:$0xff] %v854_v49  ;;  %v2683_v61 = vshrl.u32 %v854_v49, 16  ;;  %v1087_v40 = vld [vmem:[#allocation2 + $0x18] sm:$0xff] }
 0x142   : > { %7360 = vmatmul.mubr.bf16.gmra.mrb[48].mxu0 %v8812_v7  ;;  %6597 = vmatprep.mubr.bf16.mxu1 %v8671_v6  ;;  %v2664_v6 = vrot.slane %v2662_v5, 5  ;;  %v8815_v50 = vcombine.high %v2647_v9, %v2657_v63  ;;  %v8814_v51 = vcombine.low %v2647_v9, %v2657_v63  ;;  %v2670_v27 = vrot.slane %v2668_v42, 5 }
 0x143   : > { %v2674_v59 = vrot.slane %v2672_v57, 4  ;;  %v683_v55 = vor.u32 %v681_v43, %v680_v37  ;;  %v858_v58 = vsel %vm11011_vm0, %v685_v45, %v857_v23  ;;  %v8675_v17 = vcombine.high %v11549_v35, %v11561_v29  ;;  %v1089_v57 = vld [vmem:[#allocation2 + $0x28] sm:$0x11] }
 0x144   : > { %v2665_v52 = vor.u32 %v2664_v6, %v2661_v44  ;;  %7369 = vmatprep.mubr.bf16.mxu0 %v8815_v50  ;;  %859 = vst [vmem:[#allocation2 + $0x190] sm:$0x11] %v858_v58  ;;  %v2686_v62 = vshll.u32 %v854_v49, 16  ;;  %v1136_v21 = vshrl.u32 %v11544_v53, 16  ;;  %v2685_v22 = vrot.slane %v2683_v61, 4 }
 0x145   : > { %v2675_v39 = vor.u32 %v2674_v59, %v2670_v27  ;;  %v684_v8 = vsel %vm10975_vm7, %v676_v16, %v683_v55  ;;  %v1139_v3 = vshll.u32 %v11544_v53, 16  ;;  %v1155_v10 = vshll.u32 %v1086_v2, 16  ;;  %v2871_v61 = vld [vmem:[#allocation2 + $0x40] sm:$0x11] }
 0x146   : > { %v2666_v4 = vrot.slane %v2665_v52, 4  ;;  %856 = vst [vmem:[#allocation2 + $0x188] sm:$0xff] %v684_v8  ;;  %v2688_v13 = vrot.slane %v2686_v62, 5  ;;  %v2692_v36 = vshll.u32 %v684_v8, 16  ;;  %v2696_v56 = vshrl.u32 %v684_v8, 16  ;;  %v2870_v52 = vld [vmem:[#allocation2 + $0x38] sm:$0xff] }
 0x147   : > { %v2318_v11 = vld [vmem:[#allocation2 + $0x178] sm:$0x11]  ;;  %v1138_v7 = vrot.slane %v1136_v21, 4  ;;  %v1141_v48 = vrot.slane %v1139_v3, 5  ;;  %v8820_v47 = vrot.slane %v2866_v15, 9  ;;  %v2964_v9 = vrot.slane %v2867_v0, 5 }
 0x148   : > { %v2671_v46 = vsel %vm11053_vm2, %v2666_v4, %v2670_v27  ;;  %v2678_v12 = vshll.u32 %v2318_v11, 16  ;;  %v2689_v14 = vor.u32 %v2688_v13, %v2685_v22  ;;  %v2694_v30 = vrot.slane %v2692_v36, 5  ;;  %v1090_v4 = vld [vmem:[#allocation2 + $0x30] sm:$0xff]  ;;  %v1092_v36 = vld [vmem:[#allocation2 + $0x40] sm:$0x11] }
 0x149   : > { %6598 = vmatmul.mubr.bf16.gmra.mrb[52].mxu1 %v8670_v26  ;;  %v2676_v26 = vrot.slane %v2675_v39, 4  ;;  %v2698_v25 = vrot.slane %v2696_v56, 4  ;;  %v1142_v1 = vor.u32 %v1141_v48, %v1138_v7  ;;  %v8674_v42 = vcombine.low %v11549_v35, %v11561_v29 }
 0x14a   : > { %7370 = vmatmul.mubr.bf16.gmra.mrb[52].mxu0 %v8814_v51  ;;  %6607 = vmatprep.mubr.bf16.mxu1 %v8673_v60  ;;  %v1157_v60 = vrot.slane %v1155_v10, 5  ;;  %v2680_v53 = vrot.slane %v2678_v12, 5  ;;  %v2690_v24 = vrot.slane %v2689_v14, 4  ;;  %v11612_v38 = vsel %vm11589_vm5, %v8820_v47, %v2964_v9  ;;  %v2869_v51 = vld [vmem:[#allocation2 + $0x30] sm:$0xee] }
 0x14b   : > { %v2699_v28 = vor.u32 %v2698_v25, %v2694_v30  ;;  %v2321_v32 = vld [vmem:[#allocation2 + $0x190] sm:$0x11]  ;;  %v1143_v34 = vrot.slane %v1142_v1, 4  ;;  %v2966_v41 = vrot.slane %v2964_v9, 4  ;;  %v1160_v43 = vshrl.u32 %v1087_v40, 16 }
 0x14c   : > { %v2681_v5 = vsel %vm11053_vm2, %v2676_v26, %v2680_v53  ;;  %v2702_v37 = vshll.u32 %v2321_v32, 16  ;;  %v2695_v6 = vsel %vm11053_vm2, %v2690_v24, %v2694_v30  ;;  %v1163_v35 = vshll.u32 %v1087_v40, 16  ;;  %v2873_v53 = vld [vmem:[#allocation2 + $0x50] sm:$0xff]  ;;  %v1093_v32 = vld [vmem:[#allocation2 + $0x48] sm:$0xff] }
 0x14d   : > { %v2700_v19 = vrot.slane %v2699_v28, 4  ;;  %v8817_v20 = vcombine.high %v2671_v46, %v2681_v5  ;;  %v8816_v44 = vcombine.low %v2671_v46, %v2681_v5  ;;  %v11604_v23 = vsel %vm11053_vm2, %v1143_v34, %v1141_v48 }
 0x14e   : > { %v2704_v16 = vrot.slane %v2702_v37, 5  ;;  %v11608_v63 = vsel %vm11053_vm2, %v1143_v34, %v1157_v60  ;;  %v1169_v45 = vshll.u32 %v2867_v0, 16  ;;  %v1173_v49 = vshrl.u32 %v2867_v0, 16  ;;  %v1095_v37 = vld [vmem:[#allocation2 + $0x58] sm:$0x11] }
 0x14f   : > { %7379 = vmatprep.mubr.bf16.mxu0 %v8817_v20  ;;  %v1179_v50 = vshll.u32 %v1089_v57, 16  ;;  %v8677_v59 = vcombine.high %v11604_v23, %v11608_v63  ;;  %v1162_v58 = vrot.slane %v1160_v43, 4  ;;  %v1165_v2 = vrot.slane %v1163_v35, 5  ;;  %v10135_v57 = vld [vmem:[#allocation8 + $0x600] ss:$8 sps:$4 sm:$0xff]  }
 0x150   : > { %v2705_v29 = vsel %vm11053_vm2, %v2700_v19, %v2704_v16  ;;  %v1171_v21 = vrot.slane %v1169_v45, 5  ;;  %v1175_v39 = vrot.slane %v1173_v49, 4  ;;  %v8821_v22 = vrot.slane %v2869_v51, 9  ;;  %v2874_v19 = vld [vmem:[#allocation2 + $0x58] sm:$0x11] }
 0x151   : > { %6608 = vmatmul.mubr.bf16.gmra.mrb[56].mxu1 %v8672_v33  ;;  %v2967_v33 = vrot.slane %v2868_v31, 5  ;;  %v8819_v27 = vcombine.high %v2695_v6, %v2705_v29  ;;  %v1181_v8 = vrot.slane %v1179_v50, 5  ;;  %v2971_v3 = vrot.slane %v2870_v52, 5  ;;  %v2872_v31 = vld [vmem:[#allocation2 + $0x48] sm:$0xee] }
 0x152   : > { %6617 = vmatprep.mubr.bf16.mxu1 %v8675_v17  ;;  %7380 = vmatmul.mubr.bf16.gmra.mrb[56].mxu0 %v8816_v44  ;;  %v8818_v17 = vcombine.low %v2695_v6, %v2705_v29  ;;  %v1166_v46 = vor.u32 %v1165_v2, %v1162_v58  ;;  %v2974_v13 = vrot.slane %v2871_v61, 5  ;;  %v1184_v56 = vshrl.u32 %v1090_v4, 16  ;;  %v10140_v43 = vld [vmem:[#allocation8 + $0x614] ss:$8 sps:$4 sm:$0xff]  }
 0x153   : > { %v11620_v55 = vsel %vm11589_vm5, %v2966_v41, %v2967_v33  ;;  %7389 = vmatprep.mubr.bf16.mxu0 %v8819_v27  ;;  %v1187_v11 = vshll.u32 %v1090_v4, 16  ;;  %v1176_v26 = vor.u32 %v1175_v39, %v1171_v21  ;;  %v11626_v7 = vsel %vm11589_vm5, %v8821_v22, %v2971_v3  ;;  %v11648_v41 = vld [vmem:[#allocation2 + $0x60] sm:$0xee]  ;;  %v10170_v22 = vld [vmem:[#allocation8 + $0x224] ss:$8 sps:$4 sm:$0xff]  }
 0x154   : > { %v8837_v62 = vcombine.high %v11612_v38, %v11620_v55  ;;  %v2973_v48 = vrot.slane %v2971_v3, 4  ;;  %v1193_v10 = vshll.u32 %v2870_v52, 16  ;;  %v1167_v12 = vrot.slane %v1166_v46, 4  ;;  %v10167_v33 = vld [vmem:[#allocation8 + $0x214] ss:$8 sps:$4 sm:$0xff]  }
 0x155   : > { %v1186_v14 = vrot.slane %v1184_v56, 4  ;;  %v1189_v30 = vrot.slane %v1187_v11, 5  ;;  %v1197_v25 = vshrl.u32 %v2870_v52, 16  ;;  %v1177_v15 = vrot.slane %v1176_v26, 4  ;;  %v1096_v4 = vld [vmem:[#allocation2 + $0x60] sm:$0xff] }
 0x156   : > { %v11630_v0 = vsel %vm11589_vm5, %v2973_v48, %v2974_v13  ;;  %v1195_v1 = vrot.slane %v1193_v10, 5  ;;  %v1203_v60 = vshll.u32 %v1092_v36, 16  ;;  %v11634_v24 = vsel %vm11053_vm2, %v1167_v12, %v1171_v21  ;;  %v10138_v21 = vld [vmem:[#allocation8 + $0x610] ss:$8 sps:$4 sm:$0xff]   ;;  %v10143_v13 = vld [vmem:[#allocation8 + $0x624] ss:$8 sps:$4 sm:$0xff]  }
 0x157   : > { %v1190_v28 = vor.u32 %v1189_v30, %v1186_v14  ;;  %v8676_v34 = vcombine.low %v11604_v23, %v11608_v63  ;;  %v8836_v47 = vcombine.low %v11612_v38, %v11620_v55  ;;  %v11642_v9 = vsel %vm11053_vm2, %v1177_v15, %v1181_v8  ;;  %v2877_v56 = vld [vmem:[#allocation2 + $0x70] sm:$0x11] }
 0x158   : > { %v1199_v5 = vrot.slane %v1197_v25, 4  ;;  %v8679_v40 = vcombine.high %v11634_v24, %v11642_v9  ;;  %v8839_v20 = vcombine.high %v11626_v7, %v11630_v0  ;;  %v2978_v6 = vrot.slane %v2873_v53, 5  ;;  %v1098_v10 = vld [vmem:[#allocation2 + $0x70] sm:$0x11] }
 0x159   : > { %6618 = vmatmul.mubr.bf16.gmra.mrb[60].mxu1 %v8674_v42  ;;  %v1191_v44 = vrot.slane %v1190_v28, 4  ;;  %v10159_v42 = vld [vmem:[#allocation8 + $0x200] ss:$8 sps:$4 sm:$0xff]   ;;  %v1205_v23 = vrot.slane %v1203_v60, 5  ;;  %v1208_v63 = vshrl.u32 %v1093_v32, 16  ;;  %v1211_v38 = vshll.u32 %v1093_v32, 16 }
 0x15a   : > { %6660 = vmatprep.mubr.bf16.mxu1 %v8677_v59  ;;  %7390 = vmatmul.mubr.bf16.gmra.mrb[60].mxu0 %v8818_v17  ;;  %v1200_v16 = vor.u32 %v1199_v5, %v1195_v1  ;;  %v8822_v35 = vrot.slane %v2872_v31, 9  ;;  %v2980_v29 = vrot.slane %v2978_v6, 4  ;;  %v2981_v45 = vrot.slane %v2874_v19, 5  ;;  %v11650_v59 = vld [vmem:[#allocation2 + $0x68] sm:$0xff] }
 0x15b   : > { %7432 = vmatprep.mubr.bf16.mxu0 %v8837_v62  ;;  %v1217_v49 = vshll.u32 %v2873_v53, 16  ;;  %v1210_v51 = vrot.slane %v1208_v63, 4  ;;  %v1213_v52 = vrot.slane %v1211_v38, 5  ;;  %v1221_v27 = vshrl.u32 %v2873_v53, 16  ;;  %v10165_v17 = vld [vmem:[#allocation8 + $0x210] ss:$8 sps:$4 sm:$0xff]  }
 0x15c   : > { %v1201_v50 = vrot.slane %v1200_v16, 4  ;;  %v11654_v55 = vsel %vm11053_vm2, %v1191_v44, %v1195_v1  ;;  %v1227_v61 = vshll.u32 %v1095_v37, 16  ;;  %v8678_v62 = vcombine.low %v11634_v24, %v11642_v9  ;;  %v10141_v1 = vld [vmem:[#allocation8 + $0x620] ss:$8 sps:$4 sm:$0xff]   ;;  %v10176_v31 = vld [vmem:[#allocation8 + $0x234] ss:$8 sps:$4 sm:$0xff]  }
 0x15d   : > { %v1219_v58 = vrot.slane %v1217_v49, 5  ;;  %v8838_v2 = vcombine.low %v11626_v7, %v11630_v0  ;;  %v1214_v8 = vor.u32 %v1213_v52, %v1210_v51  ;;  %v11666_v3 = vsel %vm11589_vm5, %v8822_v35, %v2978_v6  ;;  %v10168_v0 = vld [vmem:[#allocation8 + $0x220] ss:$8 sps:$4 sm:$0xff]   ;;  %v11680_v37 = vld [vmem:[#allocation2 + $0x80] sm:$0xff]  ;;  %v2880_v38 = vld [vmem:[#allocation2 + $0x88] sm:$0x11] }
 0x15e   : > { %v11662_v39 = vsel %vm11053_vm2, %v1201_v50, %v1205_v23  ;;  %v11670_v46 = vsel %vm11589_vm5, %v2980_v29, %v2981_v45  ;;  %v1223_v36 = vrot.slane %v1221_v27, 4  ;;  %v8823_v11 = vrot.slane %v11648_v41, 9  ;;  %v10146_v44 = vld [vmem:[#allocation8 + $0x634] ss:$8 sps:$4 sm:$0xff]   ;;  %v2878_v63 = vld [vmem:[#allocation2 + $0x78] sm:$0xee] }
 0x15f   : > { %v8681_v26 = vcombine.high %v11654_v55, %v11662_v39  ;;  %v1229_v7 = vrot.slane %v1227_v61, 5  ;;  %v2985_v48 = vrot.slane %v11650_v59, 5  ;;  %v1232_v12 = vshrl.u32 %v1096_v4, 16  ;;  %v10174_v41 = vld [vmem:[#allocation8 + $0x230] ss:$8 sps:$4 sm:$0xff]  }
 0x160   : > { %v1224_v14 = vor.u32 %v1223_v36, %v1219_v58  ;;  %v1235_v30 = vshll.u32 %v1096_v4, 16  ;;  %v1241_v25 = vshll.u32 %v11650_v59, 16  ;;  %v1245_v15 = vshrl.u32 %v11650_v59, 16  ;;  %v10149_v29 = vld [vmem:[#allocation8 + $0x644] ss:$8 sps:$4 sm:$0xff]  }
 0x161   : > { %6661 = vmatmul.mubr.bf16.vlgmr.msra.gmra.mrb[0].mxu1 %v8676_v34  ;;  %v1215_v60 = vrot.slane %v1214_v8, 4  ;;  %v2987_v53 = vrot.slane %v2985_v48, 4  ;;  %v2988_v24 = vrot.slane %v2877_v56, 5  ;;  %v1234_v28 = vrot.slane %v1232_v12, 4  ;;  %v10179_v49 = vld [vmem:[#allocation8 + $0x244] ss:$8 sps:$4 sm:$0xff]  }
 0x162   : > { %6670 = vmatprep.mubr.bf16.mxu1 %v8679_v40  ;;  %6822 = vmatpush1.bf16.msra.mxu1 %v10159_v42  ;;  %v1225_v32 = vrot.slane %v1224_v14, 4  ;;  %v1237_v34 = vrot.slane %v1235_v30, 5  ;;  %v1247_v9 = vrot.slane %v1245_v15, 4  ;;  %v8841_v5 = vcombine.high %v11666_v3, %v11670_v46  ;;  %v1099_v40 = vld [vmem:[#allocation2 + $0x78] sm:$0xff]  ;;  %v1101_v52 = vld [vmem:[#allocation2 + $0x88] sm:$0x11] }
 0x163   : > { %6823 = vmatprep.subr.bf16.mxu1 %v10167_v33  ;;  %7433 = vmatmul.mubr.bf16.vlgmr.msra.gmra.mrb[0].mxu0 %v8836_v47  ;;  %v1243_v47 = vrot.slane %v1241_v25, 5  ;;  %v1251_v19 = vshll.u32 %v1098_v10, 16  ;;  %v11686_v6 = vsel %vm11053_vm2, %v1215_v60, %v1219_v58  ;;  %v11694_v33 = vsel %vm11589_vm5, %v8823_v11, %v2985_v48  ;;  %v10185_v36 = vld [vmem:[#allocation8 + $0x254] ss:$8 sps:$4 sm:$0xff]   ;;  %v11717_v10 = vld [vmem:[#allocation2 + $0x98] sm:$0xff] }
 0x164   : > { %7594 = vmatpush1.bf16.msra.mxu0 %v10135_v57  ;;  %7442 = vmatprep.mubr.bf16.mxu0 %v8839_v20  ;;  %v8680_v20 = vcombine.low %v11654_v55, %v11662_v39  ;;  %v11690_v42 = vsel %vm11053_vm2, %v1225_v32, %v1229_v7  ;;  %v10144_v57 = vld [vmem:[#allocation8 + $0x630] ss:$8 sps:$4 sm:$0xff]   ;;  %v1238_v16 = vor.u32 %v1237_v34, %v1234_v28  ;;  %v2992_v35 = vrot.slane %v11680_v37, 5  ;;  %v10152_v12 = vld [vmem:[#allocation8 + $0x654] ss:$8 sps:$4 sm:$0xff]  }
 0x165   : > { %7595 = vmatprep.subr.bf16.mxu0 %v10140_v43  ;;  %v1248_v23 = vor.u32 %v1247_v9, %v1243_v47  ;;  %v11698_v43 = vsel %vm11589_vm5, %v2987_v53, %v2988_v24  ;;  %v1256_v45 = vshrl.u32 %v1099_v40, 16  ;;  %v1253_v51 = vrot.slane %v1251_v19, 5  ;;  %v2881_v24 = vld [vmem:[#allocation2 + $0x90] sm:$0xee]  ;;  %v2883_v28 = vld [vmem:[#allocation2 + $0xa0] sm:$0x11] }
 0x166   : > { %6824 = vmatpush1.bf16.msra.mxu1 %v10165_v17  ;;  %v1239_v50 = vrot.slane %v1238_v16, 4  ;;  %v1259_v27 = vshll.u32 %v1099_v40, 16  ;;  %v1265_v59 = vshll.u32 %v11680_v37, 16  ;;  %v8683_v55 = vcombine.high %v11686_v6, %v11690_v42  ;;  %v10188_v34 = vld [vmem:[#allocation8 + $0x264] ss:$8 sps:$4 sm:$0xff]   ;;  %v1105_v16 = vld [vmem:[#allocation2 + $0xa8] sm:$0xff] }
 0x167   : > { %6825 = vmatprep.subr.bf16.mxu1 %v10170_v22  ;;  %v1249_v58 = vrot.slane %v1248_v23, 4  ;;  %v1258_v61 = vrot.slane %v1256_v45, 4  ;;  %v1269_v4 = vshrl.u32 %v11680_v37, 16  ;;  %v8840_v17 = vcombine.low %v11666_v3, %v11670_v46  ;;  %v10147_v3 = vld [vmem:[#allocation8 + $0x640] ss:$8 sps:$4 sm:$0xff]  }
 0x168   : > { %7596 = vmatpush1.bf16.msra.mxu0 %v10138_v21  ;;  %v10177_v21 = vld [vmem:[#allocation8 + $0x240] ss:$8 sps:$4 sm:$0xff]   ;;  %v2994_v39 = vrot.slane %v2992_v35, 4  ;;  %v2995_v8 = vrot.slane %v2880_v38, 5  ;;  %v1261_v22 = vrot.slane %v1259_v27, 5  ;;  %v8843_v56 = vcombine.high %v11694_v33, %v11698_v43 }
 0x169   : > { %6671 = vmatmul.mubr.bf16.gmra.mrb[4].mxu1 %v8678_v62  ;;  %7597 = vmatprep.subr.bf16.mxu0 %v10143_v13  ;;  %v8824_v62 = vrot.slane %v2878_v63, 9  ;;  %v1267_v13 = vrot.slane %v1265_v59, 5  ;;  %v11711_v11 = vsel %vm11053_vm2, %v1239_v50, %v1243_v47  ;;  %v1271_v46 = vrot.slane %v1269_v4, 4  ;;  %v1104_v37 = vld [vmem:[#allocation2 + $0xa0] sm:$0x11]  ;;  %v11749_v27 = vld [vmem:[#allocation2 + $0xb0] sm:$0xff] }
 0x16a   : > { %6680 = vmatprep.mubr.bf16.mxu1 %v8681_v26  ;;  %6826 = vmatpush1.bf16.msra.mxu1 %v10168_v0  ;;  %v1275_v26 = vshll.u32 %v1101_v52, 16  ;;  %v11715_v7 = vsel %vm11053_vm2, %v1249_v58, %v1253_v51  ;;  %v1262_v48 = vor.u32 %v1261_v22, %v1258_v61  ;;  %v1289_v15 = vshll.u32 %v11717_v10, 16  ;;  %v10183_v0 = vld [vmem:[#allocation8 + $0x250] ss:$8 sps:$4 sm:$0xff]   ;;  %v10155_v40 = vld [vmem:[#allocation8 + $0x664] ss:$8 sps:$4 sm:$0xff]  }
 0x16b   : > { %7443 = vmatmul.mubr.bf16.gmra.mrb[4].mxu0 %v8838_v2  ;;  %6827 = vmatprep.subr.bf16.mxu1 %v10176_v31  ;;  %v1102_v2 = vld [vmem:[#allocation2 + $0x90] sm:$0xff]  ;;  %v1272_v25 = vor.u32 %v1271_v46, %v1267_v13  ;;  %v11724_v60 = vsel %vm11589_vm5, %v8824_v62, %v2992_v35  ;;  %v11728_v53 = vsel %vm11589_vm5, %v2994_v39, %v2995_v8  ;;  %v10150_v31 = vld [vmem:[#allocation8 + $0x650] ss:$8 sps:$4 sm:$0xff]   ;;  %v1293_v32 = vshrl.u32 %v11717_v10, 16 }
 0x16c   : > { %7452 = vmatprep.mubr.bf16.mxu0 %v8841_v5  ;;  %7598 = vmatpush1.bf16.msra.mxu0 %v10141_v1  ;;  %v1280_v14 = vshrl.u32 %v1102_v2, 16  ;;  %v1283_v30 = vshll.u32 %v1102_v2, 16  ;;  %v8682_v1 = vcombine.low %v11686_v6, %v11690_v42  ;;  %v8685_v47 = vcombine.high %v11711_v11, %v11715_v7  ;;  %v10186_v23 = vld [vmem:[#allocation8 + $0x260] ss:$8 sps:$4 sm:$0xff]   ;;  %v10158_v59 = vld [vmem:[#allocation8 + $0x674] ss:$8 sps:$4 sm:$0xff]  }
 0x16d   : > { %7599 = vmatprep.subr.bf16.mxu0 %v10146_v44  ;;  %v1263_v9 = vrot.slane %v1262_v48, 4  ;;  %v1277_v5 = vrot.slane %v1275_v26, 5  ;;  %v2999_v19 = vrot.slane %v11717_v10, 5  ;;  %v11734_v42 = vrot.slane %v1289_v15, 5  ;;  %v10153_v50 = vld [vmem:[#allocation8 + $0x660] ss:$8 sps:$4 sm:$0xff]  }
 0x16e   : > { %6828 = vmatpush1.bf16.msra.mxu1 %v10174_v41  ;;  %v1282_v44 = vrot.slane %v1280_v14, 4  ;;  %v1285_v6 = vrot.slane %v1283_v30, 5  ;;  %v8842_v63 = vcombine.low %v11694_v33, %v11698_v43  ;;  %v8845_v38 = vcombine.high %v11724_v60, %v11728_v53  ;;  %v10194_v41 = vld [vmem:[#allocation8 + $0x274] ss:$8 sps:$4 sm:$0xff]   ;;  %v10192_v62 = vld [vmem:[#allocation8 + $0x270] ss:$8 sps:$4 sm:$0xff]  }
 0x16f   : > { %6829 = vmatprep.subr.bf16.mxu1 %v10179_v49  ;;  %v11742_v35 = vsel %vm11053_vm2, %v1263_v9, %v1267_v13  ;;  %v3001_v45 = vrot.slane %v2999_v19, 4  ;;  %v3002_v49 = vrot.slane %v2883_v28, 5  ;;  %v1299_v52 = vshll.u32 %v1104_v37, 16  ;;  %v10156_v39 = vld [vmem:[#allocation8 + $0x670] ss:$8 sps:$4 sm:$0xff]  }
 0x170   : > { %7600 = vmatpush1.bf16.msra.mxu0 %v10144_v57  ;;  %v1295_v57 = vrot.slane %v1293_v32, 4  ;;  %v1286_v33 = vor.u32 %v1285_v6, %v1282_v44  ;;  %v1304_v58 = vshrl.u32 %v1105_v16, 16  ;;  %v1307_v61 = vshll.u32 %v1105_v16, 16  ;;  %v10197_v8 = vld [vmem:[#allocation8 + $0x284] ss:$8 sps:$4 sm:$0xff]  }
 0x171   : > { %6681 = vmatmul.mubr.bf16.gmra.mrb[8].mxu1 %v8680_v20  ;;  %7601 = vmatprep.subr.bf16.mxu0 %v10149_v29  ;;  %v1273_v20 = vrot.slane %v1272_v25, 4  ;;  %v8825_v29 = vrot.slane %v2881_v24, 9  ;;  %v1313_v4 = vshll.u32 %v11749_v27, 16  ;;  %v8844_v2 = vcombine.low %v11724_v60, %v11728_v53  ;;  %v10195_v15 = vld [vmem:[#allocation8 + $0x280] ss:$8 sps:$4 sm:$0xff]   ;;  %v11775_v60 = vld [vmem:[#allocation2 + $0xc8] sm:$0xff] }
 0x172   : > { %6690 = vmatprep.mubr.bf16.mxu1 %v8683_v55  ;;  %6830 = vmatpush1.bf16.msra.mxu1 %v10177_v21  ;;  %v1296_v43 = vor.u32 %v1295_v57, %v11734_v42  ;;  %v11751_v55 = vld [vmem:[#allocation2 + $0xa8] sm:$0xee]  ;;  %v2886_v21 = vld [vmem:[#allocation2 + $0xb8] sm:$0x11]  ;;  %v8684_v22 = vcombine.low %v11711_v11, %v11715_v7  ;;  %v1287_v26 = vrot.slane %v1286_v33, 4  ;;  %v1301_v10 = vrot.slane %v1299_v52, 5 }
 0x173   : > { %7453 = vmatmul.mubr.bf16.gmra.mrb[8].mxu0 %v8840_v17  ;;  %6831 = vmatprep.subr.bf16.mxu1 %v10185_v36  ;;  %v11746_v51 = vsel %vm11053_vm2, %v1273_v20, %v1277_v5  ;;  %v1317_v17 = vshrl.u32 %v11749_v27, 16  ;;  %v11761_v13 = vsel %vm11589_vm5, %v8825_v29, %v2999_v19  ;;  %v11765_v36 = vsel %vm11589_vm5, %v3001_v45, %v3002_v49  ;;  %v10164_v11 = vld [vmem:[#allocation8 + $0x684] ss:$8 sps:$4 sm:$0xff]   ;;  %v10162_v28 = vld [vmem:[#allocation8 + $0x680] ss:$8 sps:$4 sm:$0xff]  }
 0x174   : > { %7462 = vmatprep.mubr.bf16.mxu0 %v8843_v56  ;;  %7602 = vmatpush1.bf16.msra.mxu0 %v10147_v3  ;;  %v3006_v56 = vrot.slane %v11749_v27, 5  ;;  %v1108_v3 = vld [vmem:[#allocation2 + $0xc0] sm:$0xff]  ;;  %v8687_v46 = vcombine.high %v11742_v35, %v11746_v51  ;;  %v1297_v48 = vrot.slane %v1296_v43, 4  ;;  %v1306_v7 = vrot.slane %v1304_v58, 4  ;;  %v2889_v57 = vld [vmem:[#allocation2 + $0xd0] sm:$0x11] }
 0x175   : > { %7603 = vmatprep.subr.bf16.mxu0 %v10152_v12  ;;  %v1107_v12 = vld [vmem:[#allocation2 + $0xb8] sm:$0x11]  ;;  %v1309_v14 = vrot.slane %v1307_v61, 5  ;;  %v11770_v30 = vrot.slane %v1313_v4, 5  ;;  %v1319_v25 = vrot.slane %v1317_v17, 4  ;;  %v1328_v53 = vshrl.u32 %v1108_v3, 16 }
 0x176   : > { %6832 = vmatpush1.bf16.msra.mxu1 %v10183_v0  ;;  %v8847_v0 = vcombine.high %v11761_v13, %v11765_v36  ;;  %v1331_v24 = vshll.u32 %v1108_v3, 16  ;;  %v3009_v32 = vrot.slane %v2886_v21, 5  ;;  %v11782_v9 = vsel %vm11053_vm2, %v1287_v26, %v11734_v42  ;;  %v11784_v5 = vld [vmem:[#allocation2 + $0xc0] sm:$0xee]  ;;  %v1110_v43 = vld [vmem:[#allocation2 + $0xd0] sm:$0x11] }
 0x177   : > { %6833 = vmatprep.subr.bf16.mxu1 %v10188_v34  ;;  %v1337_v34 = vshll.u32 %v11775_v60, 16  ;;  %v10173_v19 = vld [vmem:[#allocation8 + $0x694] ss:$8 sps:$4 sm:$0xff]   ;;  %v1310_v20 = vor.u32 %v1309_v14, %v1306_v7  ;;  %v1320_v44 = vor.u32 %v1319_v25, %v11770_v30  ;;  %v1323_v6 = vshll.u32 %v1107_v12, 16  ;;  %v10201_v16 = vld [vmem:[#allocation8 + $0x290] ss:$8 sps:$4 sm:$0xff]  }
 0x178   : > { %7604 = vmatpush1.bf16.msra.mxu0 %v10150_v31  ;;  %v3008_v31 = vrot.slane %v3006_v56, 4  ;;  %v10203_v37 = vld [vmem:[#allocation8 + $0x294] ss:$8 sps:$4 sm:$0xff]   ;;  %v8686_v42 = vcombine.low %v11742_v35, %v11746_v51  ;;  %v10171_v33 = vld [vmem:[#allocation8 + $0x690] ss:$8 sps:$4 sm:$0xff]   ;;  %v8846_v35 = vcombine.low %v11761_v13, %v11765_v36  ;;  %v1111_v52 = vld [vmem:[#allocation2 + $0xd8] sm:$0xff] }
 0x179   : > { %6691 = vmatmul.mubr.bf16.gmra.mrb[12].mxu1 %v8682_v1  ;;  %7605 = vmatprep.subr.bf16.mxu0 %v10155_v40  ;;  %v8826_v1 = vrot.slane %v11751_v55, 9  ;;  %v11788_v40 = vsel %vm11053_vm2, %v1297_v48, %v1301_v10  ;;  %v11802_v49 = vrot.slane %v1337_v34, 5  ;;  %v10182_v27 = vld [vmem:[#allocation8 + $0x6a4] ss:$8 sps:$4 sm:$0xff]   ;;  %v1321_v55 = vrot.slane %v1320_v44, 4 }
 0x17a   : > { %6700 = vmatprep.mubr.bf16.mxu1 %v8685_v47  ;;  %6834 = vmatpush1.bf16.msra.mxu1 %v10186_v23  ;;  %v1341_v47 = vshrl.u32 %v11775_v60, 16  ;;  %v3013_v23 = vrot.slane %v11775_v60, 5  ;;  %v11800_v45 = vsel %vm11589_vm5, %v3008_v31, %v3009_v32  ;;  %v8689_v51 = vcombine.high %v11782_v9, %v11788_v40  ;;  %v10204_v4 = vld [vmem:[#allocation8 + $0x2a0] ss:$8 sps:$4 sm:$0xff]   ;;  %v11812_v36 = vld [vmem:[#allocation2 + $0xe0] sm:$0xff] }
 0x17b   : > { %7463 = vmatmul.mubr.bf16.gmra.mrb[12].mxu0 %v8842_v63  ;;  %6835 = vmatprep.subr.bf16.mxu1 %v10194_v41  ;;  %v1330_v63 = vrot.slane %v1328_v53, 4  ;;  %v10206_v41 = vld [vmem:[#allocation8 + $0x2a4] ss:$8 sps:$4 sm:$0xff]   ;;  %v11796_v29 = vsel %vm11589_vm5, %v8826_v1, %v3006_v56  ;;  %v1325_v58 = vrot.slane %v1323_v6, 5  ;;  %v8827_v61 = vrot.slane %v11784_v5, 9 }
 0x17c   : > { %7472 = vmatprep.mubr.bf16.mxu0 %v8845_v38  ;;  %7606 = vmatpush1.bf16.msra.mxu0 %v10153_v50  ;;  %v1333_v38 = vrot.slane %v1331_v24, 5  ;;  %v1343_v50 = vrot.slane %v1341_v47, 4  ;;  %v8849_v17 = vcombine.high %v11796_v29, %v11800_v45  ;;  %v1347_v13 = vshll.u32 %v1110_v43, 16  ;;  %v10191_v10 = vld [vmem:[#allocation8 + $0x6b4] ss:$8 sps:$4 sm:$0xff]  }
 0x17d   : > { %7607 = vmatprep.subr.bf16.mxu0 %v10158_v59  ;;  %v1311_v59 = vrot.slane %v1310_v20, 4  ;;  %v1352_v56 = vshrl.u32 %v1111_v52, 16  ;;  %v1355_v3 = vshll.u32 %v1111_v52, 16  ;;  %v1361_v26 = vshll.u32 %v11812_v36, 16  ;;  %v2892_v14 = vld [vmem:[#allocation2 + $0xe8] sm:$0x11] }
 0x17e   : > { %6836 = vmatpush1.bf16.msra.mxu1 %v10192_v62  ;;  %v3015_v62 = vrot.slane %v3013_v23, 4  ;;  %v1334_v21 = vor.u32 %v1333_v38, %v1330_v63  ;;  %v1365_v48 = vshrl.u32 %v11812_v36, 16  ;;  %v8688_v12 = vcombine.low %v11782_v9, %v11788_v40  ;;  %v10210_v25 = vld [vmem:[#allocation8 + $0x2b0] ss:$8 sps:$4 sm:$0xff]   ;;  %v10215_v60 = vld [vmem:[#allocation8 + $0x2c4] ss:$8 sps:$4 sm:$0xff]  }
 0x17f   : > { %6837 = vmatprep.subr.bf16.mxu1 %v10197_v8  ;;  %v10212_v8 = vld [vmem:[#allocation8 + $0x2b4] ss:$8 sps:$4 sm:$0xff]   ;;  %v11827_v7 = vsel %vm11053_vm2, %v1321_v55, %v1325_v58  ;;  %v1349_v24 = vrot.slane %v1347_v13, 5  ;;  %v1354_v31 = vrot.slane %v1352_v56, 4  ;;  %v1357_v32 = vrot.slane %v1355_v3, 5 }
 0x180   : > { %7608 = vmatpush1.bf16.msra.mxu0 %v10156_v39  ;;  %v10180_v39 = vld [vmem:[#allocation8 + $0x6a0] ss:$8 sps:$4 sm:$0xff]   ;;  %v1335_v1 = vrot.slane %v1334_v21, 4  ;;  %v11840_v47 = vrot.slane %v1361_v26, 5  ;;  %v1367_v9 = vrot.slane %v1365_v48, 4  ;;  %v1117_v48 = vld [vmem:[#allocation2 + $0x108] sm:$0xff] }
 0x181   : > { %6701 = vmatmul.mubr.bf16.gmra.mrb[16].mxu1 %v8684_v22  ;;  %7609 = vmatprep.subr.bf16.mxu0 %v10164_v11  ;;  %v1344_v22 = vor.u32 %v1343_v50, %v11802_v49  ;;  %v11823_v11 = vsel %vm11053_vm2, %v1311_v59, %v11770_v30  ;;  %v3020_v30 = vrot.slane %v11812_v36, 5  ;;  %v1114_v5 = vld [vmem:[#allocation2 + $0xf0] sm:$0xff]  ;;  %v1358_v38 = vor.u32 %v1357_v32, %v1354_v31  ;;  %v10219_v59 = vld [vmem:[#allocation8 + $0x2d0] ss:$8 sps:$4 sm:$0xff]  }
 0x182   : > { %6710 = vmatprep.mubr.bf16.mxu1 %v8687_v46  ;;  %6838 = vmatpush1.bf16.msra.mxu1 %v10195_v15  ;;  %v11814_v46 = vld [vmem:[#allocation2 + $0xd8] sm:$0xee]  ;;  %v11831_v15 = vsel %vm11589_vm5, %v8827_v61, %v3013_v23  ;;  %v8691_v34 = vcombine.high %v11823_v11, %v11827_v7  ;;  %v10221_v23 = vld [vmem:[#allocation8 + $0x2d4] ss:$8 sps:$4 sm:$0xff]   ;;  %v8690_v52 = vcombine.low %v11823_v11, %v11827_v7  ;;  %v1400_v32 = vshrl.u32 %v1117_v48, 16 }
 0x183   : > { %7473 = vmatmul.mubr.bf16.gmra.mrb[16].mxu0 %v8844_v2  ;;  %6839 = vmatprep.subr.bf16.mxu1 %v10203_v37  ;;  %v3016_v2 = vrot.slane %v2889_v57, 5  ;;  %v1345_v53 = vrot.slane %v1344_v22, 4  ;;  %v8848_v37 = vcombine.low %v11796_v29, %v11800_v45  ;;  %v8828_v40 = vrot.slane %v11814_v46, 9  ;;  %v10200_v20 = vld [vmem:[#allocation8 + $0x6c4] ss:$8 sps:$4 sm:$0xff]  }
 0x184   : > { %7482 = vmatprep.mubr.bf16.mxu0 %v8847_v0  ;;  %7610 = vmatpush1.bf16.msra.mxu0 %v10162_v28  ;;  %v1113_v28 = vld [vmem:[#allocation2 + $0xe8] sm:$0x11]  ;;  %v10213_v44 = vld [vmem:[#allocation8 + $0x2c0] ss:$8 sps:$4 sm:$0xff]   ;;  %v11850_v57 = vsel %vm11053_vm2, %v1335_v1, %v11802_v49  ;;  %v1376_v29 = vshrl.u32 %v1114_v5, 16  ;;  %v1379_v45 = vshll.u32 %v1114_v5, 16 }
 0x185   : > { %7611 = vmatprep.subr.bf16.mxu0 %v10173_v19  ;;  %v11835_v0 = vsel %vm11589_vm5, %v3015_v62, %v3016_v2  ;;  %v10189_v19 = vld [vmem:[#allocation8 + $0x6b0] ss:$8 sps:$4 sm:$0xff]   ;;  %v11854_v63 = vsel %vm11053_vm2, %v1345_v53, %v1349_v24  ;;  %v10198_v50 = vld [vmem:[#allocation8 + $0x6c0] ss:$8 sps:$4 sm:$0xff]   ;;  %v1371_v49 = vshll.u32 %v1113_v28, 16  ;;  %v11869_v58 = vsel %vm11589_vm5, %v8828_v40, %v3020_v30 }
 0x186   : > { %6840 = vmatpush1.bf16.msra.mxu1 %v10201_v16  ;;  %v8851_v6 = vcombine.high %v11831_v15, %v11835_v0  ;;  %v3022_v16 = vrot.slane %v3020_v30, 4  ;;  %v10209_v43 = vld [vmem:[#allocation8 + $0x6d4] ss:$8 sps:$4 sm:$0xff]   ;;  %v8693_v55 = vcombine.high %v11850_v57, %v11854_v63  ;;  %v10224_v62 = vld [vmem:[#allocation8 + $0x2e4] ss:$8 sps:$4 sm:$0xff]   ;;  %v1359_v2 = vrot.slane %v1358_v38, 4 }
 0x187   : > { %6841 = vmatprep.subr.bf16.mxu1 %v10206_v41  ;;  %v11856_v41 = vld [vmem:[#allocation2 + $0xf8] sm:$0xff]  ;;  %v1381_v22 = vrot.slane %v1379_v45, 5  ;;  %v1373_v3 = vrot.slane %v1371_v49, 5  ;;  %v10227_v24 = vld [vmem:[#allocation8 + $0x6f4] ss:$8 sps:$4 sm:$0xff]   ;;  %v8692_v5 = vcombine.low %v11850_v57, %v11854_v63  ;;  %v1402_v45 = vrot.slane %v1400_v32, 4 }
 0x188   : > { %7612 = vmatpush1.bf16.msra.mxu0 %v10171_v33  ;;  %v1368_v33 = vor.u32 %v1367_v9, %v11840_v47  ;;  %v3027_v21 = vrot.slane %v11856_v41, 5  ;;  %v10218_v13 = vld [vmem:[#allocation8 + $0x6e4] ss:$8 sps:$4 sm:$0xff]   ;;  %v10222_v36 = vld [vmem:[#allocation8 + $0x2e0] ss:$8 sps:$4 sm:$0xff]   ;;  %v11888_v1 = vsel %vm11053_vm2, %v1359_v2, %v11840_v47  ;;  %v11910_v57 = vld [vmem:[#allocation2 + $0x128] sm:$0xff] }
 0x189   : > { %6711 = vmatmul.mubr.bf16.gmra.mrb[20].mxu1 %v8686_v42  ;;  %7613 = vmatprep.subr.bf16.mxu0 %v10182_v27  ;;  %v3023_v42 = vrot.slane %v2892_v14, 5  ;;  %v11863_v27 = vld [vmem:[#allocation2 + $0xf0] sm:$0xee]  ;;  %v1120_v40 = vld [vmem:[#allocation2 + $0x120] sm:$0xff] }
 0x18a   : > { %6720 = vmatprep.mubr.bf16.mxu1 %v8689_v51  ;;  %6842 = vmatpush1.bf16.msra.mxu1 %v10204_v4  ;;  %v1389_v51 = vshrl.u32 %v11856_v41, 16  ;;  %v2895_v4 = vld [vmem:[#allocation2 + $0x100] sm:$0x11]  ;;  %v1369_v56 = vrot.slane %v1368_v33, 4  ;;  %v8829_v7 = vrot.slane %v11863_v27, 9  ;;  %v11883_v14 = vld [vmem:[#allocation2 + $0x110] sm:$0xff] }
 0x18b   : > { %7483 = vmatmul.mubr.bf16.gmra.mrb[20].mxu0 %v8846_v35  ;;  %6843 = vmatprep.subr.bf16.mxu1 %v10212_v8  ;;  %v1385_v35 = vshll.u32 %v11856_v41, 16  ;;  %v11873_v61 = vsel %vm11589_vm5, %v3022_v16, %v3023_v42  ;;  %v1378_v8 = vrot.slane %v1376_v29, 4  ;;  %v3029_v30 = vrot.slane %v3027_v21, 4  ;;  %v1119_v42 = vld [vmem:[#allocation2 + $0x118] sm:$0x11] }
 0x18c   : > { %7492 = vmatprep.mubr.bf16.mxu0 %v8849_v17  ;;  %7614 = vmatpush1.bf16.msra.mxu0 %v10180_v39  ;;  %v10207_v17 = vld [vmem:[#allocation8 + $0x6d0] ss:$8 sps:$4 sm:$0xff]   ;;  %v1391_v26 = vrot.slane %v1389_v51, 4  ;;  %v8853_v11 = vcombine.high %v11869_v58, %v11873_v61  ;;  %v1409_v9 = vshll.u32 %v11883_v14, 16  ;;  %v1413_v47 = vshrl.u32 %v11883_v14, 16 }
 0x18d   : > { %7615 = vmatprep.subr.bf16.mxu0 %v10191_v10  ;;  %v1116_v39 = vld [vmem:[#allocation2 + $0x100] sm:$0x11]  ;;  %v11876_v46 = vrot.slane %v1385_v35, 5  ;;  %v10230_v10 = vld [vmem:[#allocation8 + $0x2f4] ss:$8 sps:$4 sm:$0xff]   ;;  %v1382_v53 = vor.u32 %v1381_v22, %v1378_v8  ;;  %v3034_v16 = vrot.slane %v11883_v14, 5  ;;  %v8852_v51 = vcombine.low %v11869_v58, %v11873_v61 }
 0x18e   : > { %6844 = vmatpush1.bf16.msra.mxu1 %v10210_v25  ;;  %v10216_v25 = vld [vmem:[#allocation8 + $0x6e0] ss:$8 sps:$4 sm:$0xff]   ;;  %v1395_v31 = vshll.u32 %v1116_v39, 16  ;;  %v10235_v63 = vld [vmem:[#allocation8 + $0x704] ss:$8 sps:$4 sm:$0xff]   ;;  %v1411_v33 = vrot.slane %v1409_v9, 5 }
 0x18f   : > { %6845 = vmatprep.subr.bf16.mxu1 %v10215_v60  ;;  %v3030_v60 = vrot.slane %v2895_v4, 5  ;;  %v1392_v28 = vor.u32 %v1391_v26, %v11876_v46  ;;  %v1383_v38 = vrot.slane %v1382_v53, 4  ;;  %v1415_v49 = vrot.slane %v1413_v47, 4  ;;  %v2899_v58 = vld [vmem:[#allocation2 + $0x120] sm:$0xee] }
 0x190   : > { %7616 = vmatpush1.bf16.msra.mxu0 %v10189_v19  ;;  %v2896_v19 = vld [vmem:[#allocation2 + $0x108] sm:$0xee]  ;;  %v1397_v29 = vrot.slane %v1395_v31, 5  ;;  %v1424_v35 = vshrl.u32 %v1120_v40, 16  ;;  %v1437_v27 = vshrl.u32 %v11910_v57, 16  ;;  %v3036_v4 = vrot.slane %v3034_v16, 4 }
 0x191   : > { %6721 = vmatmul.mubr.bf16.gmra.mrb[24].mxu1 %v8688_v12  ;;  %7617 = vmatprep.subr.bf16.mxu0 %v10200_v20  ;;  %v8850_v12 = vcombine.low %v11831_v15, %v11835_v0  ;;  %v10228_v15 = vld [vmem:[#allocation8 + $0x2f0] ss:$8 sps:$4 sm:$0xff]   ;;  %v11892_v0 = vsel %vm11053_vm2, %v1369_v56, %v1373_v3  ;;  %v1393_v41 = vrot.slane %v1392_v28, 4  ;;  %v1419_v2 = vshll.u32 %v1119_v42, 16  ;;  %v10274_v61 = vld [vmem:[#allocation8 + $0x304] ss:$8 sps:$4 sm:$0xff]  }
 0x192   : > { %6730 = vmatprep.mubr.bf16.mxu1 %v8691_v34  ;;  %6846 = vmatpush1.bf16.msra.mxu1 %v10213_v44  ;;  %v1403_v34 = vshll.u32 %v1117_v48, 16  ;;  %v8695_v20 = vcombine.high %v11888_v1, %v11892_v0  ;;  %v11903_v44 = vsel %vm11589_vm5, %v8829_v7, %v3027_v21  ;;  %v1416_v8 = vor.u32 %v1415_v49, %v1411_v33  ;;  %v11952_v49 = vld [vmem:[#allocation2 + $0x150] sm:$0xff] }
 0x193   : > { %7493 = vmatmul.mubr.bf16.gmra.mrb[24].mxu0 %v8848_v37  ;;  %6847 = vmatprep.subr.bf16.mxu1 %v10221_v23  ;;  %v2898_v37 = vld [vmem:[#allocation2 + $0x118] sm:$0x11]  ;;  %v10225_v23 = vld [vmem:[#allocation8 + $0x6f0] ss:$8 sps:$4 sm:$0xff]   ;;  %v11925_v21 = vsel %vm11053_vm2, %v1393_v41, %v1397_v29  ;;  %v3041_v22 = vrot.slane %v11910_v57, 5  ;;  %v8694_v26 = vcombine.low %v11888_v1, %v11892_v0  ;;  %v1421_v14 = vrot.slane %v1419_v2, 5 }
 0x194   : > { %7502 = vmatprep.mubr.bf16.mxu0 %v8851_v6  ;;  %7618 = vmatpush1.bf16.msra.mxu0 %v10198_v50  ;;  %v11907_v6 = vsel %vm11589_vm5, %v3029_v30, %v3030_v60  ;;  %v1405_v50 = vrot.slane %v1403_v34, 5  ;;  %v1123_v30 = vld [vmem:[#allocation2 + $0x138] sm:$0xff]  ;;  %v1417_v53 = vrot.slane %v1416_v8, 4 }
 0x195   : > { %7619 = vmatprep.subr.bf16.mxu0 %v10209_v43  ;;  %v1427_v43 = vshll.u32 %v1120_v40, 16  ;;  %v3043_v1 = vrot.slane %v3041_v22, 4  ;;  %v1448_v34 = vshrl.u32 %v1123_v30, 16  ;;  %v1451_v9 = vshll.u32 %v1123_v30, 16  ;;  %v11962_v2 = vld [vmem:[#allocation2 + $0x158] sm:$0xff]  ;;  %v11974_v30 = vld [vmem:[#allocation2 + $0x168] sm:$0xff] }
 0x196   : > { %6848 = vmatpush1.bf16.msra.mxu1 %v10219_v59  ;;  %v8855_v59 = vcombine.high %v11903_v44, %v11907_v6  ;;  %v1406_v39 = vor.u32 %v1405_v50, %v1402_v45 }
 0x197   : > { %6849 = vmatprep.subr.bf16.mxu1 %v10224_v62  ;;  %v11921_v62 = vsel %vm11053_vm2, %v1383_v38, %v11876_v46  ;;  %v1429_v56 = vrot.slane %v1427_v43, 5  ;;  %v1439_v46 = vrot.slane %v1437_v27, 4  ;;  %v1125_v38 = vld [vmem:[#allocation2 + $0x148] sm:$0x11]  ;;  %v1450_v41 = vrot.slane %v1448_v34, 4 }
 0x198   : > { %7620 = vmatpush1.bf16.msra.mxu0 %v10207_v17  ;;  %v3037_v17 = vrot.slane %v2898_v37, 5  ;;  %v8697_v7 = vcombine.high %v11921_v62, %v11925_v21  ;;  %v1407_v60 = vrot.slane %v1406_v39, 4  ;;  %v2902_v37 = vld [vmem:[#allocation2 + $0x138] sm:$0xee]  ;;  %v1453_v29 = vrot.slane %v1451_v9, 5 }
 0x199   : > { %6731 = vmatmul.mubr.bf16.gmra.mrb[28].mxu1 %v8690_v52  ;;  %7621 = vmatprep.subr.bf16.mxu0 %v10218_v13  ;;  %v1433_v52 = vshll.u32 %v11910_v57, 16  ;;  %v2901_v13 = vld [vmem:[#allocation2 + $0x130] sm:$0x11]  ;;  %v8832_v43 = vrot.slane %v2902_v37, 9  ;;  %v1485_v39 = vshrl.u32 %v11962_v2, 16 }
 0x19a   : > { %6740 = vmatprep.mubr.bf16.mxu1 %v8693_v55  ;;  %6850 = vmatpush1.bf16.msra.mxu1 %v10222_v36  ;;  %v8830_v55 = vrot.slane %v2896_v19, 9  ;;  %v1426_v36 = vrot.slane %v1424_v35, 4  ;;  %v8696_v19 = vcombine.low %v11921_v62, %v11925_v21  ;;  %v1412_v40 = vsel %vm11053_vm2, %v1407_v60, %v1411_v33 }
 0x19b   : > { %7503 = vmatmul.mubr.bf16.gmra.mrb[28].mxu0 %v8850_v12  ;;  %6851 = vmatprep.subr.bf16.mxu1 %v10230_v10  ;;  %v1435_v3 = vrot.slane %v1433_v52, 5  ;;  %v3038_v10 = vsel %vm11589_vm5, %v3036_v4, %v3037_v17  ;;  %v1122_v12 = vld [vmem:[#allocation2 + $0x130] sm:$0x11]  ;;  %v1454_v17 = vor.u32 %v1453_v29, %v1450_v41  ;;  %v1481_v21 = vshll.u32 %v11962_v2, 16  ;;  %v1131_v41 = vld [vmem:[#allocation2 + $0x178] sm:$0x11] }
 0x19c   : > { %7512 = vmatprep.mubr.bf16.mxu0 %v8853_v11  ;;  %7622 = vmatpush1.bf16.msra.mxu0 %v10216_v25  ;;  %v3035_v48 = vsel %vm11589_vm5, %v8830_v55, %v3034_v16  ;;  %v8854_v11 = vcombine.low %v11903_v44, %v11907_v6  ;;  %v8831_v25 = vrot.slane %v2899_v58, 9  ;;  %v1430_v28 = vor.u32 %v1429_v56, %v1426_v36  ;;  %v2905_v56 = vld [vmem:[#allocation2 + $0x150] sm:$0xee] }
 0x19d   : > { %7623 = vmatprep.subr.bf16.mxu0 %v10227_v24  ;;  %v3044_v24 = vrot.slane %v2901_v13, 5  ;;  %v8857_v0 = vcombine.high %v3035_v48, %v3038_v10  ;;  %v1440_v31 = vor.u32 %v1439_v46, %v1435_v3  ;;  %v1443_v32 = vshll.u32 %v1122_v12, 16  ;;  %v1128_v12 = vld [vmem:[#allocation2 + $0x160] sm:$0x11] }
 0x19e   : > { %6852 = vmatpush1.bf16.msra.mxu1 %v10228_v15  ;;  %v2903_v15 = vld [vmem:[#allocation2 + $0x140] sm:$0xff]  ;;  %v11946_v44 = vsel %vm11589_vm5, %v8831_v25, %v3041_v22  ;;  %v1431_v16 = vrot.slane %v1430_v28, 4  ;;  %v8856_v35 = vcombine.low %v3035_v48, %v3038_v10  ;;  %v1467_v55 = vshll.u32 %v1125_v38, 16 }
 0x19f   : > { %7014 = vmatprep.subr.bf16.mxu1 %v10274_v61  ;;  %v1457_v47 = vshll.u32 %v2903_v15, 16  ;;  %v11950_v6 = vsel %vm11589_vm5, %v3043_v1, %v3044_v24  ;;  %v1441_v42 = vrot.slane %v1440_v31, 4  ;;  %v1445_v57 = vrot.slane %v1443_v32, 5  ;;  %v2907_v48 = vld [vmem:[#allocation2 + $0x160] sm:$0x11]  ;;  %v11982_v31 = vld [vmem:[#allocation2 + $0x170] sm:$0xff] }
 0x1a0   : > { %7624 = vmatpush1.bf16.msra.mxu0 %v10225_v23  ;;  %v2904_v23 = vld [vmem:[#allocation2 + $0x148] sm:$0x11]  ;;  %v11958_v52 = vsel %vm11053_vm2, %v1431_v16, %v1435_v3  ;;  %v1472_v58 = vshrl.u32 %v11952_v49, 16  ;;  %v1475_v61 = vshll.u32 %v11952_v49, 16  ;;  %v1455_v3 = vrot.slane %v1454_v17, 4 }
 0x1a1   : > { %6741 = vmatmul.mubr.bf16.gmra.mrb[32].mxu1 %v8692_v5  ;;  %7786 = vmatprep.subr.bf16.mxu0 %v10235_v63  ;;  %v1461_v5 = vshrl.u32 %v2903_v15, 16  ;;  %v3048_v63 = vrot.slane %v2903_v15, 5  ;;  %v1459_v45 = vrot.slane %v1457_v47, 5  ;;  %v1446_v4 = vsel %vm11053_vm2, %v1441_v42, %v1445_v57  ;;  %v2908_v16 = vld [vmem:[#allocation2 + $0x168] sm:$0xee] }
 0x1a2   : > { %6750 = vmatprep.mubr.bf16.mxu1 %v8695_v20  ;;  %v1422_v20 = vsel %vm11053_vm2, %v1417_v53, %v1421_v14  ;;  %v8701_v22 = vcombine.high %v11958_v52, %v1446_v4  ;;  %v3055_v10 = vrot.slane %v11962_v2, 5  ;;  %v1483_v14 = vrot.slane %v1481_v21, 5  ;;  %v2910_v42 = vld [vmem:[#allocation2 + $0x178] sm:$0x11] }
 0x1a3   : > { %7513 = vmatmul.mubr.bf16.gmra.mrb[32].mxu0 %v8852_v51  ;;  %v1463_v50 = vrot.slane %v1461_v5, 4  ;;  %v8699_v33 = vcombine.high %v1412_v40, %v1422_v20  ;;  %v8859_v51 = vcombine.high %v11946_v44, %v11950_v6  ;;  %v3050_v27 = vrot.slane %v3048_v63, 4 }
 0x1a4   : > { %7522 = vmatprep.mubr.bf16.mxu0 %v8855_v59  ;;  %v3051_v59 = vrot.slane %v2904_v23, 5  ;;  %v8698_v8 = vcombine.low %v1412_v40, %v1422_v20  ;;  %v3049_v13 = vsel %vm11589_vm5, %v8832_v43, %v3048_v63  ;;  %v1487_v25 = vrot.slane %v1485_v39, 4  ;;  %v2912_v43 = vld [vmem:[#allocation2 + $0x188] sm:$0xff] }
 0x1a5   : > { %v1464_v62 = vor.u32 %v1463_v50, %v1459_v45  ;;  %v8858_v60 = vcombine.low %v11946_v44, %v11950_v6  ;;  %v8833_v1 = vrot.slane %v2905_v56, 9  ;;  %v1460_v24 = vsel %vm11053_vm2, %v1455_v3, %v1459_v45 }
 0x1a6   : > { %v3052_v36 = vsel %vm11589_vm5, %v3050_v27, %v3051_v59  ;;  %v3058_v28 = vrot.slane %v2907_v48, 5  ;;  %v1488_v34 = vor.u32 %v1487_v25, %v1483_v14  ;;  %v1491_v9 = vshll.u32 %v1128_v12, 16  ;;  %v12006_v25 = vld [vmem:[#allocation2] sm:$0xff] }
 0x1a7   : > { %v1465_v46 = vrot.slane %v1464_v62, 4  ;;  %v8861_v53 = vcombine.high %v3049_v13, %v3052_v36  ;;  %v1496_v47 = vshrl.u32 %v11974_v30, 16  ;;  %v1499_v5 = vshll.u32 %v11974_v30, 16 }
 0x1a8   : > { %v1509_v37 = vshrl.u32 %v11982_v31, 16  ;;  %v8700_v40 = vcombine.low %v11958_v52, %v1446_v4  ;;  %v3056_v44 = vsel %vm11589_vm5, %v8833_v1, %v3055_v10  ;;  %v1489_v23 = vrot.slane %v1488_v34, 4  ;;  %v1681_v1 = vld [vmem:[#allocation2 + $0x10] sm:$0x11] }
 0x1a9   : > { %6751 = vmatmul.mubr.bf16.gmra.mrb[36].mxu1 %v8694_v26  ;;  %v1469_v26 = vrot.slane %v1467_v55, 5  ;;  %v1493_v63 = vrot.slane %v1491_v9, 5  ;;  %v3062_v38 = vrot.slane %v11982_v31, 5  ;;  %v1498_v29 = vrot.slane %v1496_v47, 4 }
 0x1aa   : > { %6760 = vmatprep.mubr.bf16.mxu1 %v8697_v7  ;;  %v1477_v7 = vrot.slane %v1475_v61, 5  ;;  %v1501_v45 = vrot.slane %v1499_v5, 5  ;;  %v8834_v27 = vrot.slane %v2908_v16, 9  ;;  %v3065_v55 = vrot.slane %v2910_v42, 5  ;;  %v12013_v5 = vld [vmem:[#allocation2 + $0x20] sm:$0xff] }
 0x1ab   : > { %7523 = vmatmul.mubr.bf16.gmra.mrb[36].mxu0 %v8854_v11  ;;  %v1474_v11 = vrot.slane %v1472_v58, 4  ;;  %v1470_v15 = vsel %vm11053_vm2, %v1465_v46, %v1469_v26  ;;  %v3064_v59 = vrot.slane %v3062_v38, 4  ;;  %v1494_v4 = vsel %vm11053_vm2, %v1489_v23, %v1493_v63  ;;  %v12022_v23 = vld [vmem:[#allocation2 + $0x30] sm:$0xff]  ;;  %v12024_v63 = vld [vmem:[#allocation2 + $0x38] sm:$0xff] }
 0x1ac   : > { %7532 = vmatprep.mubr.bf16.mxu0 %v8857_v0  ;;  %v3057_v0 = vrot.slane %v3055_v10, 4  ;;  %v8703_v20 = vcombine.high %v1460_v24, %v1470_v15  ;;  %v1502_v17 = vor.u32 %v1501_v45, %v1498_v29  ;;  %v1515_v58 = vshll.u32 %v1131_v41, 16 }
 0x1ad   : > { %v1478_v32 = vor.u32 %v1477_v7, %v1474_v11  ;;  %v8702_v61 = vcombine.low %v1460_v24, %v1470_v15  ;;  %v3063_v39 = vsel %vm11589_vm5, %v8834_v27, %v3062_v38  ;;  %v1783_v9 = vrot.slane %v1681_v1, 5  ;;  %v12038_v27 = vld [vmem:[#allocation2 + $0x60] sm:$0xff] }
 0x1ae   : > { %v3059_v6 = vsel %vm11589_vm5, %v3057_v0, %v3058_v28  ;;  %v1503_v56 = vrot.slane %v1502_v17, 4  ;;  %v1517_v46 = vrot.slane %v1515_v58, 5  ;;  %v8893_v16 = vcombine.high %v11952_v49, %v11962_v2 }
 0x1af   : > { %v1479_v57 = vrot.slane %v1478_v32, 4  ;;  %v8862_v26 = vcombine.low %v3056_v44, %v3059_v6  ;;  %v8892_v41 = vcombine.low %v11952_v49, %v11962_v2  ;;  %v1794_v58 = vrot.slane %v12024_v63, 5 }
 0x1b1   : > { %6761 = vmatmul.mubr.bf16.gmra.mrb[40].mxu1 %v8696_v19  ;;  %v1505_v19 = vshll.u32 %v11982_v31, 16  ;;  %v1484_v52 = vsel %vm11053_vm2, %v1479_v57, %v1483_v14 }
 0x1b2   : > { %6770 = vmatprep.mubr.bf16.mxu1 %v8699_v33  ;;  %v1511_v33 = vrot.slane %v1509_v37, 4  ;;  %v8705_v21 = vcombine.high %v1484_v52, %v1494_v4  ;;  %v8704_v24 = vcombine.low %v1484_v52, %v1494_v4  ;;  %v12036_v52 = vld [vmem:[#allocation2 + $0x50] sm:$0xff]  ;;  %v12040_v4 = vld [vmem:[#allocation2 + $0x68] sm:$0xff] }
 0x1b3   : > { %7533 = vmatmul.mubr.bf16.gmra.mrb[40].mxu0 %v8856_v35  ;;  %v1507_v50 = vrot.slane %v1505_v19, 5  ;;  %v8860_v35 = vcombine.low %v3049_v13, %v3052_v36  ;;  %v2913_v13 = vld [vmem:[#allocation2 + $0x190] sm:$0x11]  ;;  %v3069_v36 = vrot.slane %v2912_v43, 5  ;;  %v12034_v43 = vld [vmem:[#allocation2 + $0x48] sm:$0xff] }
 0x1b4   : > { %7542 = vmatprep.mubr.bf16.mxu0 %v8859_v51  ;;  %v8863_v51 = vcombine.high %v3056_v44, %v3059_v6  ;;  %v3072_v11 = vrot.slane %v2913_v13, 5  ;;  %v1787_v44 = vrot.slane %v12013_v5, 5  ;;  %v1684_v6 = vld [vmem:[#allocation2 + $0x28] sm:$0x11] }
 0x1b5   : > { %v1512_v62 = vor.u32 %v1511_v33, %v1507_v50  ;;  %v3071_v12 = vrot.slane %v3069_v36, 4  ;;  %v1508_v7 = vsel %vm11053_vm2, %v1503_v56, %v1507_v50  ;;  %v1790_v45 = vrot.slane %v1684_v6, 5  ;;  %v10285_v6 = vld [vmem:[#allocation8 + $0x324] ss:$8 sps:$4 sm:$0xff]  }
 0x1b6   : > { %v1789_v29 = vrot.slane %v1787_v44, 4  ;;  %v8895_v50 = vcombine.high %v11974_v30, %v11982_v31  ;;  %v8894_v33 = vcombine.low %v11974_v30, %v11982_v31  ;;  %v8873_v56 = vcombine.high %v12038_v27, %v12040_v4  ;;  %v12232_v30 = vld [vmem:[#allocation2 + $0x78] sm:$0xff]  ;;  %v12234_v31 = vld [vmem:[#allocation2 + $0x80] sm:$0xff] }
 0x1b7   : > { %v1513_v3 = vrot.slane %v1512_v62, 4  ;;  %v3073_v28 = vsel %vm11589_vm5, %v3071_v12, %v3072_v11  ;;  %v10272_v12 = vld [vmem:[#allocation8 + $0x300] ss:$8 sps:$4 sm:$0xff]   ;;  %v3511_v11 = vshll.u32 %v12022_v23, 16 }
 0x1b8   : > { %v12048_v62 = vsel %vm11589_vm5, %v1789_v29, %v1790_v45 }
 0x1b9   : > { %6771 = vmatmul.mubr.bf16.gmra.mrb[44].mxu1 %v8698_v8  ;;  %v3066_v8 = vsel %vm11589_vm5, %v3064_v59, %v3065_v55  ;;  %v1518_v14 = vsel %vm11053_vm2, %v1513_v3, %v1517_v46  ;;  %v1685_v59 = vld [vmem:[#allocation2 + $0x30] sm:$0xee]  ;;  %v1687_v55 = vld [vmem:[#allocation2 + $0x40] sm:$0x11]  ;;  %v3508_v46 = vshrl.u32 %v12022_v23, 16 }
 0x1ba   : > { %6780 = vmatprep.mubr.bf16.mxu1 %v8701_v22  ;;  %v2911_v22 = vld [vmem:[#allocation2 + $0x180] sm:$0xee]  ;;  %v8865_v48 = vcombine.high %v3063_v39, %v3066_v8  ;;  %v8707_v15 = vcombine.high %v1508_v7, %v1518_v14  ;;  %v8864_v47 = vcombine.low %v3063_v39, %v3066_v8  ;;  %v8706_v42 = vcombine.low %v1508_v7, %v1518_v14  ;;  %v3461_v3 = vld [vmem:[#allocation2 + $0x40] sm:$0x11]  ;;  %v10233_v7 = vld [vmem:[#allocation8 + $0x700] ss:$8 sps:$4 sm:$0xff]  }
 0x1bb   : > { %7543 = vmatmul.mubr.bf16.gmra.mrb[44].mxu0 %v8858_v60  ;;  %v8835_v10 = vrot.slane %v2911_v22, 9  ;;  %v1780_v60 = vrot.slane %v12006_v25, 5  ;;  %v8868_v39 = vcombine.low %v12022_v23, %v12024_v63  ;;  %v8871_v8 = vcombine.high %v12034_v43, %v12036_v52 }
 0x1bc   : > { %7552 = vmatprep.mubr.bf16.mxu0 %v8861_v53  ;;  %v1679_v53 = vld [vmem:[#allocation2] sm:$0xee]  ;;  %v8870_v22 = vcombine.low %v12034_v43, %v12036_v52  ;;  %v8710_v13 = vrot.slane %v1685_v59, 9  ;;  %v3510_v1 = vrot.slane %v3508_v46, 4 }
 0x1bd   : > { %v3070_v0 = vsel %vm11589_vm5, %v8835_v10, %v3069_v36  ;;  %v8708_v32 = vrot.slane %v1679_v53, 9  ;;  %v1782_v34 = vrot.slane %v1780_v60, 4  ;;  %v1797_v36 = vrot.slane %v1687_v55, 5  ;;  %v10281_v53 = vld [vmem:[#allocation8 + $0x314] ss:$8 sps:$4 sm:$0xff]  }
 0x1be   : > { %v8867_v19 = vcombine.high %v3070_v0, %v3073_v28  ;;  %v1801_v10 = vrot.slane %v12036_v52, 5 }
 0x1bf   : > { %v1781_v37 = vsel %vm11589_vm5, %v8708_v32, %v1780_v60  ;;  %v1796_v60 = vrot.slane %v1794_v58, 4  ;;  %v3527_v32 = vshll.u32 %v3461_v3, 16 }
 0x1c1   : > { %6781 = vmatmul.mubr.bf16.gmra.mrb[48].mxu1 %v8700_v40  ;;  %v1784_v40 = vsel %vm11589_vm5, %v1782_v34, %v1783_v9  ;;  %v3532_v34 = vshrl.u32 %v12034_v43, 16  ;;  %v12069_v9 = vld [vmem:[#allocation2 + $0x58] sm:$0x11]  ;;  %v3529_v55 = vrot.slane %v3527_v32, 5 }
 0x1c2   : > { %6790 = vmatprep.mubr.bf16.mxu1 %v8703_v20  ;;  %v1682_v20 = vld [vmem:[#allocation2 + $0x18] sm:$0xee]  ;;  %v8725_v57 = vcombine.high %v1781_v37, %v1784_v40 }
 0x1c3   : > { %7553 = vmatmul.mubr.bf16.gmra.mrb[48].mxu0 %v8860_v35  ;;  %v8709_v38 = vrot.slane %v1682_v20, 9  ;;  %v8866_v35 = vcombine.low %v3070_v0, %v3073_v28  ;;  %v3513_v0 = vrot.slane %v3511_v11, 5  ;;  %v3521_v28 = vshrl.u32 %v12024_v63, 16 }
 0x1c4   : > { %7562 = vmatprep.mubr.bf16.mxu0 %v8863_v51  ;;  %v8869_v51 = vcombine.high %v12022_v23, %v12024_v63  ;;  %v12076_v20 = vsel %vm11589_vm5, %v8710_v13, %v1794_v58  ;;  %v3534_v23 = vrot.slane %v3532_v34, 4 }
 0x1c5   : > { %v12044_v17 = vsel %vm11589_vm5, %v8709_v38, %v1787_v44  ;;  %v10279_v44 = vld [vmem:[#allocation8 + $0x310] ss:$8 sps:$4 sm:$0xff]   ;;  %v3464_v38 = vld [vmem:[#allocation2 + $0x58] sm:$0x11] }
 0x1c6   : > { %v8726_v14 = vcombine.low %v12044_v17, %v12048_v62 }
 0x1c9   : > { %6791 = vmatmul.mubr.bf16.gmra.mrb[52].mxu1 %v8702_v61  ;;  %v1688_v61 = vld [vmem:[#allocation2 + $0x48] sm:$0xee] }
 0x1ca   : > { %6800 = vmatprep.mubr.bf16.mxu1 %v8705_v21  ;;  %v8724_v21 = vcombine.low %v1781_v37, %v1784_v40  ;;  %v3541_v37 = vshll.u32 %v12036_v52, 16  ;;  %v3545_v40 = vshrl.u32 %v12036_v52, 16  ;;  %v12134_v52 = vld [vmem:[#allocation2 + $0x80] sm:$0xff] }
 0x1cb   : > { %7563 = vmatmul.mubr.bf16.gmra.mrb[52].mxu0 %v8862_v26  ;;  %v8727_v26 = vcombine.high %v12044_v17, %v12048_v62  ;;  %v3551_v17 = vshll.u32 %v3464_v38, 16  ;;  %v10238_v62 = vld [vmem:[#allocation8 + $0x710] ss:$8 sps:$4 sm:$0xff]  }
 0x1cc   : > { %7572 = vmatprep.mubr.bf16.mxu0 %v8865_v48  ;;  %v8711_v48 = vrot.slane %v1688_v61, 9  ;;  %v3543_v45 = vrot.slane %v3541_v37, 5  ;;  %v1804_v61 = vrot.slane %v12069_v9, 5  ;;  %v3569_v9 = vshrl.u32 %v12040_v4, 16 }
 0x1cd   : > { %v3553_v46 = vrot.slane %v3551_v17, 5 }
 0x1ce   : > { %v12084_v58 = vsel %vm11589_vm5, %v8711_v48, %v1801_v10  ;;  %v1808_v48 = vrot.slane %v12040_v4, 5  ;;  %v3571_v38 = vrot.slane %v3569_v9, 4  ;;  %v1696_v9 = vld [vmem:[#allocation2 + $0x88] sm:$0x11] }
 0x1d1   : > { %6801 = vmatmul.mubr.bf16.gmra.mrb[56].mxu1 %v8704_v24  ;;  %v3517_v24 = vshll.u32 %v12024_v63, 16  ;;  %v12080_v63 = vsel %vm11589_vm5, %v1796_v60, %v1797_v36  ;;  %v10292_v60 = vld [vmem:[#allocation8 + $0x334] ss:$8 sps:$4 sm:$0xff]  }
 0x1d2   : > { %6810 = vmatprep.mubr.bf16.mxu1 %v8707_v15  ;;  %v10240_v15 = vld [vmem:[#allocation8 + $0x714] ss:$8 sps:$4 sm:$0xff]   ;;  %v8729_v36 = vcombine.high %v12076_v20, %v12080_v63 }
 0x1d3   : > { %7573 = vmatmul.mubr.bf16.gmra.mrb[56].mxu0 %v8864_v47  ;;  %v3519_v47 = vrot.slane %v3517_v24, 5  ;;  %v3559_v24 = vshll.u32 %v12038_v27, 16 }
 0x1d4   : > { %7582 = vmatprep.mubr.bf16.mxu0 %v8867_v19  ;;  %v3535_v19 = vshll.u32 %v12034_v43, 16  ;;  %v12132_v43 = vld [vmem:[#allocation2 + $0x78] sm:$0xff] }
 0x1d5   : > { %v3561_v37 = vrot.slane %v3559_v24, 5 }
 0x1d6   : > { %v3537_v29 = vrot.slane %v3535_v19, 5 }
 0x1d9   : > { %6811 = vmatmul.mubr.bf16.gmra.mrb[60].mxu1 %v8706_v42  ;;  %v3514_v42 = vor.u32 %v3513_v0, %v3510_v1  ;;  %v3556_v1 = vshrl.u32 %v12038_v27, 16  ;;  %v10250_v0 = vld [vmem:[#allocation8 + $0x734] ss:$8 sps:$4 sm:$0xff]  }
 0x1da   : > { %6853 = vmatprep.mubr.bf16.mxu1 %v8725_v57  ;;  %v3523_v57 = vrot.slane %v3521_v28, 4 }
 0x1db   : > { %7583 = vmatmul.mubr.bf16.gmra.mrb[60].mxu0 %v8866_v35  ;;  %v3547_v35 = vrot.slane %v3545_v40, 4  ;;  %v3558_v19 = vrot.slane %v3556_v1, 4 }
 0x1dc   : > { %7625 = vmatprep.mubr.bf16.mxu0 %v8869_v51  ;;  %v3515_v51 = vrot.slane %v3514_v42, 4  ;;  %v3524_v59 = vor.u32 %v3523_v57, %v3519_v47 }
 0x1dd   : > { %v3548_v13 = vor.u32 %v3547_v35, %v3543_v45  ;;  %v3562_v35 = vor.u32 %v3561_v37, %v3558_v19 }
 0x1de   : > { %v12091_v3 = vsel %vm11053_vm2, %v3515_v51, %v3519_v47  ;;  %v1691_v47 = vld [vmem:[#allocation2 + $0x60] sm:$0xee] }
 0x1e1   : > { %6854 = vmatmul.mubr.bf16.vlgmr.msra.gmra.mrb[0].mxu1 %v8724_v21  ;;  %v3538_v21 = vor.u32 %v3537_v29, %v3534_v23  ;;  %v3467_v23 = vld [vmem:[#allocation2 + $0x70] sm:$0x11] }
 0x1e2   : > { %6863 = vmatprep.mubr.bf16.mxu1 %v8727_v26  ;;  %7015 = vmatpush1.bf16.msra.mxu1 %v10272_v12  ;;  %v1803_v26 = vrot.slane %v1801_v10, 4  ;;  %v10283_v12 = vld [vmem:[#allocation8 + $0x320] ss:$8 sps:$4 sm:$0xff]   ;;  %v3575_v51 = vshll.u32 %v3467_v23, 16 }
 0x1e3   : > { %7016 = vmatprep.subr.bf16.mxu1 %v10281_v53  ;;  %7626 = vmatmul.mubr.bf16.vlgmr.msra.gmra.mrb[0].mxu0 %v8868_v39  ;;  %v10245_v39 = vld [vmem:[#allocation8 + $0x724] ss:$8 sps:$4 sm:$0xff]   ;;  %v3539_v11 = vrot.slane %v3538_v21, 4  ;;  %v10243_v10 = vld [vmem:[#allocation8 + $0x720] ss:$8 sps:$4 sm:$0xff]  }
 0x1e4   : > { %7787 = vmatpush1.bf16.msra.mxu0 %v10233_v7  ;;  %7635 = vmatprep.mubr.bf16.mxu0 %v8871_v8  ;;  %v3525_v8 = vrot.slane %v3524_v59, 4  ;;  %v3549_v7 = vrot.slane %v3548_v13, 4  ;;  %v1693_v29 = vld [vmem:[#allocation2 + $0x70] sm:$0x11]  ;;  %v8728_v59 = vcombine.low %v12076_v20, %v12080_v63  ;;  %v3577_v21 = vrot.slane %v3575_v51, 5 }
 0x1e5   : > { %7788 = vmatprep.subr.bf16.mxu0 %v10240_v15  ;;  %v3565_v15 = vshll.u32 %v12040_v4, 16  ;;  %v12107_v34 = vsel %vm11053_vm2, %v3539_v11, %v3543_v45  ;;  %v10296_v45 = vld [vmem:[#allocation8 + $0x344] ss:$8 sps:$4 sm:$0xff]   ;;  %v8712_v13 = vrot.slane %v1691_v47, 9  ;;  %v10294_v20 = vld [vmem:[#allocation8 + $0x340] ss:$8 sps:$4 sm:$0xff]  }
 0x1e6   : > { %7017 = vmatpush1.bf16.msra.mxu1 %v10279_v44  ;;  %v12096_v53 = vsel %vm11053_vm2, %v3525_v8, %v3529_v55  ;;  %v12116_v44 = vsel %vm11589_vm5, %v1803_v26, %v1804_v61  ;;  %v10248_v55 = vld [vmem:[#allocation8 + $0x730] ss:$8 sps:$4 sm:$0xff]   ;;  %v3563_v61 = vrot.slane %v3562_v35, 4  ;;  %v10303_v8 = vld [vmem:[#allocation8 + $0x354] ss:$8 sps:$4 sm:$0xff]   ;;  %v8875_v26 = vcombine.high %v12132_v43, %v12134_v52 }
 0x1e7   : > { %7018 = vmatprep.subr.bf16.mxu1 %v10285_v6  ;;  %v8900_v28 = vcombine.low %v12091_v3, %v12096_v53  ;;  %v8901_v32 = vcombine.high %v12091_v3, %v12096_v53  ;;  %v3567_v40 = vrot.slane %v3565_v15, 5  ;;  %v10290_v6 = vld [vmem:[#allocation8 + $0x330] ss:$8 sps:$4 sm:$0xff]   ;;  %v1809_v1 = vsel %vm11589_vm5, %v8712_v13, %v1808_v48  ;;  %v10307_v47 = vld [vmem:[#allocation8 + $0x364] ss:$8 sps:$4 sm:$0xff]  }
 0x1e8   : > { %7789 = vmatpush1.bf16.msra.mxu0 %v10238_v62  ;;  %v8731_v62 = vcombine.high %v12084_v58, %v12116_v44  ;;  %v1815_v15 = vrot.slane %v12134_v52, 5  ;;  %v8730_v19 = vcombine.low %v12084_v58, %v12116_v44  ;;  %v8874_v35 = vcombine.low %v12132_v43, %v12134_v52  ;;  %v10314_v51 = vld [vmem:[#allocation8 + $0x374] ss:$8 sps:$4 sm:$0xff]   ;;  %v10263_v58 = vld [vmem:[#allocation8 + $0x760] ss:$8 sps:$4 sm:$0xff]  }
 0x1e9   : > { %6864 = vmatmul.mubr.bf16.gmra.mrb[4].mxu1 %v8726_v14  ;;  %7790 = vmatprep.subr.bf16.mxu0 %v10245_v39  ;;  %v12112_v14 = vsel %vm11053_vm2, %v3549_v7, %v3553_v46  ;;  %v3572_v17 = vor.u32 %v3571_v38, %v3567_v40  ;;  %v8872_v39 = vcombine.low %v12038_v27, %v12040_v4  ;;  %v10260_v7 = vld [vmem:[#allocation8 + $0x754] ss:$8 sps:$4 sm:$0xff]   ;;  %v10258_v4 = vld [vmem:[#allocation8 + $0x750] ss:$8 sps:$4 sm:$0xff]   ;;  %v1697_v43 = vld [vmem:[#allocation2 + $0x90] sm:$0xee] }
 0x1ea   : > { %6873 = vmatprep.mubr.bf16.mxu1 %v8729_v36  ;;  %7019 = vmatpush1.bf16.msra.mxu1 %v10283_v12  ;;  %v8903_v42 = vcombine.high %v12107_v34, %v12112_v14  ;;  %v8902_v57 = vcombine.low %v12107_v34, %v12112_v14  ;;  %v1811_v36 = vrot.slane %v1693_v29, 5  ;;  %v12142_v46 = vsel %vm11053_vm2, %v3563_v61, %v3567_v40  ;;  %v10253_v12 = vld [vmem:[#allocation8 + $0x740] ss:$8 sps:$4 sm:$0xff]   ;;  %v10270_v44 = vld [vmem:[#allocation8 + $0x774] ss:$8 sps:$4 sm:$0xff]  }
 0x1eb   : > { %7636 = vmatmul.mubr.bf16.gmra.mrb[4].mxu0 %v8870_v22  ;;  %7020 = vmatprep.subr.bf16.mxu1 %v10292_v60  ;;  %v10255_v22 = vld [vmem:[#allocation8 + $0x744] ss:$8 sps:$4 sm:$0xff]   ;;  %v3573_v63 = vrot.slane %v3572_v17, 4  ;;  %v1817_v38 = vrot.slane %v1815_v15, 4  ;;  %v1818_v29 = vrot.slane %v1696_v9, 5 }
 0x1ec   : > { %7645 = vmatprep.mubr.bf16.mxu0 %v8873_v56  ;;  %7791 = vmatpush1.bf16.msra.mxu0 %v10243_v10  ;;  %v1810_v56 = vrot.slane %v1808_v48, 4  ;;  %v10301_v10 = vld [vmem:[#allocation8 + $0x350] ss:$8 sps:$4 sm:$0xff]   ;;  %v3243_v48 = vld [vmem:[#allocation2 + $0x90] sm:$0xff]  ;;  %v3244_v40 = vld [vmem:[#allocation2 + $0x98] sm:$0xff] }
 0x1ed   : > { %7792 = vmatprep.subr.bf16.mxu0 %v10250_v0  ;;  %v12148_v11 = vsel %vm11053_vm2, %v3573_v63, %v3577_v21  ;;  %v1694_v0 = vld [vmem:[#allocation2 + $0x78] sm:$0xee]  ;;  %v1819_v17 = vsel %vm11589_vm5, %v1817_v38, %v1818_v29  ;;  %v1699_v52 = vld [vmem:[#allocation2 + $0xa0] sm:$0x11]  ;;  %v3248_v29 = vld [vmem:[#allocation2 + $0xc8] sm:$0xff] }
 0x1ee   : > { %7021 = vmatpush1.bf16.msra.mxu1 %v10290_v6  ;;  %v8905_v27 = vcombine.high %v12142_v46, %v12148_v11  ;;  %v8904_v60 = vcombine.low %v12142_v46, %v12148_v11  ;;  %v1812_v24 = vsel %vm11589_vm5, %v1810_v56, %v1811_v36  ;;  %v10265_v6 = vld [vmem:[#allocation8 + $0x764] ss:$8 sps:$4 sm:$0xff]   ;;  %v8713_v23 = vrot.slane %v1694_v0, 9  ;;  %v10268_v13 = vld [vmem:[#allocation8 + $0x770] ss:$8 sps:$4 sm:$0xff]  }
 0x1ef   : > { %7022 = vmatprep.subr.bf16.mxu1 %v10296_v45  ;;  %v8733_v37 = vcombine.high %v1809_v1, %v1812_v24  ;;  %v10305_v45 = vld [vmem:[#allocation8 + $0x360] ss:$8 sps:$4 sm:$0xff]   ;;  %v10318_v61 = vld [vmem:[#allocation8 + $0x384] ss:$8 sps:$4 sm:$0xff]   ;;  %v8732_v21 = vcombine.low %v1809_v1, %v1812_v24  ;;  %v3245_v36 = vld [vmem:[#allocation2 + $0xa8] sm:$0xff]  ;;  %v8765_v46 = vcombine.high %v12232_v30, %v12234_v31 }
 0x1f0   : > { %7793 = vmatpush1.bf16.msra.mxu0 %v10248_v55  ;;  %v1816_v55 = vsel %vm11589_vm5, %v8713_v23, %v1815_v15  ;;  %v10278_v63 = vld [vmem:[#allocation8 + $0x784] ss:$8 sps:$4 sm:$0xff]   ;;  %v10325_v15 = vld [vmem:[#allocation8 + $0x394] ss:$8 sps:$4 sm:$0xff]   ;;  %v10276_v0 = vld [vmem:[#allocation8 + $0x780] ss:$8 sps:$4 sm:$0xff]  }
 0x1f1   : > { %6874 = vmatmul.mubr.bf16.gmra.mrb[8].mxu1 %v8728_v59  ;;  %7794 = vmatprep.subr.bf16.mxu0 %v10255_v22  ;;  %v8877_v59 = vcombine.high %v3243_v48, %v3244_v40  ;;  %v10312_v22 = vld [vmem:[#allocation8 + $0x370] ss:$8 sps:$4 sm:$0xff]   ;;  %v8735_v56 = vcombine.high %v1816_v55, %v1819_v17  ;;  %v10289_v1 = vld [vmem:[#allocation8 + $0x794] ss:$8 sps:$4 sm:$0xff]   ;;  %v10392_v11 = vld [vmem:[#allocation8 + $0x864] ss:$8 sps:$4 sm:$0xff]  }
 0x1f2   : > { %6883 = vmatprep.mubr.bf16.mxu1 %v8731_v62  ;;  %7023 = vmatpush1.bf16.msra.mxu1 %v10294_v20  ;;  %v1822_v62 = vrot.slane %v3244_v40, 5  ;;  %v3246_v20 = vld [vmem:[#allocation2 + $0xb0] sm:$0xff]  ;;  %v3247_v38 = vld [vmem:[#allocation2 + $0xc0] sm:$0xff] }
 0x1f3   : > { %7646 = vmatmul.mubr.bf16.gmra.mrb[8].mxu0 %v8872_v39  ;;  %7024 = vmatprep.subr.bf16.mxu1 %v10303_v8  ;;  %v8714_v39 = vrot.slane %v1697_v43, 9  ;;  %v10298_v43 = vld [vmem:[#allocation8 + $0x7a0] ss:$8 sps:$4 sm:$0xff]   ;;  %v3473_v53 = vld [vmem:[#allocation2 + $0xa0] sm:$0x11] }
 0x1f4   : > { %7655 = vmatprep.mubr.bf16.mxu0 %v8875_v26  ;;  %7795 = vmatpush1.bf16.msra.mxu0 %v10253_v12  ;;  %v1824_v8 = vrot.slane %v1822_v62, 4  ;;  %v1825_v26 = vrot.slane %v1699_v52, 5  ;;  %v10316_v12 = vld [vmem:[#allocation8 + $0x380] ss:$8 sps:$4 sm:$0xff]  }
 0x1f5   : > { %7796 = vmatprep.subr.bf16.mxu0 %v10260_v7  ;;  %v8876_v7 = vcombine.low %v3243_v48, %v3244_v40  ;;  %v1823_v24 = vsel %vm11589_vm5, %v8714_v39, %v1822_v62  ;;  %v10329_v48 = vld [vmem:[#allocation8 + $0x3a4] ss:$8 sps:$4 sm:$0xff]   ;;  %v8734_v40 = vcombine.low %v1816_v55, %v1819_v17  ;;  %v10336_v62 = vld [vmem:[#allocation8 + $0x3b4] ss:$8 sps:$4 sm:$0xff]  }
 0x1f6   : > { %7025 = vmatpush1.bf16.msra.mxu1 %v10301_v10  ;;  %v8879_v10 = vcombine.high %v3245_v36, %v3246_v20  ;;  %v1826_v9 = vsel %vm11589_vm5, %v1824_v8, %v1825_v26  ;;  %v10311_v55 = vld [vmem:[#allocation8 + $0x7b4] ss:$8 sps:$4 sm:$0xff]   ;;  %v3249_v8 = vld [vmem:[#allocation2 + $0xd8] sm:$0xff] }
 0x1f7   : > { %7026 = vmatprep.subr.bf16.mxu1 %v10307_v47  ;;  %v1829_v47 = vrot.slane %v3246_v20, 5  ;;  %v8737_v23 = vcombine.high %v1823_v24, %v1826_v9  ;;  %v3250_v26 = vld [vmem:[#allocation2 + $0xe0] sm:$0xff] }
 0x1f8   : > { %7797 = vmatpush1.bf16.msra.mxu0 %v10258_v4  ;;  %v1700_v4 = vld [vmem:[#allocation2 + $0xa8] sm:$0xee] }
 0x1f9   : > { %6884 = vmatmul.mubr.bf16.gmra.mrb[12].mxu1 %v8730_v19  ;;  %7798 = vmatprep.subr.bf16.mxu0 %v10265_v6  ;;  %v10323_v19 = vld [vmem:[#allocation8 + $0x390] ss:$8 sps:$4 sm:$0xff]  }
 0x1fa   : > { %6893 = vmatprep.mubr.bf16.mxu1 %v8733_v37  ;;  %7027 = vmatpush1.bf16.msra.mxu1 %v10305_v45  ;;  %v1702_v37 = vld [vmem:[#allocation2 + $0xb8] sm:$0x11]  ;;  %v10287_v6 = vld [vmem:[#allocation8 + $0x790] ss:$8 sps:$4 sm:$0xff]  }
 0x1fb   : > { %7656 = vmatmul.mubr.bf16.gmra.mrb[12].mxu0 %v8874_v35  ;;  %7028 = vmatprep.subr.bf16.mxu1 %v10314_v51  ;;  %v10300_v45 = vld [vmem:[#allocation8 + $0x7a4] ss:$8 sps:$4 sm:$0xff]   ;;  %v8715_v35 = vrot.slane %v1700_v4, 9  ;;  %v1831_v51 = vrot.slane %v1829_v47, 4  ;;  %v10320_v4 = vld [vmem:[#allocation8 + $0x7c0] ss:$8 sps:$4 sm:$0xff]  }
 0x1fc   : > { %7665 = vmatprep.mubr.bf16.mxu0 %v8877_v59  ;;  %7799 = vmatpush1.bf16.msra.mxu0 %v10263_v58  ;;  %v1832_v59 = vrot.slane %v1702_v37, 5  ;;  %v10327_v58 = vld [vmem:[#allocation8 + $0x3a0] ss:$8 sps:$4 sm:$0xff]  }
 0x1fd   : > { %7800 = vmatprep.subr.bf16.mxu0 %v10270_v44  ;;  %v8878_v44 = vcombine.low %v3245_v36, %v3246_v20  ;;  %v1830_v17 = vsel %vm11589_vm5, %v8715_v35, %v1829_v47  ;;  %v10340_v36 = vld [vmem:[#allocation8 + $0x3c4] ss:$8 sps:$4 sm:$0xff]   ;;  %v8736_v20 = vcombine.low %v1823_v24, %v1826_v9  ;;  %v10347_v47 = vld [vmem:[#allocation8 + $0x3d4] ss:$8 sps:$4 sm:$0xff]  }
 0x1fe   : > { %7029 = vmatpush1.bf16.msra.mxu1 %v10312_v22  ;;  %v8881_v22 = vcombine.high %v3247_v38, %v3248_v29  ;;  %v1833_v52 = vsel %vm11589_vm5, %v1831_v51, %v1832_v59  ;;  %v10333_v24 = vld [vmem:[#allocation8 + $0x7d4] ss:$8 sps:$4 sm:$0xff]   ;;  %v3252_v59 = vld [vmem:[#allocation2 + $0xf8] sm:$0xff] }
 0x1ff   : > { %7030 = vmatprep.subr.bf16.mxu1 %v10318_v61  ;;  %v1836_v61 = vrot.slane %v3248_v29, 5  ;;  %v8739_v39 = vcombine.high %v1830_v17, %v1833_v52  ;;  %v3251_v51 = vld [vmem:[#allocation2 + $0xf0] sm:$0xff] }
 0x200   : > { %7801 = vmatpush1.bf16.msra.mxu0 %v10268_v13  ;;  %v1703_v13 = vld [vmem:[#allocation2 + $0xc0] sm:$0xee] }
 0x201   : > { %6894 = vmatmul.mubr.bf16.gmra.mrb[16].mxu1 %v8732_v21  ;;  %7802 = vmatprep.subr.bf16.mxu0 %v10278_v63  ;;  %v10334_v21 = vld [vmem:[#allocation8 + $0x3b0] ss:$8 sps:$4 sm:$0xff]  }
 0x202   : > { %6903 = vmatprep.mubr.bf16.mxu1 %v8735_v56  ;;  %7031 = vmatpush1.bf16.msra.mxu1 %v10316_v12  ;;  %v1705_v56 = vld [vmem:[#allocation2 + $0xd0] sm:$0x11]  ;;  %v10309_v63 = vld [vmem:[#allocation8 + $0x7b0] ss:$8 sps:$4 sm:$0xff]   ;;  %v10322_v12 = vld [vmem:[#allocation8 + $0x7c4] ss:$8 sps:$4 sm:$0xff]  }
 0x203   : > { %7666 = vmatmul.mubr.bf16.gmra.mrb[16].mxu0 %v8876_v7  ;;  %7032 = vmatprep.subr.bf16.mxu1 %v10325_v15  ;;  %v8716_v7 = vrot.slane %v1703_v13, 9  ;;  %v1838_v15 = vrot.slane %v1836_v61, 4  ;;  %v10342_v13 = vld [vmem:[#allocation8 + $0x7e0] ss:$8 sps:$4 sm:$0xff]  }
 0x204   : > { %7675 = vmatprep.mubr.bf16.mxu0 %v8879_v10  ;;  %7803 = vmatpush1.bf16.msra.mxu0 %v10276_v0  ;;  %v1839_v10 = vrot.slane %v1705_v56, 5  ;;  %v10338_v0 = vld [vmem:[#allocation8 + $0x3c0] ss:$8 sps:$4 sm:$0xff]  }
 0x205   : > { %7804 = vmatprep.subr.bf16.mxu0 %v10289_v1  ;;  %v8880_v1 = vcombine.low %v3247_v38, %v3248_v29  ;;  %v1837_v9 = vsel %vm11589_vm5, %v8716_v7, %v1836_v61  ;;  %v10350_v38 = vld [vmem:[#allocation8 + $0x3e4] ss:$8 sps:$4 sm:$0xff]   ;;  %v8738_v29 = vcombine.low %v1830_v17, %v1833_v52  ;;  %v10356_v61 = vld [vmem:[#allocation8 + $0x3f4] ss:$8 sps:$4 sm:$0xff]  }
 0x206   : > { %7033 = vmatpush1.bf16.msra.mxu1 %v10323_v19  ;;  %v8883_v19 = vcombine.high %v3249_v8, %v3250_v26  ;;  %v1840_v37 = vsel %vm11589_vm5, %v1838_v15, %v1839_v10  ;;  %v10353_v17 = vld [vmem:[#allocation8 + $0x7f4] ss:$8 sps:$4 sm:$0xff]   ;;  %v10361_v10 = vld [vmem:[#allocation8 + $0x804] ss:$8 sps:$4 sm:$0xff]  }
 0x207   : > { %7034 = vmatprep.subr.bf16.mxu1 %v10329_v48  ;;  %v1843_v48 = vrot.slane %v3250_v26, 5  ;;  %v8741_v35 = vcombine.high %v1837_v9, %v1840_v37  ;;  %v3253_v7 = vld [vmem:[#allocation2 + $0x108] sm:$0xff]  ;;  %v3254_v15 = vld [vmem:[#allocation2 + $0x110] sm:$0xff] }
 0x208   : > { %7805 = vmatpush1.bf16.msra.mxu0 %v10287_v6  ;;  %v1706_v6 = vld [vmem:[#allocation2 + $0xd8] sm:$0xee] }
 0x209   : > { %6904 = vmatmul.mubr.bf16.gmra.mrb[20].mxu1 %v8734_v40  ;;  %7806 = vmatprep.subr.bf16.mxu0 %v10300_v45  ;;  %v10345_v40 = vld [vmem:[#allocation8 + $0x3d0] ss:$8 sps:$4 sm:$0xff]  }
 0x20a   : > { %6913 = vmatprep.mubr.bf16.mxu1 %v8737_v23  ;;  %7035 = vmatpush1.bf16.msra.mxu1 %v10327_v58  ;;  %v1708_v23 = vld [vmem:[#allocation2 + $0xe8] sm:$0x11]  ;;  %v10344_v58 = vld [vmem:[#allocation8 + $0x7e4] ss:$8 sps:$4 sm:$0xff]  }
 0x20b   : > { %7676 = vmatmul.mubr.bf16.gmra.mrb[20].mxu0 %v8878_v44  ;;  %7036 = vmatprep.subr.bf16.mxu1 %v10336_v62  ;;  %v10331_v45 = vld [vmem:[#allocation8 + $0x7d0] ss:$8 sps:$4 sm:$0xff]   ;;  %v8717_v44 = vrot.slane %v1706_v6, 9  ;;  %v1845_v62 = vrot.slane %v1843_v48, 4 }
 0x20c   : > { %7685 = vmatprep.mubr.bf16.mxu0 %v8881_v22  ;;  %7807 = vmatpush1.bf16.msra.mxu0 %v10298_v43  ;;  %v1846_v22 = vrot.slane %v1708_v23, 5  ;;  %v10348_v43 = vld [vmem:[#allocation8 + $0x3e0] ss:$8 sps:$4 sm:$0xff]  }
 0x20d   : > { %7808 = vmatprep.subr.bf16.mxu0 %v10311_v55  ;;  %v8882_v55 = vcombine.low %v3249_v8, %v3250_v26  ;;  %v1844_v52 = vsel %vm11589_vm5, %v8717_v44, %v1843_v48  ;;  %v8740_v8 = vcombine.low %v1837_v9, %v1840_v37  ;;  %v10351_v26 = vld [vmem:[#allocation8 + $0x7f0] ss:$8 sps:$4 sm:$0xff]   ;;  %v1857_v37 = vrot.slane %v3254_v15, 5 }
 0x20e   : > { %7037 = vmatpush1.bf16.msra.mxu1 %v10334_v21  ;;  %v8885_v21 = vcombine.high %v3251_v51, %v3252_v59  ;;  %v1847_v56 = vsel %vm11589_vm5, %v1845_v62, %v1846_v22  ;;  %v1712_v48 = vld [vmem:[#allocation2 + $0x108] sm:$0xee] }
 0x20f   : > { %7038 = vmatprep.subr.bf16.mxu1 %v10340_v36  ;;  %v1850_v36 = vrot.slane %v3252_v59, 5  ;;  %v8742_v6 = vcombine.low %v1844_v52, %v1847_v56 }
 0x210   : > { %7809 = vmatpush1.bf16.msra.mxu0 %v10309_v63  ;;  %v1709_v63 = vld [vmem:[#allocation2 + $0xf0] sm:$0xee] }
 0x211   : > { %6914 = vmatmul.mubr.bf16.gmra.mrb[24].mxu1 %v8736_v20  ;;  %7810 = vmatprep.subr.bf16.mxu0 %v10322_v12  ;;  %v10354_v20 = vld [vmem:[#allocation8 + $0x3f0] ss:$8 sps:$4 sm:$0xff]   ;;  %v8743_v12 = vcombine.high %v1844_v52, %v1847_v56 }
 0x212   : > { %6923 = vmatprep.mubr.bf16.mxu1 %v8739_v39  ;;  %7039 = vmatpush1.bf16.msra.mxu1 %v10338_v0  ;;  %v1711_v39 = vld [vmem:[#allocation2 + $0x100] sm:$0x11]  ;;  %v8718_v0 = vrot.slane %v1709_v63, 9 }
 0x213   : > { %7686 = vmatmul.mubr.bf16.gmra.mrb[24].mxu0 %v8880_v1  ;;  %7040 = vmatprep.subr.bf16.mxu1 %v10347_v47  ;;  %v1852_v1 = vrot.slane %v1850_v36, 4  ;;  %v1853_v47 = vrot.slane %v1711_v39, 5 }
 0x214   : > { %7695 = vmatprep.mubr.bf16.mxu0 %v8883_v19  ;;  %7811 = vmatpush1.bf16.msra.mxu0 %v10320_v4  ;;  %v8884_v19 = vcombine.low %v3251_v51, %v3252_v59  ;;  %v8887_v4 = vcombine.high %v3253_v7, %v3254_v15  ;;  %v8886_v51 = vcombine.low %v3253_v7, %v3254_v15  ;;  %v10441_v59 = vld [vmem:[#allocation2 + $0x120] sm:$0xff]  ;;  %v1720_v7 = vld [vmem:[#allocation2 + $0x148] sm:$0x11] }
 0x215   : > { %7812 = vmatprep.subr.bf16.mxu0 %v10333_v24  ;;  %v1851_v24 = vsel %vm11589_vm5, %v8718_v0, %v1850_v36  ;;  %v1854_v9 = vsel %vm11589_vm5, %v1852_v1, %v1853_v47  ;;  %v1874_v47 = vrot.slane %v1720_v7, 5  ;;  %v3593_v7 = vshrl.u32 %v12234_v31, 16 }
 0x216   : > { %7041 = vmatpush1.bf16.msra.mxu1 %v10345_v40  ;;  %v1714_v40 = vld [vmem:[#allocation2 + $0x118] sm:$0x11]  ;;  %v8745_v23 = vcombine.high %v1851_v24, %v1854_v9 }
 0x217   : > { %7042 = vmatprep.subr.bf16.mxu1 %v10350_v38  ;;  %v3256_v38 = vld [vmem:[#allocation2 + $0x128] sm:$0xff] }
 0x218   : > { %7813 = vmatpush1.bf16.msra.mxu0 %v10331_v45  ;;  %v1859_v45 = vrot.slane %v1857_v37, 4  ;;  %v1864_v22 = vrot.slane %v3256_v38, 5  ;;  %v8888_v36 = vcombine.low %v10441_v59, %v3256_v38 }
 0x219   : > { %6924 = vmatmul.mubr.bf16.gmra.mrb[28].mxu1 %v8738_v29  ;;  %7814 = vmatprep.subr.bf16.mxu0 %v10344_v58  ;;  %v8719_v29 = vrot.slane %v1712_v48, 9  ;;  %v8889_v58 = vcombine.high %v10441_v59, %v3256_v38  ;;  %v1721_v48 = vld [vmem:[#allocation2 + $0x150] sm:$0xee] }
 0x21a   : > { %6933 = vmatprep.mubr.bf16.mxu1 %v8741_v35  ;;  %7043 = vmatpush1.bf16.msra.mxu1 %v10348_v43  ;;  %v1860_v35 = vrot.slane %v1714_v40, 5  ;;  %v1715_v43 = vld [vmem:[#allocation2 + $0x120] sm:$0xee]  ;;  %v1866_v52 = vrot.slane %v1864_v22, 4  ;;  %v1723_v40 = vld [vmem:[#allocation2 + $0x160] sm:$0x11] }
 0x21b   : > { %7696 = vmatmul.mubr.bf16.gmra.mrb[28].mxu0 %v8882_v55  ;;  %7044 = vmatprep.subr.bf16.mxu1 %v10356_v61  ;;  %v1858_v44 = vsel %vm11589_vm5, %v8719_v29, %v1857_v37  ;;  %v1717_v55 = vld [vmem:[#allocation2 + $0x130] sm:$0x11]  ;;  %v8744_v61 = vcombine.low %v1851_v24, %v1854_v9  ;;  %v8722_v38 = vrot.slane %v1721_v48, 9 }
 0x21c   : > { %7705 = vmatprep.mubr.bf16.mxu0 %v8885_v21  ;;  %7815 = vmatpush1.bf16.msra.mxu0 %v10342_v13  ;;  %v1861_v62 = vsel %vm11589_vm5, %v1859_v45, %v1860_v35  ;;  %v3258_v13 = vld [vmem:[#allocation2 + $0x140] sm:$0xff]  ;;  %v1867_v56 = vrot.slane %v1717_v55, 5  ;;  %v1881_v45 = vrot.slane %v1723_v40, 5  ;;  %v12207_v35 = vld [vmem:[#allocation2 + $0x170] sm:$0xff] }
 0x21d   : > { %7816 = vmatprep.subr.bf16.mxu0 %v10353_v17  ;;  %v8747_v21 = vcombine.high %v1858_v44, %v1861_v62  ;;  %v8720_v17 = vrot.slane %v1715_v43, 9  ;;  %v8746_v15 = vcombine.low %v1858_v44, %v1861_v62  ;;  %v1726_v44 = vld [vmem:[#allocation2 + $0x178] sm:$0x11]  ;;  %v3263_v43 = vld [vmem:[#allocation2 + $0x180] sm:$0xff] }
 0x21e   : > { %7045 = vmatpush1.bf16.msra.mxu1 %v10354_v20  ;;  %v10442_v20 = vld [vmem:[#allocation2 + $0x138] sm:$0xff] }
 0x21f   : > { %v8891_v63 = vcombine.high %v10442_v20, %v3258_v13  ;;  %v1865_v39 = vsel %vm11589_vm5, %v8720_v17, %v1864_v22 }
 0x220   : > { %7817 = vmatpush1.bf16.msra.mxu0 %v10351_v26  ;;  %v1871_v26 = vrot.slane %v3258_v13, 5 }
 0x221   : > { %6934 = vmatmul.mubr.bf16.gmra.mrb[32].mxu1 %v8740_v8  ;;  %7979 = vmatprep.subr.bf16.mxu0 %v10361_v10  ;;  %v1868_v8 = vsel %vm11589_vm5, %v1866_v52, %v1867_v56  ;;  %v8899_v56 = vcombine.high %v12006_v25, %v12006_v25 }
 0x222   : > { %6943 = vmatprep.mubr.bf16.mxu1 %v8743_v12  ;;  %v1718_v12 = vld [vmem:[#allocation2 + $0x138] sm:$0xee]  ;;  %v8749_v10 = vcombine.high %v1865_v39, %v1868_v8  ;;  %v1873_v1 = vrot.slane %v1871_v26, 4 }
 0x223   : > { %7706 = vmatmul.mubr.bf16.gmra.mrb[32].mxu0 %v8884_v19  ;;  %v8721_v0 = vrot.slane %v1718_v12, 9  ;;  %v8890_v19 = vcombine.low %v10442_v20, %v3258_v13  ;;  %v10443_v13 = vld [vmem:[#allocation2 + $0x188] sm:$0xff]  ;;  %v3583_v12 = vshll.u32 %v12232_v30, 16 }
 0x224   : > { %7715 = vmatprep.mubr.bf16.mxu0 %v8887_v4  ;;  %v12197_v4 = vld [vmem:[#allocation2 + $0x158] sm:$0xff]  ;;  %v1875_v9 = vsel %vm11589_vm5, %v1873_v1, %v1874_v47  ;;  %v8897_v17 = vcombine.high %v3263_v43, %v10443_v13  ;;  %v8896_v52 = vcombine.low %v3263_v43, %v10443_v13  ;;  %v12248_v1 = vld [vmem:[#allocation2 + $0x48] sm:$0xff] }
 0x225   : > { %v1872_v24 = vsel %vm11589_vm5, %v8721_v0, %v1871_v26  ;;  %v1878_v37 = vrot.slane %v12197_v4, 5  ;;  %v3580_v26 = vshrl.u32 %v12232_v30, 16  ;;  %v10359_v0 = vld [vmem:[#allocation8 + $0x800] ss:$8 sps:$4 sm:$0xff]   ;;  %v12264_v43 = vld [vmem:[#allocation2 + $0xa8] sm:$0xff] }
 0x226   : > { %v8750_v62 = vcombine.low %v1872_v24, %v1875_v9  ;;  %v10377_v13 = vld [vmem:[#allocation8 + $0x834] ss:$8 sps:$4 sm:$0xff]  }
 0x227   : > { %v1880_v29 = vrot.slane %v1878_v37, 4  ;;  %v3582_v47 = vrot.slane %v3580_v26, 4 }
 0x229   : > { %6944 = vmatmul.mubr.bf16.gmra.mrb[36].mxu1 %v8742_v6  ;;  %v8748_v6 = vcombine.low %v1865_v39, %v1868_v8  ;;  %v1882_v59 = vsel %vm11589_vm5, %v1880_v29, %v1881_v45  ;;  %v8898_v39 = vcombine.low %v12006_v25, %v12006_v25  ;;  %v10362_v8 = vld [vmem:[#allocation2 + $0x34] ss:$8 sps:$4 sm:$0xff]   ;;  %v3589_v25 = vshll.u32 %v12234_v31, 16  ;;  %v10365_v29 = vld [vmem:[#allocation8 + $0x810] ss:$8 sps:$4 sm:$0xff]  }
 0x22a   : > { %6953 = vmatprep.mubr.bf16.mxu1 %v8745_v23  ;;  %v8751_v23 = vcombine.high %v1872_v24, %v1875_v9  ;;  %v3595_v9 = vrot.slane %v3593_v7, 4 }
 0x22b   : > { %7716 = vmatmul.mubr.bf16.gmra.mrb[36].mxu0 %v8886_v51  ;;  %v1879_v51 = vsel %vm11589_vm5, %v8722_v38, %v1878_v37  ;;  %v3591_v24 = vrot.slane %v3589_v25, 5  ;;  %v3470_v37 = vld [vmem:[#allocation2 + $0x88] sm:$0x11]  ;;  %v10364_v38 = vld [vmem:[#allocation2 + $0x30] ss:$8 sps:$4 sm:$0xff]  }
 0x22c   : > { %7725 = vmatprep.mubr.bf16.mxu0 %v8889_v58  ;;  %v1885_v58 = vrot.slane %v12207_v35, 5  ;;  %v8753_v22 = vcombine.high %v1879_v51, %v1882_v59 }
 0x231   : > { %6954 = vmatmul.mubr.bf16.gmra.mrb[40].mxu1 %v8744_v61  ;;  %v1887_v61 = vrot.slane %v1885_v58, 4 }
 0x232   : > { %6963 = vmatprep.mubr.bf16.mxu1 %v8747_v21  ;;  %v1888_v21 = vrot.slane %v1726_v44, 5 }
 0x233   : > { %7726 = vmatmul.mubr.bf16.gmra.mrb[40].mxu0 %v8888_v36  ;;  %v2050_v36 = vld [vmem:[#allocation2 + $0x18] sm:$0xff] }
 0x234   : > { %7735 = vmatprep.mubr.bf16.mxu0 %v8891_v63  ;;  %v1889_v2 = vsel %vm11589_vm5, %v1887_v61, %v1888_v21  ;;  %v8757_v63 = vcombine.high %v2050_v36, %v12013_v5 }
 0x239   : > { %6964 = vmatmul.mubr.bf16.gmra.mrb[44].mxu1 %v8746_v15  ;;  %v12244_v15 = vld [vmem:[#allocation2 + $0x90] sm:$0xff] }
 0x23a   : > { %6973 = vmatprep.mubr.bf16.mxu1 %v8749_v10  ;;  %v12246_v10 = vld [vmem:[#allocation2 + $0x98] sm:$0xff]  ;;  %v3604_v48 = vshrl.u32 %v12244_v15, 16  ;;  %v3607_v40 = vshll.u32 %v12244_v15, 16 }
 0x23b   : > { %7736 = vmatmul.mubr.bf16.gmra.mrb[44].mxu0 %v8890_v19  ;;  %v3585_v19 = vrot.slane %v3583_v12, 5 }
 0x23c   : > { %7745 = vmatprep.mubr.bf16.mxu0 %v8893_v16  ;;  %v1724_v16 = vld [vmem:[#allocation2 + $0x168] sm:$0xee]  ;;  %v3606_v44 = vrot.slane %v3604_v48, 4 }
 0x23d   : > { %v8723_v55 = vrot.slane %v1724_v16, 9  ;;  %v3599_v16 = vshll.u32 %v3470_v37, 16 }
 0x23f   : > { %v1886_v49 = vsel %vm11589_vm5, %v8723_v55, %v1885_v58  ;;  %v3596_v58 = vor.u32 %v3595_v9, %v3591_v24  ;;  %v3601_v21 = vrot.slane %v3599_v16, 5  ;;  %v12289_v9 = vld [vmem:[#allocation2 + $0xc8] sm:$0xff] }
 0x240   : > { %v8754_v20 = vcombine.low %v1886_v49, %v1889_v2 }
 0x241   : > { %6974 = vmatmul.mubr.bf16.gmra.mrb[48].mxu1 %v8748_v6  ;;  %v3613_v6 = vshll.u32 %v12246_v10, 16  ;;  %v3597_v61 = vrot.slane %v3596_v58, 4  ;;  %v3665_v58 = vshrl.u32 %v12289_v9, 16 }
 0x242   : > { %6983 = vmatprep.mubr.bf16.mxu1 %v8751_v23  ;;  %v3617_v23 = vshrl.u32 %v12246_v10, 16 }
 0x243   : > { %7746 = vmatmul.mubr.bf16.gmra.mrb[48].mxu0 %v8892_v41  ;;  %v8752_v41 = vcombine.low %v1879_v51, %v1882_v59  ;;  %v10372_v51 = vld [vmem:[#allocation8 + $0x824] ss:$8 sps:$4 sm:$0xff]   ;;  %v3586_v59 = vor.u32 %v3585_v19, %v3582_v47  ;;  %v10387_v19 = vld [vmem:[#allocation8 + $0x854] ss:$8 sps:$4 sm:$0xff]  }
 0x244   : > { %7755 = vmatprep.mubr.bf16.mxu0 %v8895_v50  ;;  %v8755_v50 = vcombine.high %v1886_v49, %v1889_v2  ;;  %v3619_v3 = vrot.slane %v3617_v23, 4  ;;  %v12268_v49 = vld [vmem:[#allocation2 + $0x68] sm:$0xff]  ;;  %v3476_v47 = vld [vmem:[#allocation2 + $0xb8] sm:$0x11] }
 0x245   : > { %v3587_v55 = vrot.slane %v3586_v59, 4  ;;  %v3661_v59 = vshll.u32 %v12289_v9, 16 }
 0x247   : > { %v3592_v14 = vsel %vm11053_vm2, %v3587_v55, %v3591_v24  ;;  %v12287_v24 = vld [vmem:[#allocation2 + $0xc0] sm:$0xff]  ;;  %v3667_v55 = vrot.slane %v3665_v58, 4 }
 0x248   : > { %v10405_v58 = vld [vmem:[#allocation8 + $0x890] ss:$8 sps:$4 sm:$0xff]  }
 0x249   : > { %6984 = vmatmul.mubr.bf16.gmra.mrb[52].mxu1 %v8750_v62  ;;  %v3609_v62 = vrot.slane %v3607_v40, 5 }
 0x24a   : > { %6993 = vmatprep.mubr.bf16.mxu1 %v8753_v22  ;;  %v3615_v22 = vrot.slane %v3613_v6, 5 }
 0x24b   : > { %7756 = vmatmul.mubr.bf16.gmra.mrb[52].mxu0 %v8894_v33  ;;  %v8756_v33 = vcombine.low %v2050_v36, %v12013_v5  ;;  %v10367_v5 = vld [vmem:[#allocation8 + $0x814] ss:$8 sps:$4 sm:$0xff]   ;;  %v3610_v2 = vor.u32 %v3609_v62, %v3606_v44 }
 0x24c   : > { %7765 = vmatprep.mubr.bf16.mxu0 %v8897_v17  ;;  %v2056_v17 = vld [vmem:[#allocation2 + $0x60] sm:$0xff] }
 0x24d   : > { %v8763_v34 = vcombine.high %v2056_v17, %v12268_v49  ;;  %v8762_v37 = vcombine.low %v2056_v17, %v12268_v49  ;;  %v12311_v17 = vld [vmem:[#allocation2 + $0xd8] sm:$0xff] }
 0x251   : > { %6994 = vmatmul.mubr.bf16.gmra.mrb[56].mxu1 %v8752_v41  ;;  %v3620_v41 = vor.u32 %v3619_v3, %v3615_v22 }
 0x252   : > { %7003 = vmatprep.mubr.bf16.mxu1 %v8755_v50  ;;  %v3623_v50 = vshll.u32 %v3473_v53, 16 }
 0x253   : > { %7766 = vmatmul.mubr.bf16.gmra.mrb[56].mxu0 %v8896_v52  ;;  %v3628_v52 = vshrl.u32 %v12264_v43, 16  ;;  %v3621_v26 = vrot.slane %v3620_v41, 4  ;;  %v8764_v41 = vcombine.low %v12232_v30, %v12234_v31  ;;  %v3679_v30 = vshll.u32 %v12311_v17, 16 }
 0x254   : > { %7775 = vmatprep.mubr.bf16.mxu0 %v8899_v56  ;;  %v3631_v56 = vshll.u32 %v12264_v43, 16  ;;  %v3625_v12 = vrot.slane %v3623_v50, 5  ;;  %v8767_v50 = vcombine.high %v12244_v15, %v12246_v10 }
 0x255   : > { %v3630_v25 = vrot.slane %v3628_v52, 4 }
 0x256   : > { %v12301_v40 = vsel %vm11053_vm2, %v3621_v26, %v3625_v12  ;;  %v12333_v26 = vld [vmem:[#allocation2 + $0xf0] sm:$0xff]  ;;  %v12335_v12 = vld [vmem:[#allocation2 + $0xf8] sm:$0xff] }
 0x259   : > { %7004 = vmatmul.mubr.bf16.gmra.mrb[60].mxu1 %v8754_v20 }
 0x25a   : > { %7046 = vmatprep.mubr.bf16.mxu1 %v8757_v63 }
 0x25b   : > { %7776 = vmatmul.mubr.bf16.gmra.mrb[60].mxu0 %v8898_v39  ;;  %v10375_v39 = vld [vmem:[#allocation8 + $0x830] ss:$8 sps:$4 sm:$0xff]  }
 0x25c   : > { %7818 = vmatprep.mubr.bf16.mxu0 %v8901_v32  ;;  %v12250_v32 = vld [vmem:[#allocation2 + $0x50] sm:$0xff] }
 0x25d   : > { %v8761_v45 = vcombine.high %v12248_v1, %v12250_v32  ;;  %v8760_v63 = vcombine.low %v12248_v1, %v12250_v32  ;;  %v10380_v1 = vld [vmem:[#allocation8 + $0x840] ss:$8 sps:$4 sm:$0xff]  }
 0x261   : > { %7047 = vmatmul.mubr.bf16.vlgmr.msra.gmra.mrb[0].mxu1 %v8756_v33  ;;  %v10382_v33 = vld [vmem:[#allocation8 + $0x844] ss:$8 sps:$4 sm:$0xff]  }
 0x262   : > { %7056 = vmatprep.mubr.bf16.mxu1 %v10362_v8  ;;  %v3611_v8 = vrot.slane %v3610_v2, 4  ;;  %v12313_v2 = vld [vmem:[#allocation2 + $0xe0] sm:$0xff] }
 0x263   : > { %7819 = vmatmul.mubr.bf16.vlgmr.msra.gmra.mrb[0].mxu0 %v8900_v28  ;;  %v10370_v28 = vld [vmem:[#allocation8 + $0x820] ss:$8 sps:$4 sm:$0xff]  }
 0x264   : > { %7980 = vmatpush1.bf16.msra.mxu0 %v10359_v0  ;;  %7828 = vmatprep.mubr.bf16.mxu0 %v8903_v42  ;;  %v12266_v42 = vld [vmem:[#allocation2 + $0xb0] sm:$0xff]  ;;  %v12294_v48 = vsel %vm11053_vm2, %v3611_v8, %v3615_v22 }
 0x265   : > { %7981 = vmatprep.subr.bf16.mxu0 %v10367_v5  ;;  %v3637_v36 = vshll.u32 %v12266_v42, 16  ;;  %v3641_v20 = vshrl.u32 %v12266_v42, 16  ;;  %v8909_v16 = vcombine.high %v12294_v48, %v12301_v40  ;;  %v8908_v8 = vcombine.low %v12294_v48, %v12301_v40  ;;  %v10407_v48 = vld [vmem:[#allocation8 + $0x894] ss:$8 sps:$4 sm:$0xff]  }
 0x266   : > { %v3482_v40 = vld [vmem:[#allocation2 + $0xe8] sm:$0x11] }
 0x267   : > { %v3639_v7 = vrot.slane %v3637_v36, 5  ;;  %v3643_v0 = vrot.slane %v3641_v20, 4 }
 0x268   : > { %7982 = vmatpush1.bf16.msra.mxu0 %v10365_v29  ;;  %v10385_v29 = vld [vmem:[#allocation8 + $0x850] ss:$8 sps:$4 sm:$0xff]  }
 0x269   : > { %7057 = vmatmul.mubr.bf16.gmra.mrb[4].mxu1 %v10364_v38  ;;  %7983 = vmatprep.subr.bf16.mxu0 %v10372_v51  ;;  %v3644_v23 = vor.u32 %v3643_v0, %v3639_v7  ;;  %v3647_v38 = vshll.u32 %v3476_v47, 16  ;;  %v3655_v51 = vshll.u32 %v12287_v24, 16  ;;  %v3681_v47 = vrot.slane %v3679_v30, 5 }
 0x26a   : > { %7066 = vmatprep.mubr.bf16.mxu1 %v8761_v45  ;;  %v3652_v45 = vshrl.u32 %v12287_v24, 16 }
 0x26b   : > { %7829 = vmatmul.mubr.bf16.gmra.mrb[4].mxu0 %v8902_v57  ;;  %v3602_v57 = vsel %vm11053_vm2, %v3597_v61, %v3601_v21  ;;  %v3645_v62 = vrot.slane %v3644_v23, 4  ;;  %v3649_v22 = vrot.slane %v3647_v38, 5  ;;  %v3657_v53 = vrot.slane %v3655_v51, 5  ;;  %v10390_v61 = vld [vmem:[#allocation8 + $0x860] ss:$8 sps:$4 sm:$0xff]  }
 0x26c   : > { %7838 = vmatprep.mubr.bf16.mxu0 %v8905_v27  ;;  %7984 = vmatpush1.bf16.msra.mxu0 %v10370_v28  ;;  %v3633_v27 = vrot.slane %v3631_v56, 5  ;;  %v8907_v5 = vcombine.high %v3592_v14, %v3602_v57  ;;  %v3654_v3 = vrot.slane %v3652_v45, 4  ;;  %v3663_v28 = vrot.slane %v3661_v59, 5  ;;  %v3479_v21 = vld [vmem:[#allocation2 + $0xd0] sm:$0x11] }
 0x26d   : > { %7985 = vmatprep.subr.bf16.mxu0 %v10377_v13  ;;  %v10397_v13 = vld [vmem:[#allocation8 + $0x874] ss:$8 sps:$4 sm:$0xff]   ;;  %v12325_v56 = vsel %vm11053_vm2, %v3645_v62, %v3649_v22  ;;  %v3703_v23 = vshll.u32 %v12333_v26, 16  ;;  %v3709_v38 = vshll.u32 %v12335_v12, 16  ;;  %v8766_v45 = vcombine.low %v12244_v15, %v12246_v10 }
 0x26e   : > { %v3634_v6 = vor.u32 %v3633_v27, %v3630_v25  ;;  %v3658_v36 = vor.u32 %v3657_v53, %v3654_v3  ;;  %v3668_v20 = vor.u32 %v3667_v55, %v3663_v28  ;;  %v8769_v51 = vcombine.high %v12264_v43, %v12266_v42  ;;  %v3485_v55 = vld [vmem:[#allocation2 + $0x100] sm:$0x11] }
 0x26f   : > { %v3705_v22 = vrot.slane %v3703_v23, 5  ;;  %v3711_v15 = vrot.slane %v3709_v38, 5  ;;  %v3488_v23 = vld [vmem:[#allocation2 + $0x118] sm:$0x11] }
 0x270   : > { %7986 = vmatpush1.bf16.msra.mxu0 %v10375_v39  ;;  %v3635_v44 = vrot.slane %v3634_v6, 4  ;;  %v10395_v39 = vld [vmem:[#allocation8 + $0x870] ss:$8 sps:$4 sm:$0xff]   ;;  %v3659_v27 = vrot.slane %v3658_v36, 4  ;;  %v3700_v6 = vshrl.u32 %v12333_v26, 16 }
 0x271   : > { %7067 = vmatmul.mubr.bf16.gmra.mrb[8].mxu1 %v8760_v63  ;;  %7987 = vmatprep.subr.bf16.mxu0 %v10382_v33  ;;  %v3671_v63 = vshll.u32 %v3479_v21, 16  ;;  %v10402_v33 = vld [vmem:[#allocation8 + $0x884] ss:$8 sps:$4 sm:$0xff]   ;;  %v10420_v38 = vld [vmem:[#allocation8 + $0x8c0] ss:$8 sps:$4 sm:$0xff]  }
 0x272   : > { %7076 = vmatprep.mubr.bf16.mxu1 %v8763_v34  ;;  %v12321_v52 = vsel %vm11053_vm2, %v3635_v44, %v3639_v7  ;;  %v3676_v34 = vshrl.u32 %v12311_v17, 16  ;;  %v3669_v7 = vrot.slane %v3668_v20, 4  ;;  %v12349_v59 = vsel %vm11053_vm2, %v3659_v27, %v3663_v28  ;;  %v10412_v44 = vld [vmem:[#allocation8 + $0x8a4] ss:$8 sps:$4 sm:$0xff]   ;;  %v10417_v20 = vld [vmem:[#allocation8 + $0x8b4] ss:$8 sps:$4 sm:$0xff]  }
 0x273   : > { %7839 = vmatmul.mubr.bf16.gmra.mrb[8].mxu0 %v8904_v60  ;;  %v8906_v60 = vcombine.low %v3592_v14, %v3602_v57  ;;  %v3685_v14 = vshll.u32 %v12313_v2, 16  ;;  %v3689_v57 = vshrl.u32 %v12313_v2, 16  ;;  %v8911_v25 = vcombine.high %v12321_v52, %v12325_v56  ;;  %v12358_v21 = vld [vmem:[#allocation2 + $0x110] sm:$0xff] }
 0x274   : > { %7848 = vmatprep.mubr.bf16.mxu0 %v8907_v5  ;;  %7988 = vmatpush1.bf16.msra.mxu0 %v10380_v1  ;;  %v3673_v0 = vrot.slane %v3671_v63, 5  ;;  %v10400_v5 = vld [vmem:[#allocation8 + $0x880] ss:$8 sps:$4 sm:$0xff]   ;;  %v3678_v1 = vrot.slane %v3676_v34, 4  ;;  %v3702_v62 = vrot.slane %v3700_v6, 4  ;;  %v8910_v53 = vcombine.low %v12321_v52, %v12325_v56 }
 0x275   : > { %7989 = vmatprep.subr.bf16.mxu0 %v10387_v19  ;;  %v3687_v19 = vrot.slane %v3685_v14, 5  ;;  %v3719_v34 = vshll.u32 %v3485_v55, 16  ;;  %v3733_v30 = vshll.u32 %v12358_v21, 16  ;;  %v3737_v14 = vshrl.u32 %v12358_v21, 16 }
 0x276   : > { %v3706_v63 = vor.u32 %v3705_v22, %v3702_v62  ;;  %v10425_v22 = vld [vmem:[#allocation8 + $0x8d0] ss:$8 sps:$4 sm:$0xff]  }
 0x278   : > { %7990 = vmatpush1.bf16.msra.mxu0 %v10385_v29  ;;  %v3713_v29 = vshrl.u32 %v12335_v12, 16 }
 0x279   : > { %7077 = vmatmul.mubr.bf16.gmra.mrb[12].mxu1 %v8762_v37  ;;  %7991 = vmatprep.subr.bf16.mxu0 %v10392_v11  ;;  %v3691_v37 = vrot.slane %v3689_v57, 4  ;;  %v3682_v11 = vor.u32 %v3681_v47, %v3678_v1  ;;  %v8768_v57 = vcombine.low %v12264_v43, %v12266_v42  ;;  %v3721_v47 = vrot.slane %v3719_v34, 5  ;;  %v3491_v34 = vld [vmem:[#allocation2 + $0x130] sm:$0x11] }
 0x27a   : > { %7086 = vmatprep.mubr.bf16.mxu1 %v8765_v46  ;;  %v3674_v46 = vsel %vm11053_vm2, %v3669_v7, %v3673_v0  ;;  %v3715_v3 = vrot.slane %v3713_v29, 4  ;;  %v10422_v7 = vld [vmem:[#allocation8 + $0x8c4] ss:$8 sps:$4 sm:$0xff]   ;;  %v12375_v29 = vld [vmem:[#allocation2 + $0x128] sm:$0xff] }
 0x27b   : > { %7849 = vmatmul.mubr.bf16.gmra.mrb[12].mxu0 %v8906_v60  ;;  %v3692_v60 = vor.u32 %v3691_v37, %v3687_v19  ;;  %v8913_v28 = vcombine.high %v12349_v59, %v3674_v46  ;;  %v8912_v0 = vcombine.low %v12349_v59, %v3674_v46  ;;  %v3757_v62 = vshll.u32 %v12375_v29, 16 }
 0x27c   : > { %7858 = vmatprep.mubr.bf16.mxu0 %v8909_v16  ;;  %7992 = vmatpush1.bf16.msra.mxu0 %v10390_v61  ;;  %v3695_v16 = vshll.u32 %v3482_v40, 16  ;;  %v12356_v61 = vld [vmem:[#allocation2 + $0x108] sm:$0xff]  ;;  %v3739_v40 = vrot.slane %v3737_v14, 4  ;;  %v8772_v14 = vcombine.low %v12311_v17, %v12313_v2 }
 0x27d   : > { %7993 = vmatprep.subr.bf16.mxu0 %v10397_v13  ;;  %v10410_v13 = vld [vmem:[#allocation8 + $0x8a0] ss:$8 sps:$4 sm:$0xff]   ;;  %v3724_v52 = vshrl.u32 %v12356_v61, 16  ;;  %v3727_v56 = vshll.u32 %v12356_v61, 16 }
 0x27e   : > { %v3697_v36 = vrot.slane %v3695_v16, 5 }
 0x27f   : > { %v3726_v37 = vrot.slane %v3724_v52, 4  ;;  %v3729_v43 = vrot.slane %v3727_v56, 5  ;;  %v10437_v52 = vld [vmem:[#allocation8 + $0x8f4] ss:$8 sps:$4 sm:$0xff]   ;;  %v12395_v56 = vld [vmem:[#allocation2 + $0x138] sm:$0xff] }
 0x280   : > { %7994 = vmatpush1.bf16.msra.mxu0 %v10395_v39  ;;  %v3716_v39 = vor.u32 %v3715_v3, %v3711_v15  ;;  %v10432_v3 = vld [vmem:[#allocation8 + $0x8e4] ss:$8 sps:$4 sm:$0xff]  }
 0x281   : > { %7087 = vmatmul.mubr.bf16.gmra.mrb[16].mxu1 %v8764_v41  ;;  %7995 = vmatprep.subr.bf16.mxu0 %v10402_v33  ;;  %v3683_v41 = vrot.slane %v3682_v11, 4  ;;  %v10415_v33 = vld [vmem:[#allocation8 + $0x8b0] ss:$8 sps:$4 sm:$0xff]   ;;  %v3730_v46 = vor.u32 %v3729_v43, %v3726_v37  ;;  %v12413_v43 = vld [vmem:[#allocation2 + $0x150] sm:$0xff] }
 0x282   : > { %7096 = vmatprep.mubr.bf16.mxu1 %v8767_v50  ;;  %v3693_v50 = vrot.slane %v3692_v60, 4  ;;  %v3717_v1 = vrot.slane %v3716_v39, 4  ;;  %v3743_v60 = vshll.u32 %v3488_v23, 16  ;;  %v10430_v39 = vld [vmem:[#allocation8 + $0x8e0] ss:$8 sps:$4 sm:$0xff]  }
 0x283   : > { %7859 = vmatmul.mubr.bf16.gmra.mrb[16].mxu0 %v8908_v8  ;;  %v8771_v8 = vcombine.high %v12287_v24, %v12289_v9 }
 0x284   : > { %7868 = vmatprep.mubr.bf16.mxu0 %v8911_v25  ;;  %7996 = vmatpush1.bf16.msra.mxu0 %v10400_v5  ;;  %v3688_v25 = vsel %vm11053_vm2, %v3683_v41, %v3687_v19  ;;  %v3698_v27 = vsel %vm11053_vm2, %v3693_v50, %v3697_v36  ;;  %v3707_v5 = vrot.slane %v3706_v63, 4  ;;  %v12373_v19 = vld [vmem:[#allocation2 + $0x120] sm:$0xff]  ;;  %v3745_v41 = vrot.slane %v3743_v60, 5 }
 0x285   : > { %7997 = vmatprep.subr.bf16.mxu0 %v10407_v48  ;;  %v3735_v48 = vrot.slane %v3733_v30, 5  ;;  %v8915_v6 = vcombine.high %v3688_v25, %v3698_v27  ;;  %v3748_v16 = vshrl.u32 %v12373_v19, 16  ;;  %v12397_v30 = vld [vmem:[#allocation2 + $0x140] sm:$0xff]  ;;  %v3796_v60 = vshrl.u32 %v12413_v43, 16 }
 0x286   : > { %v12381_v59 = vsel %vm11053_vm2, %v3707_v5, %v3711_v15  ;;  %v8773_v15 = vcombine.high %v12311_v17, %v12313_v2  ;;  %v3772_v5 = vshrl.u32 %v12395_v56, 16  ;;  %v3781_v17 = vshll.u32 %v12397_v30, 16 }
 0x287   : > { %v3740_v11 = vor.u32 %v3739_v40, %v3735_v48  ;;  %v3750_v50 = vrot.slane %v3748_v16, 4  ;;  %v3799_v16 = vshll.u32 %v12413_v43, 16 }
 0x288   : > { %7998 = vmatpush1.bf16.msra.mxu0 %v10405_v58  ;;  %v12385_v58 = vsel %vm11053_vm2, %v3717_v1, %v3721_v47  ;;  %v3775_v1 = vshll.u32 %v12395_v56, 16  ;;  %v3785_v47 = vshrl.u32 %v12397_v30, 16 }
 0x289   : > { %7097 = vmatmul.mubr.bf16.gmra.mrb[20].mxu1 %v8766_v45  ;;  %7999 = vmatprep.subr.bf16.mxu0 %v10412_v44  ;;  %v10427_v45 = vld [vmem:[#allocation8 + $0x8d4] ss:$8 sps:$4 sm:$0xff]   ;;  %v3751_v44 = vshll.u32 %v12373_v19, 16  ;;  %v8917_v55 = vcombine.high %v12381_v59, %v12385_v58  ;;  %v8916_v37 = vcombine.low %v12381_v59, %v12385_v58  ;;  %v3805_v59 = vshll.u32 %v12197_v4, 16 }
 0x28a   : > { %7106 = vmatprep.mubr.bf16.mxu1 %v8769_v51  ;;  %v8770_v51 = vcombine.low %v12287_v24, %v12289_v9  ;;  %v3761_v24 = vshrl.u32 %v12375_v29, 16  ;;  %v3809_v58 = vshrl.u32 %v12197_v4, 16 }
 0x28b   : > { %7869 = vmatmul.mubr.bf16.gmra.mrb[20].mxu0 %v8910_v53  ;;  %v8914_v53 = vcombine.low %v3688_v25, %v3698_v27  ;;  %v3753_v36 = vrot.slane %v3751_v44, 5  ;;  %v8774_v44 = vcombine.low %v12333_v26, %v12335_v12  ;;  %v3807_v4 = vrot.slane %v3805_v59, 5 }
 0x28c   : > { %7878 = vmatprep.mubr.bf16.mxu0 %v8913_v28  ;;  %8000 = vmatpush1.bf16.msra.mxu0 %v10410_v13  ;;  %v3731_v28 = vrot.slane %v3730_v46, 4  ;;  %v3741_v13 = vrot.slane %v3740_v11, 4  ;;  %v3763_v63 = vrot.slane %v3761_v24, 4  ;;  %v3787_v46 = vrot.slane %v3785_v47, 4  ;;  %v3494_v11 = vld [vmem:[#allocation2 + $0x148] sm:$0x11] }
 0x28d   : > { %8001 = vmatprep.subr.bf16.mxu0 %v10417_v20  ;;  %v3759_v20 = vrot.slane %v3757_v62, 5  ;;  %v3754_v25 = vor.u32 %v3753_v36, %v3750_v50  ;;  %v8777_v62 = vcombine.high %v12356_v61, %v12358_v21  ;;  %v12427_v36 = vld [vmem:[#allocation2 + $0x168] sm:$0xff] }
 0x28f   : > { %v3764_v27 = vor.u32 %v3763_v63, %v3759_v20  ;;  %v3755_v40 = vrot.slane %v3754_v25, 4  ;;  %v3823_v25 = vshll.u32 %v12427_v36, 16 }
 0x290   : > { %8002 = vmatpush1.bf16.msra.mxu0 %v10415_v33  ;;  %v3736_v33 = vsel %vm11053_vm2, %v3731_v28, %v3735_v48  ;;  %v3801_v28 = vrot.slane %v3799_v16, 5 }
 0x291   : > { %7107 = vmatmul.mubr.bf16.gmra.mrb[24].mxu1 %v8768_v57  ;;  %8003 = vmatprep.subr.bf16.mxu0 %v10422_v7  ;;  %v8775_v57 = vcombine.high %v12333_v26, %v12335_v12  ;;  %v3767_v7 = vshll.u32 %v3491_v34, 16  ;;  %v3760_v24 = vsel %vm11053_vm2, %v3755_v40, %v3759_v20  ;;  %v3497_v26 = vld [vmem:[#allocation2 + $0x160] sm:$0x11]  ;;  %v3825_v40 = vrot.slane %v3823_v25, 5 }
 0x292   : > { %7116 = vmatprep.mubr.bf16.mxu1 %v8771_v8  ;;  %v3746_v8 = vsel %vm11053_vm2, %v3741_v13, %v3745_v41  ;;  %v3811_v41 = vrot.slane %v3809_v58, 4  ;;  %v12467_v25 = vld [vmem:[#allocation2] sm:$0xff] }
 0x293   : > { %7879 = vmatmul.mubr.bf16.gmra.mrb[24].mxu0 %v8912_v0  ;;  %v10435_v0 = vld [vmem:[#allocation8 + $0x8f0] ss:$8 sps:$4 sm:$0xff]   ;;  %v8919_v48 = vcombine.high %v3736_v33, %v3746_v8  ;;  %v3769_v23 = vrot.slane %v3767_v7, 5  ;;  %v8918_v13 = vcombine.low %v3736_v33, %v3746_v8  ;;  %v8776_v33 = vcombine.low %v12356_v61, %v12358_v21 }
 0x294   : > { %7888 = vmatprep.mubr.bf16.mxu0 %v8915_v6  ;;  %8004 = vmatpush1.bf16.msra.mxu0 %v10420_v38  ;;  %v3765_v6 = vrot.slane %v3764_v27, 4  ;;  %v3774_v38 = vrot.slane %v3772_v5, 4  ;;  %v3829_v8 = vshll.u32 %v12207_v35, 16  ;;  %v3833_v27 = vshrl.u32 %v12207_v35, 16  ;;  %v3500_v35 = vld [vmem:[#allocation2 + $0x178] sm:$0x11] }
 0x295   : > { %8005 = vmatprep.subr.bf16.mxu0 %v10427_v45  ;;  %v3777_v45 = vrot.slane %v3775_v1, 5  ;;  %v8779_v7 = vcombine.high %v12373_v19, %v12375_v29  ;;  %v3839_v59 = vshll.u32 %v3500_v35, 16 }
 0x298   : > { %8006 = vmatpush1.bf16.msra.mxu0 %v10425_v22  ;;  %v3770_v22 = vsel %vm11053_vm2, %v3765_v6, %v3769_v23  ;;  %v3831_v6 = vrot.slane %v3829_v8, 5  ;;  %v3835_v23 = vrot.slane %v3833_v27, 4  ;;  %v3871_v8 = vshll.u32 %v12467_v25, 16 }
 0x299   : > { %7117 = vmatmul.mubr.bf16.gmra.mrb[28].mxu1 %v8770_v51  ;;  %8007 = vmatprep.subr.bf16.mxu0 %v10432_v3  ;;  %v3783_v51 = vrot.slane %v3781_v17, 5  ;;  %v8921_v50 = vcombine.high %v3760_v24, %v3770_v22  ;;  %v8920_v1 = vcombine.low %v3760_v24, %v3770_v22 }
 0x29a   : > { %7126 = vmatprep.mubr.bf16.mxu1 %v8773_v15  ;;  %v3778_v15 = vor.u32 %v3777_v45, %v3774_v38  ;;  %v12441_v38 = vld [vmem:[#allocation2 + $0x180] sm:$0xff]  ;;  %v12443_v45 = vld [vmem:[#allocation2 + $0x188] sm:$0xff]  ;;  %v3836_v16 = vor.u32 %v3835_v23, %v3831_v6 }
 0x29b   : > { %7889 = vmatmul.mubr.bf16.gmra.mrb[28].mxu0 %v8914_v53  ;;  %v3788_v3 = vor.u32 %v3787_v46, %v3783_v51  ;;  %v3791_v53 = vshll.u32 %v3494_v11, 16  ;;  %v3844_v58 = vshrl.u32 %v12441_v38, 16  ;;  %v3853_v24 = vshll.u32 %v12443_v45, 16 }
 0x29c   : > { %7898 = vmatprep.mubr.bf16.mxu0 %v8917_v55  ;;  %8008 = vmatpush1.bf16.msra.mxu0 %v10430_v39  ;;  %v3798_v55 = vrot.slane %v3796_v60, 4  ;;  %v3779_v63 = vrot.slane %v3778_v15, 4 }
 0x29d   : > { %8009 = vmatprep.subr.bf16.mxu0 %v10437_v52  ;;  %v3789_v39 = vrot.slane %v3788_v3, 4  ;;  %v3793_v20 = vrot.slane %v3791_v53, 5  ;;  %v3812_v52 = vor.u32 %v3811_v41, %v3807_v4  ;;  %v3837_v53 = vrot.slane %v3836_v16, 4  ;;  %v4052_v16 = vld [vmem:[#allocation2 + $0x38] sm:$0xff] }
 0x29e   : > { %v3802_v34 = vor.u32 %v3801_v28, %v3798_v55  ;;  %v3841_v55 = vrot.slane %v3839_v59, 5  ;;  %v3846_v28 = vrot.slane %v3844_v58, 4  ;;  %v3855_v41 = vrot.slane %v3853_v24, 5  ;;  %v4051_v24 = vld [vmem:[#allocation2 + $0x30] sm:$0xee] }
 0x29f   : > { %v3794_v5 = vsel %vm11053_vm2, %v3789_v39, %v3793_v20  ;;  %v3813_v47 = vrot.slane %v3812_v52, 4  ;;  %v8787_v59 = vcombine.high %v12441_v38, %v12443_v45 }
 0x2a0   : > { %8010 = vmatpush1.bf16.msra.mxu0 %v10435_v0  ;;  %v3784_v0 = vsel %vm11053_vm2, %v3779_v63, %v3783_v51  ;;  %v3803_v17 = vrot.slane %v3802_v34, 4  ;;  %v8778_v51 = vcombine.low %v12373_v19, %v12375_v29  ;;  %v3857_v19 = vshrl.u32 %v12443_v45, 16 }
 0x2a1   : > { %7127 = vmatmul.mubr.bf16.gmra.mrb[32].mxu1 %v8772_v14  ;;  %v3815_v14 = vshll.u32 %v3497_v26, 16  ;;  %v8923_v61 = vcombine.high %v3784_v0, %v3794_v5  ;;  %v8922_v22 = vcombine.low %v3784_v0, %v3794_v5  ;;  %v3503_v26 = vld [vmem:[#allocation2 + $0x190] sm:$0x11]  ;;  %v8780_v63 = vcombine.low %v12395_v56, %v12397_v30 }
 0x2a2   : > { %7136 = vmatprep.mubr.bf16.mxu1 %v8775_v57  ;;  %v3820_v57 = vshrl.u32 %v12427_v36, 16  ;;  %v3808_v46 = vsel %vm11053_vm2, %v3803_v17, %v3807_v4  ;;  %v12457_v4 = vld [vmem:[#allocation2 + $0x158] sm:$0xff]  ;;  %v3842_v34 = vsel %vm11053_vm2, %v3837_v53, %v3841_v55  ;;  %v12471_v0 = vld [vmem:[#allocation2 + $0x170] sm:$0xff] }
 0x2a3   : > { %7899 = vmatmul.mubr.bf16.gmra.mrb[32].mxu0 %v8916_v37  ;;  %v3817_v37 = vrot.slane %v3815_v14, 5  ;;  %v8783_v39 = vcombine.high %v12413_v43, %v12457_v4 }
 0x2a4   : > { %7908 = vmatprep.mubr.bf16.mxu0 %v8919_v48  ;;  %v3822_v48 = vrot.slane %v3820_v57, 4  ;;  %v3863_v57 = vshll.u32 %v3503_v26, 16 }
 0x2a5   : > { %v3818_v11 = vsel %vm11053_vm2, %v3813_v47, %v3817_v37  ;;  %v3873_v47 = vrot.slane %v3871_v8, 5  ;;  %v3506_v37 = vld [vmem:[#allocation2 + $0x1a8] sm:$0x11] }
 0x2a6   : > { %v3826_v60 = vor.u32 %v3825_v40, %v3822_v48  ;;  %v8925_v15 = vcombine.high %v3808_v46, %v3818_v11  ;;  %v8782_v48 = vcombine.low %v12413_v43, %v12457_v4  ;;  %v8785_v40 = vcombine.high %v12427_v36, %v12471_v0 }
 0x2a7   : > { %v3887_v35 = vshll.u32 %v3506_v37, 16  ;;  %v8784_v43 = vcombine.low %v12427_v36, %v12471_v0  ;;  %v8786_v36 = vcombine.low %v12441_v38, %v12443_v45  ;;  %v4062_v37 = vld [vmem:[#allocation2 + $0x88] sm:$0x11] }
 0x2a8   : > { %v3827_v3 = vrot.slane %v3826_v60, 4 }
 0x2a9   : > { %7137 = vmatmul.mubr.bf16.gmra.mrb[36].mxu1 %v8774_v44  ;;  %v3847_v44 = vshll.u32 %v12441_v38, 16  ;;  %v3889_v60 = vrot.slane %v3887_v35, 5 }
 0x2aa   : > { %7146 = vmatprep.mubr.bf16.mxu1 %v8777_v62  ;;  %v8781_v62 = vcombine.high %v12395_v56, %v12397_v30  ;;  %v3832_v20 = vsel %vm11053_vm2, %v3827_v3, %v3831_v6  ;;  %v8924_v56 = vcombine.low %v3808_v46, %v3818_v11  ;;  %v8932_v3 = vrot.slane %v4051_v24, 9  ;;  %v4066_v24 = vld [vmem:[#allocation2 + $0xa8] sm:$0xee] }
 0x2ab   : > { %7909 = vmatmul.mubr.bf16.gmra.mrb[36].mxu0 %v8918_v13  ;;  %v3849_v13 = vrot.slane %v3847_v44, 5  ;;  %v8927_v27 = vcombine.high %v3832_v20, %v3842_v34 }
 0x2ac   : > { %7918 = vmatprep.mubr.bf16.mxu0 %v8921_v50  ;;  %v3859_v50 = vrot.slane %v3857_v19, 4  ;;  %v4053_v19 = vld [vmem:[#allocation2 + $0x40] sm:$0x11] }
 0x2ad   : > { %v3850_v52 = vor.u32 %v3849_v13, %v3846_v28  ;;  %v4152_v55 = vrot.slane %v4053_v19, 5  ;;  %v4156_v13 = vrot.slane %v12250_v32, 5  ;;  %v4059_v32 = vld [vmem:[#allocation2 + $0x70] sm:$0x11]  ;;  %v4068_v19 = vld [vmem:[#allocation2 + $0xb8] sm:$0x11] }
 0x2ae   : > { %v3860_v14 = vor.u32 %v3859_v50, %v3855_v41  ;;  %v4056_v50 = vld [vmem:[#allocation2 + $0x58] sm:$0x11] }
 0x2b0   : > { %v3861_v5 = vrot.slane %v3860_v14, 4  ;;  %v4163_v14 = vrot.slane %v12268_v49, 5 }
 0x2b1   : > { %7147 = vmatmul.mubr.bf16.gmra.mrb[40].mxu1 %v8776_v33  ;;  %v3868_v33 = vshrl.u32 %v12467_v25, 16 }
 0x2b2   : > { %7156 = vmatprep.mubr.bf16.mxu1 %v8779_v7  ;;  %v3851_v7 = vrot.slane %v3850_v52, 4 }
 0x2b3   : > { %7919 = vmatmul.mubr.bf16.gmra.mrb[40].mxu0 %v8920_v1  ;;  %v3865_v1 = vrot.slane %v3863_v57, 5  ;;  %v3870_v17 = vrot.slane %v3868_v33, 4  ;;  %v4057_v57 = vld [vmem:[#allocation2 + $0x60] sm:$0xee] }
 0x2b4   : > { %7928 = vmatprep.mubr.bf16.mxu0 %v8923_v61  ;;  %v3856_v61 = vsel %vm11053_vm2, %v3851_v7, %v3855_v41  ;;  %v4054_v41 = vld [vmem:[#allocation2 + $0x48] sm:$0xee]  ;;  %v4166_v7 = vrot.slane %v4059_v32, 5 }
 0x2b5   : > { %v3866_v6 = vsel %vm11053_vm2, %v3861_v5, %v3865_v1  ;;  %v3874_v23 = vor.u32 %v3873_v47, %v3870_v17  ;;  %v4170_v17 = vrot.slane %v12234_v31, 5 }
 0x2b6   : > { %v8929_v46 = vcombine.high %v3856_v61, %v3866_v6 }
 0x2b7   : > { %v3875_v11 = vrot.slane %v3874_v23, 4 }
 0x2b9   : > { %7157 = vmatmul.mubr.bf16.gmra.mrb[44].mxu1 %v8778_v51  ;;  %v8926_v51 = vcombine.low %v3832_v20, %v3842_v34  ;;  %v3880_v58 = vsel %vm11053_vm2, %v3875_v11, %v3873_v47  ;;  %v3890_v44 = vsel %vm11053_vm2, %v3875_v11, %v3889_v60  ;;  %v4158_v20 = vrot.slane %v4156_v13, 4  ;;  %v4060_v47 = vld [vmem:[#allocation2 + $0x78] sm:$0xee]  ;;  %v4065_v11 = vld [vmem:[#allocation2 + $0xa0] sm:$0x11] }
 0x2ba   : > { %7166 = vmatprep.mubr.bf16.mxu1 %v8781_v62  ;;  %v4149_v62 = vrot.slane %v4052_v16, 5  ;;  %v8930_v26 = vcombine.low %v3880_v58, %v3890_v44  ;;  %v4159_v34 = vrot.slane %v4056_v50, 5 }
 0x2bb   : > { %7929 = vmatmul.mubr.bf16.gmra.mrb[44].mxu0 %v8922_v22  ;;  %v8928_v22 = vcombine.low %v3856_v61, %v3866_v6  ;;  %v4172_v61 = vrot.slane %v4170_v17, 4  ;;  %v4173_v6 = vrot.slane %v4062_v37, 5 }
 0x2bc   : > { %7938 = vmatprep.mubr.bf16.mxu0 %v8925_v15  ;;  %v8931_v15 = vcombine.high %v3880_v58, %v3890_v44  ;;  %v4151_v53 = vrot.slane %v4149_v62, 4  ;;  %v4150_v28 = vsel %vm11589_vm5, %v8932_v3, %v4149_v62  ;;  %v4160_v52 = vsel %vm11589_vm5, %v4158_v20, %v4159_v34 }
 0x2bd   : > { %v4174_v35 = vsel %vm11589_vm5, %v4172_v61, %v4173_v6  ;;  %v4184_v62 = vrot.slane %v12266_v42, 5  ;;  %v4198_v34 = vrot.slane %v12313_v2, 5  ;;  %v4078_v61 = vld [vmem:[#allocation2 + $0x108] sm:$0xee]  ;;  %v4080_v6 = vld [vmem:[#allocation2 + $0x118] sm:$0x11] }
 0x2be   : > { %v4153_v54 = vsel %vm11589_vm5, %v4151_v53, %v4152_v55  ;;  %v4187_v53 = vrot.slane %v4068_v19, 5 }
 0x2bf   : > { %v8948_v33 = vcombine.low %v4150_v28, %v4153_v54  ;;  %v4186_v3 = vrot.slane %v4184_v62, 4  ;;  %v4200_v32 = vrot.slane %v4198_v34, 4 }
 0x2c1   : > { %7167 = vmatmul.mubr.bf16.gmra.mrb[48].mxu1 %v8780_v63  ;;  %v8949_v63 = vcombine.high %v4150_v28, %v4153_v54  ;;  %v4191_v28 = vrot.slane %v12289_v9, 5  ;;  %v4069_v54 = vld [vmem:[#allocation2 + $0xc0] sm:$0xee] }
 0x2c2   : > { %7176 = vmatprep.mubr.bf16.mxu1 %v8783_v39  ;;  %v8933_v39 = vrot.slane %v4054_v41, 9  ;;  %v8938_v50 = vrot.slane %v4069_v54, 9 }
 0x2c3   : > { %7939 = vmatmul.mubr.bf16.gmra.mrb[48].mxu0 %v8924_v56  ;;  %v8934_v56 = vrot.slane %v4057_v57, 9 }
 0x2c4   : > { %7948 = vmatprep.mubr.bf16.mxu0 %v8927_v27  ;;  %v4157_v38 = vsel %vm11589_vm5, %v8933_v39, %v4156_v13  ;;  %v4165_v27 = vrot.slane %v4163_v14, 4  ;;  %v4071_v13 = vld [vmem:[#allocation2 + $0xd0] sm:$0x11]  ;;  %v4192_v39 = vsel %vm11589_vm5, %v8938_v50, %v4191_v28 }
 0x2c5   : > { %v8951_v8 = vcombine.high %v4157_v38, %v4160_v52  ;;  %v4164_v5 = vsel %vm11589_vm5, %v8934_v56, %v4163_v14  ;;  %v8950_v49 = vcombine.low %v4157_v38, %v4160_v52  ;;  %v4072_v38 = vld [vmem:[#allocation2 + $0xd8] sm:$0xee]  ;;  %v4074_v52 = vld [vmem:[#allocation2 + $0xe8] sm:$0x11] }
 0x2c6   : > { %v4167_v1 = vsel %vm11589_vm5, %v4165_v27, %v4166_v7  ;;  %v8939_v57 = vrot.slane %v4072_v38, 9  ;;  %v4205_v27 = vrot.slane %v12335_v12, 5  ;;  %v4075_v7 = vld [vmem:[#allocation2 + $0xf0] sm:$0xee] }
 0x2c7   : > { %v8952_v31 = vcombine.low %v4164_v5, %v4167_v1 }
 0x2c9   : > { %7177 = vmatmul.mubr.bf16.gmra.mrb[52].mxu1 %v8782_v48  ;;  %v8953_v48 = vcombine.high %v4164_v5, %v4167_v1  ;;  %v4077_v5 = vld [vmem:[#allocation2 + $0x100] sm:$0x11] }
 0x2ca   : > { %7186 = vmatprep.mubr.bf16.mxu1 %v8785_v40  ;;  %v8935_v40 = vrot.slane %v4060_v47, 9  ;;  %v4207_v47 = vrot.slane %v4205_v27, 4  ;;  %v4208_v37 = vrot.slane %v4077_v5, 5 }
 0x2cb   : > { %7949 = vmatmul.mubr.bf16.gmra.mrb[52].mxu0 %v8926_v51  ;;  %v4177_v51 = vrot.slane %v12246_v10, 5 }
 0x2cc   : > { %7958 = vmatprep.mubr.bf16.mxu0 %v8929_v46  ;;  %v4171_v23 = vsel %vm11589_vm5, %v8935_v40, %v4170_v17  ;;  %v4063_v46 = vld [vmem:[#allocation2 + $0x90] sm:$0xee]  ;;  %v8940_v17 = vrot.slane %v4075_v7, 9  ;;  %v4212_v40 = vrot.slane %v12358_v21, 5 }
 0x2cd   : > { %v8955_v60 = vcombine.high %v4171_v23, %v4174_v35  ;;  %v8936_v16 = vrot.slane %v4063_v46, 9  ;;  %v8954_v10 = vcombine.low %v4171_v23, %v4174_v35  ;;  %v8941_v35 = vrot.slane %v4078_v61, 9 }
 0x2ce   : > { %v4215_v46 = vrot.slane %v4080_v6, 5 }
 0x2cf   : > { %v4178_v58 = vsel %vm11589_vm5, %v8936_v16, %v4177_v51  ;;  %v4081_v16 = vld [vmem:[#allocation2 + $0x120] sm:$0xee] }
 0x2d1   : > { %7187 = vmatmul.mubr.bf16.gmra.mrb[56].mxu1 %v8784_v43  ;;  %v4179_v43 = vrot.slane %v4177_v51, 4  ;;  %v4214_v51 = vrot.slane %v4212_v40, 4 }
 0x2d2   : > { %7196 = vmatprep.mubr.bf16.mxu1 %v8787_v59  ;;  %v4180_v59 = vrot.slane %v4065_v11, 5  ;;  %v4213_v11 = vsel %vm11589_vm5, %v8941_v35, %v4212_v40 }
 0x2d3   : > { %7959 = vmatmul.mubr.bf16.gmra.mrb[56].mxu0 %v8928_v22 }
 0x2d4   : > { %7968 = vmatprep.mubr.bf16.mxu0 %v8931_v15  ;;  %v4181_v44 = vsel %vm11589_vm5, %v4179_v43, %v4180_v59  ;;  %v8937_v15 = vrot.slane %v4066_v24, 9  ;;  %v4083_v43 = vld [vmem:[#allocation2 + $0x130] sm:$0x11] }
 0x2d5   : > { %v8957_v22 = vcombine.high %v4178_v58, %v4181_v44  ;;  %v8956_v42 = vcombine.low %v4178_v58, %v4181_v44  ;;  %v8942_v58 = vrot.slane %v4081_v16, 9  ;;  %v4096_v16 = vld [vmem:[#allocation2 + $0x198] sm:$0xee] }
 0x2d6   : > { %v4185_v55 = vsel %vm11589_vm5, %v8937_v15, %v4184_v62  ;;  %v4222_v62 = vrot.slane %v4083_v43, 5  ;;  %v4086_v15 = vld [vmem:[#allocation2 + $0x148] sm:$0x11] }
 0x2d7   : > { %v4098_v43 = vld [vmem:[#allocation2 + $0x1a8] sm:$0x11] }
 0x2d9   : > { %7197 = vmatmul.mubr.bf16.gmra.mrb[60].mxu1 %v8786_v36  ;;  %v4188_v36 = vsel %vm11589_vm5, %v4186_v3, %v4187_v53 }
 0x2da   : > { %v8959_v41 = vcombine.high %v4185_v55, %v4188_v36  ;;  %v8958_v9 = vcombine.low %v4185_v55, %v4188_v36  ;;  %v4229_v36 = vrot.slane %v4086_v15, 5 }
 0x2db   : > { %7969 = vmatmul.mubr.bf16.gmra.mrb[60].mxu0 %v8930_v26  ;;  %v4193_v26 = vrot.slane %v4191_v28, 4 }
 0x2dc   : > { %8011 = vmatprep.mubr.bf16.mxu0 %v8949_v63  ;;  %v4194_v63 = vrot.slane %v4071_v13, 5  ;;  %v4233_v13 = vrot.slane %v12457_v4, 5 }
 0x2de   : > { %v4195_v20 = vsel %vm11589_vm5, %v4193_v26, %v4194_v63  ;;  %v4235_v63 = vrot.slane %v4233_v13, 4 }
 0x2df   : > { %v8961_v14 = vcombine.high %v4192_v39, %v4195_v20  ;;  %v8960_v2 = vcombine.low %v4192_v39, %v4195_v20 }
 0x2e3   : > { %8012 = vmatmul.mubr.bf16.vlgmr.msra.gmra.mrb[0].mxu0 %v8948_v33  ;;  %v4201_v33 = vrot.slane %v4074_v52, 5 }
 0x2e4   : > { %8021 = vmatprep.mubr.bf16.mxu0 %v8951_v8  ;;  %v4199_v8 = vsel %vm11589_vm5, %v8939_v57, %v4198_v34  ;;  %v4090_v57 = vld [vmem:[#allocation2 + $0x168] sm:$0xee] }
 0x2e5   : > { %v4202_v56 = vsel %vm11589_vm5, %v4200_v32, %v4201_v33  ;;  %v4092_v32 = vld [vmem:[#allocation2 + $0x178] sm:$0x11] }
 0x2e6   : > { %v8963_v1 = vcombine.high %v4199_v8, %v4202_v56  ;;  %v8962_v12 = vcombine.low %v4199_v8, %v4202_v56  ;;  %v8945_v56 = vrot.slane %v4090_v57, 9  ;;  %v4243_v7 = vrot.slane %v4092_v32, 5 }
 0x2eb   : > { %8022 = vmatmul.mubr.bf16.gmra.mrb[4].mxu0 %v8950_v49  ;;  %v4206_v49 = vsel %vm11589_vm5, %v8940_v17, %v4205_v27 }
 0x2ec   : > { %8031 = vmatprep.mubr.bf16.mxu0 %v8953_v48  ;;  %v4209_v48 = vsel %vm11589_vm5, %v4207_v47, %v4208_v37  ;;  %v4247_v47 = vrot.slane %v12443_v45, 5 }
 0x2ed   : > { %v8965_v23 = vcombine.high %v4206_v49, %v4209_v48  ;;  %v8964_v21 = vcombine.low %v4206_v49, %v4209_v48  ;;  %v4093_v49 = vld [vmem:[#allocation2 + $0x180] sm:$0xee]  ;;  %v4095_v48 = vld [vmem:[#allocation2 + $0x190] sm:$0x11] }
 0x2ee   : > { %v8946_v6 = vrot.slane %v4093_v49, 9 }
 0x2f0   : > { %v4248_v45 = vsel %vm11589_vm5, %v8946_v6, %v4247_v47 }
 0x2f3   : > { %8032 = vmatmul.mubr.bf16.gmra.mrb[8].mxu0 %v8952_v31  ;;  %v4216_v31 = vsel %vm11589_vm5, %v4214_v51, %v4215_v46 }
 0x2f4   : > { %8041 = vmatprep.mubr.bf16.mxu0 %v8955_v60  ;;  %v4219_v60 = vrot.slane %v12375_v29, 5  ;;  %v8967_v59 = vcombine.high %v4213_v11, %v4216_v31  ;;  %v8966_v29 = vcombine.low %v4213_v11, %v4216_v31  ;;  %v4254_v31 = vrot.slane %v12467_v25, 5 }
 0x2f6   : > { %v4221_v44 = vrot.slane %v4219_v60, 4  ;;  %v4220_v24 = vsel %vm11589_vm5, %v8942_v58, %v4219_v60  ;;  %v8947_v58 = vrot.slane %v4096_v16, 9 }
 0x2f8   : > { %v4223_v19 = vsel %vm11589_vm5, %v4221_v44, %v4222_v62  ;;  %v4256_v44 = vrot.slane %v4254_v31, 4  ;;  %v4257_v62 = vrot.slane %v4098_v43, 5  ;;  %v4255_v25 = vsel %vm11589_vm5, %v8947_v58, %v4254_v31 }
 0x2f9   : > { %v8969_v3 = vcombine.high %v4220_v24, %v4223_v19 }
 0x2fb   : > { %8042 = vmatmul.mubr.bf16.gmra.mrb[12].mxu0 %v8954_v10  ;;  %v4226_v10 = vrot.slane %v12397_v30, 5  ;;  %v8968_v30 = vcombine.low %v4220_v24, %v4223_v19 }
 0x2fc   : > { %8051 = vmatprep.mubr.bf16.mxu0 %v8957_v22  ;;  %v4084_v22 = vld [vmem:[#allocation2 + $0x138] sm:$0xee] }
 0x2fd   : > { %v8943_v53 = vrot.slane %v4084_v22, 9  ;;  %v4228_v55 = vrot.slane %v4226_v10, 4  ;;  %v4258_v22 = vsel %vm11589_vm5, %v4256_v44, %v4257_v62 }
 0x2ff   : > { %v4227_v28 = vsel %vm11589_vm5, %v8943_v53, %v4226_v10  ;;  %v4230_v54 = vsel %vm11589_vm5, %v4228_v55, %v4229_v36 }
 0x300   : > { %v8971_v50 = vcombine.high %v4227_v28, %v4230_v54  ;;  %v8970_v33 = vcombine.low %v4227_v28, %v4230_v54  ;;  %v8978_v54 = vcombine.low %v4255_v25, %v4258_v22 }
 0x303   : > { %8052 = vmatmul.mubr.bf16.gmra.mrb[16].mxu0 %v8956_v42  ;;  %v4087_v42 = vld [vmem:[#allocation2 + $0x150] sm:$0xee] }
 0x304   : > { %8061 = vmatprep.mubr.bf16.mxu0 %v8959_v41  ;;  %v4089_v41 = vld [vmem:[#allocation2 + $0x160] sm:$0x11]  ;;  %v8944_v26 = vrot.slane %v4087_v42, 9 }
 0x305   : > { %v4236_v39 = vrot.slane %v4089_v41, 5 }
 0x306   : > { %v4234_v52 = vsel %vm11589_vm5, %v8944_v26, %v4233_v13 }
 0x307   : > { %v4237_v4 = vsel %vm11589_vm5, %v4235_v63, %v4236_v39 }
 0x308   : > { %v8973_v8 = vcombine.high %v4234_v52, %v4237_v4  ;;  %v8972_v40 = vcombine.low %v4234_v52, %v4237_v4 }
 0x30b   : > { %8062 = vmatmul.mubr.bf16.gmra.mrb[20].mxu0 %v8958_v9  ;;  %v4240_v9 = vrot.slane %v12471_v0, 5 }
 0x30c   : > { %8071 = vmatprep.mubr.bf16.mxu0 %v8961_v14 }
 0x30d   : > { %v4242_v27 = vrot.slane %v4240_v9, 4  ;;  %v4241_v0 = vsel %vm11589_vm5, %v8945_v56, %v4240_v9 }
 0x30f   : > { %v4244_v17 = vsel %vm11589_vm5, %v4242_v27, %v4243_v7 }
 0x310   : > { %v8975_v61 = vcombine.high %v4241_v0, %v4244_v17 }
 0x313   : > { %8072 = vmatmul.mubr.bf16.gmra.mrb[24].mxu0 %v8960_v2 }
 0x314   : > { %8081 = vmatprep.mubr.bf16.mxu0 %v8963_v1 }
 0x31b   : > { %8082 = vmatmul.mubr.bf16.gmra.mrb[28].mxu0 %v8962_v12  ;;  %v4249_v12 = vrot.slane %v4247_v47, 4 }
 0x31c   : > { %8091 = vmatprep.mubr.bf16.mxu0 %v8965_v23  ;;  %v4250_v23 = vrot.slane %v4095_v48, 5 }
 0x31e   : > { %v4251_v11 = vsel %vm11589_vm5, %v4249_v12, %v4250_v23 }
 0x323   : > { %8092 = vmatmul.mubr.bf16.gmra.mrb[32].mxu0 %v8964_v21  ;;  %v8974_v21 = vcombine.low %v4241_v0, %v4244_v17 }
 0x324   : > { %8101 = vmatprep.mubr.bf16.mxu0 %v8967_v59  ;;  %v8977_v59 = vcombine.high %v4248_v45, %v4251_v11 }
 0x32b   : > { %8102 = vmatmul.mubr.bf16.gmra.mrb[36].mxu0 %v8966_v29  ;;  %v8976_v29 = vcombine.low %v4248_v45, %v4251_v11 }
 0x32c   : > { %8111 = vmatprep.mubr.bf16.mxu0 %v8969_v3  ;;  %v8979_v3 = vcombine.high %v4255_v25, %v4258_v22  ;;  %v12974_v22 = vlaneseq }
 0x333   : > { %8112 = vmatmul.mubr.bf16.gmra.mrb[40].mxu0 %v8968_v30 }
 0x334   : > { %v12551_v20 = vpop.f32.mrb[0].mxu1  ;;  %8121 = vmatprep.mubr.bf16.mxu0 %v8971_v50 }
 0x335   : > { %v12553_v34 = vpop.f32.mrb[1].mxu1 }
 0x336   : > { %v12555_v38 = vpop.f32.mrb[2].mxu1 }
 0x337   : > { %v12562_v14 = vpop.f32.mrb[3].mxu1 }
 0x33b   : > { %8122 = vmatmul.mubr.bf16.gmra.mrb[44].mxu0 %v8970_v33 }
 0x33c   : > { %v12564_v5 = vpop.f32.mrb[4].mxu1  ;;  %8131 = vmatprep.mubr.bf16.mxu0 %v8973_v8 }
 0x33d   : > { %v12566_v2 = vpop.f32.mrb[5].mxu1 }
 0x33e   : > { %v12568_v1 = vpop.f32.mrb[6].mxu1 }
 0x33f   : > { %v12575_v37 = vpop.f32.mrb[7].mxu1 }
 0x343   : > { %8132 = vmatmul.mubr.bf16.gmra.mrb[48].mxu0 %v8972_v40 }
 0x344   : > { %v12577_v35 = vpop.f32.mrb[8].mxu1  ;;  %8141 = vmatprep.mubr.bf16.mxu0 %v8975_v61 }
 0x345   : > { %v12579_v51 = vpop.f32.mrb[9].mxu1 }
 0x346   : > { %v12581_v46 = vpop.f32.mrb[10].mxu1 }
 0x347   : > { %v12588_v60 = vpop.f32.mrb[11].mxu1 }
 0x34b   : > { %8142 = vmatmul.mubr.bf16.gmra.mrb[52].mxu0 %v8974_v21 }
 0x34c   : > { %v12590_v24 = vpop.f32.mrb[12].mxu1  ;;  %8151 = vmatprep.mubr.bf16.mxu0 %v8977_v59 }
 0x34d   : > { %v12592_v19 = vpop.f32.mrb[13].mxu1 }
 0x34e   : > { %v12594_v10 = vpop.f32.mrb[14].mxu1 }
 0x34f   : > { %v12600_v15 = vpop.f32.mrb[15].mxu1 }
 0x353   : > { %8152 = vmatmul.mubr.bf16.gmra.mrb[56].mxu0 %v8976_v29 }
 0x354   : > { %v12602_v53 = vpop.f32.mrb[16].mxu1  ;;  %8161 = vmatprep.mubr.bf16.mxu0 %v8979_v3 }
 0x355   : > { %v12604_v55 = vpop.f32.mrb[17].mxu1 }
 0x356   : > { %v12606_v36 = vpop.f32.mrb[18].mxu1 }
 0x357   : > { %v12608_v28 = vpop.f32.mrb[19].mxu1 }
 0x35b   : > { %8162 = vmatmul.mubr.bf16.gmra.mrb[60].mxu0 %v8978_v54 }
 0x35c   : > { %v12610_v13 = vpop.f32.mrb[20].mxu1 }
 0x35d   : > { %v12612_v18 = vpop.f32.mrb[21].mxu1 }
 0x35e   : > { %v12614_v42 = vpop.f32.mrb[22].mxu1 }
 0x35f   : > { %v12616_v41 = vpop.f32.mrb[23].mxu1 }
 0x364   : > { %v12618_v30 = vpop.f32.mrb[24].mxu1 }
 0x365   : > { %v12620_v50 = vpop.f32.mrb[25].mxu1 }
 0x366   : > { %v12622_v26 = vpop.f32.mrb[26].mxu1 }
 0x367   : > { %v12624_v63 = vpop.f32.mrb[27].mxu1 }
 0x36c   : > { %v12626_v39 = vpop.f32.mrb[28].mxu1 }
 0x36d   : > { %v12628_v52 = vpop.f32.mrb[29].mxu1 }
 0x36e   : > { %v12630_v4 = vpop.f32.mrb[30].mxu1 }
 0x36f   : > { %v12632_v9 = vpop.f32.mrb[31].mxu1 }
 0x374   : > { %v12634_v57 = vpop.f32.mrb[32].mxu1 }
 0x375   : > { %v12636_v32 = vpop.f32.mrb[33].mxu1 }
 0x376   : > { %v12638_v33 = vpop.f32.mrb[34].mxu1 }
 0x377   : > { %v12640_v8 = vpop.f32.mrb[35].mxu1 }
 0x37c   : > { %v12642_v56 = vpop.f32.mrb[36].mxu1 }
 0x37d   : > { %v12644_v27 = vpop.f32.mrb[37].mxu1 }
 0x37e   : > { %v12646_v7 = vpop.f32.mrb[38].mxu1 }
 0x37f   : > { %v12648_v0 = vpop.f32.mrb[39].mxu1 }
 0x384   : > { %v12650_v17 = vpop.f32.mrb[40].mxu1 }
 0x385   : > { %v12652_v47 = vpop.f32.mrb[41].mxu1 }
 0x386   : > { %v12654_v49 = vpop.f32.mrb[42].mxu1 }
 0x387   : > { %v12656_v48 = vpop.f32.mrb[43].mxu1 }
 0x388   : > { %13010 = vst [vmem:[#allocation19_spill] sm:$0xff] %v12656_v48 }
 0x38c   : > { %v12658_v40 = vpop.f32.mrb[44].mxu1 }
 0x38d   : > { %13011 = vst [vmem:[#allocation20_spill] sm:$0xff] %v12658_v40  ;;  %v12660_v61 = vpop.f32.mrb[45].mxu1 }
 0x38e   : > { %13012 = vst [vmem:[#allocation21_spill] sm:$0xff] %v12660_v61  ;;  %v12662_v6 = vpop.f32.mrb[46].mxu1 }
 0x38f   : > { %13013 = vst [vmem:[#allocation22_spill] sm:$0xff] %v12662_v6  ;;  %v12664_v12 = vpop.f32.mrb[47].mxu1 }
 0x390   : > { %13014 = vst [vmem:[#allocation23_spill] sm:$0xff] %v12664_v12 }
 0x394   : > { %v12666_v23 = vpop.f32.mrb[48].mxu1 }
 0x395   : > { %13015 = vst [vmem:[#allocation24_spill] sm:$0xff] %v12666_v23  ;;  %v12668_v45 = vpop.f32.mrb[49].mxu1 }
 0x396   : > { %13016 = vst [vmem:[#allocation25_spill] sm:$0xff] %v12668_v45  ;;  %v12670_v11 = vpop.f32.mrb[50].mxu1 }
 0x397   : > { %13017 = vst [vmem:[#allocation26_spill] sm:$0xff] %v12670_v11  ;;  %v12672_v31 = vpop.f32.mrb[51].mxu1 }
 0x398   : > { %13018 = vst [vmem:[#allocation27_spill] sm:$0xff] %v12672_v31 }
 0x39c   : > { %v12674_v16 = vpop.f32.mrb[52].mxu1 }
 0x39d   : > { %13019 = vst [vmem:[#allocation28_spill] sm:$0xff] %v12674_v16  ;;  %v12676_v43 = vpop.f32.mrb[53].mxu1 }
 0x39e   : > { %13020 = vst [vmem:[#allocation29_spill] sm:$0xff] %v12676_v43  ;;  %v12678_v21 = vpop.f32.mrb[54].mxu1  ;;  %v12697_v43 = vshrl.u32 %v12974_v22, 7 }
 0x39f   : > { %13021 = vst [vmem:[#allocation30_spill] sm:$0xff] %v12678_v21  ;;  %v12680_v59 = vpop.f32.mrb[55].mxu1 }
 0x3a0   : > { %13022 = vst [vmem:[#allocation31_spill] sm:$0xff] %v12680_v59  ;;  %13030 = vst [vmem:[#allocation39_spill] sm:$0xff] %v12697_v43  ;;  %v8248_v59 = vld [vmem:[#allocation11] sm:$0x3] }
 0x3a4   : > { %v12682_v58 = vpop.f32.mrb[56].mxu1 }
 0x3a5   : > { %13023 = vst [vmem:[#allocation32_spill] sm:$0xff] %v12682_v58  ;;  %v12684_v44 = vpop.f32.mrb[57].mxu1  ;;  %v12702_v58 = vsub.s32 0, %v12697_v43 }
 0x3a6   : > { %13024 = vst [vmem:[#allocation33_spill] sm:$0xff] %v12684_v44  ;;  %v12686_v62 = vpop.f32.mrb[58].mxu1  ;;  %v8172_v44 = vld [vmem:[#allocation10] sm:$0x3] }
 0x3a7   : > { %13025 = vst [vmem:[#allocation34_spill] sm:$0xff] %v12686_v62  ;;  %v12688_v25 = vpop.f32.mrb[59].mxu1  ;;  %13032 = vst [vmem:[#allocation41_spill] sm:$0xff] %v12702_v58  ;;  %v8180_v62 = vsub.s32 1, %v12697_v43  ;;  %v12712_v22 = vrot.slane %v8248_v59, %v12702_v58 }
 0x3a8   : > { %13026 = vst [vmem:[#allocation35_spill] sm:$0xff] %v12688_v25  ;;  %v12706_v25 = vrot.slane %v8172_v44, %v12702_v58 }
 0x3a9   : > { %v12708_v16 = vrot.slane %v8172_v44, %v8180_v62  ;;  %v12715_v31 = vrot.slane %v8248_v59, %v8180_v62 }
 0x3ac   : > { %v12690_v29 = vpop.f32.mrb[60].mxu1 }
 0x3ad   : > { %13027 = vst [vmem:[#allocation36_spill] sm:$0xff] %v12690_v29  ;;  %v12692_v3 = vpop.f32.mrb[61].mxu1 }
 0x3ae   : > { %13028 = vst [vmem:[#allocation37_spill] sm:$0xff] %v12692_v3  ;;  %v12694_v54 = vpop.f32.mrb[62].mxu1 }
 0x3af   : > { %13029 = vst [vmem:[#allocation38_spill] sm:$0xff] %v12694_v54  ;;  %v12699_v21 = vpop.f32.mrb[63].mxu1 }
 0x3b0   : > { %13031 = vst [vmem:[#allocation40_spill] sm:$0xff] %v12699_v21 }
 0x3b6   : > { %v8013_v29 = vpop.f32.mrb[0].mxu0 }
 0x3b7   : > { %v9339_v54 = vadd.f32 %v8013_v29, %v12551_v20  ;;  %v8015_v3 = vpop.f32.mrb[1].mxu0 }
 0x3b8   : > { %v9340_v21 = vadd.f32 %v8015_v3, %v12553_v34  ;;  %v8017_v11 = vpop.f32.mrb[2].mxu0  ;;  %v12726_v3 = vld [vmem:[#allocation13] sm:$0x3] }
 0x3b9   : > { %v8184_v43 = vmul.f32 %v9339_v54, %v12706_v25  ;;  %v9341_v45 = vadd.f32 %v8017_v11, %v12555_v38  ;;  %v8019_v23 = vpop.f32.mrb[3].mxu0  ;;  %v8407_v11 = vrot.slane %v12726_v3, %v8180_v62 }
 0x3ba   : > { %v8185_v12 = vmul.f32 %v9340_v21, %v12708_v16  ;;  %v9342_v44 = vadd.f32 %v8019_v23, %v12562_v14 }
 0x3bb   : > { %v8260_v20 = vadd.f32 %v12712_v22, %v8184_v43  ;;  %v8186_v29 = vmul.f32 %v9341_v45, %v12706_v25  ;;  %8474 = vmatprep.mubr.f32.mxu1 %v8407_v11 }
 0x3bc   : > { %v8261_v58 = vadd.f32 %v12715_v31, %v8185_v12  ;;  %v8187_v34 = vmul.f32 %v9342_v44, %v12708_v16 }
 0x3bd   : > { %v8262_v59 = vadd.f32 %v12712_v22, %v8186_v29  ;;  %v8324_v21 = vmax.f32 %v8260_v20, 0.0 }
 0x3be   : > { %v8263_v54 = vadd.f32 %v12715_v31, %v8187_v34  ;;  %v8023_v38 = vpop.f32.mrb[4].mxu0  ;;  %v8325_v43 = vmax.f32 %v8261_v58, 0.0 }
 0x3bf   : > { %v8326_v6 = vmax.f32 %v8262_v59, 0.0  ;;  %v9343_v14 = vadd.f32 %v8023_v38, %v12564_v5  ;;  %v8025_v23 = vpop.f32.mrb[5].mxu0 }
 0x3c0   : > { %v8327_v45 = vmax.f32 %v8263_v54, 0.0  ;;  %v9344_v12 = vadd.f32 %v8025_v23, %v12566_v2  ;;  %v8027_v61 = vpop.f32.mrb[6].mxu0 }
 0x3c1   : > { %v9277_v44 = vpack.c.bf16 %v8326_v6, %v8324_v21  ;;  %v8188_v29 = vmul.f32 %v9343_v14, %v12706_v25  ;;  %v9345_v40 = vadd.f32 %v8027_v61, %v12568_v1  ;;  %v8029_v34 = vpop.f32.mrb[7].mxu0  ;;  %v8389_v6 = vld [vmem:[#allocation4] sm:$0x1] }
 0x3c2   : > { %v8189_v48 = vmul.f32 %v9344_v12, %v12708_v16  ;;  %v9346_v62 = vadd.f32 %v8029_v34, %v12575_v37  ;;  %v9275_v20 = vpack.c.bf16 %v8327_v45, %v8325_v43  ;;  %8392 = vperm.xlu0 %9942, %v8389_v6  }
 0x3c3   : > { %v8264_v5 = vadd.f32 %v12712_v22, %v8188_v29  ;;  %v8190_v58 = vmul.f32 %v9345_v40, %v12706_v25 }
 0x3c4   : > { %v8265_v59 = vadd.f32 %v12715_v31, %v8189_v48  ;;  %v8191_v2 = vmul.f32 %v9346_v62, %v12708_v16  ;;  %9276 = vmatprep.subr.bf16.mxu1 %v9275_v20 }
 0x3c5   : > { %v8266_v54 = vadd.f32 %v12712_v22, %v8190_v58  ;;  %9278 = vmatpush1.bf16.xpose.msra.mxu1 %v9277_v44  ;;  %v8328_v38 = vmax.f32 %v8264_v5, 0.0 }
 0x3c6   : > { %v8267_v1 = vadd.f32 %v12715_v31, %v8191_v2  ;;  %v8033_v61 = vpop.f32.mrb[8].mxu0  ;;  %v8329_v14 = vmax.f32 %v8265_v59, 0.0 }
 0x3c7   : > { %v8330_v37 = vmax.f32 %v8266_v54, 0.0  ;;  %v9347_v11 = vadd.f32 %v8033_v61, %v12577_v35  ;;  %v8035_v21 = vpop.f32.mrb[9].mxu0 }
 0x3c8   : > { %v8331_v40 = vmax.f32 %v8267_v1, 0.0  ;;  %v9348_v48 = vadd.f32 %v8035_v21, %v12579_v51  ;;  %v8037_v23 = vpop.f32.mrb[10].mxu0 }
 0x3c9   : > { %v9281_v43 = vpack.c.bf16 %v8330_v37, %v8328_v38  ;;  %v8192_v45 = vmul.f32 %v9347_v11, %v12706_v25  ;;  %v9349_v12 = vadd.f32 %v8037_v23, %v12581_v46  ;;  %v8039_v44 = vpop.f32.mrb[11].mxu0 }
 0x3ca   : > { %v8193_v29 = vmul.f32 %v9348_v48, %v12708_v16  ;;  %v9350_v34 = vadd.f32 %v8039_v44, %v12588_v60  ;;  %v9279_v62 = vpack.c.bf16 %v8331_v40, %v8329_v14 }
 0x3cb   : > { %v8268_v20 = vadd.f32 %v12712_v22, %v8192_v45  ;;  %v8194_v35 = vmul.f32 %v9349_v12, %v12706_v25 }
 0x3cc   : > { %v8269_v5 = vadd.f32 %v12715_v31, %v8193_v29  ;;  %v8195_v51 = vmul.f32 %v9350_v34, %v12708_v16  ;;  %9280 = vmatprep.subr.bf16.mxu1 %v9279_v62 }
 0x3cd   : > { %v8270_v58 = vadd.f32 %v12712_v22, %v8194_v35  ;;  %9282 = vmatpush1.bf16.xpose.msra.mxu1 %v9281_v43  ;;  %v8332_v2 = vmax.f32 %v8268_v20, 0.0 }
 0x3ce   : > { %v8271_v46 = vadd.f32 %v12715_v31, %v8195_v51  ;;  %v8043_v59 = vpop.f32.mrb[12].mxu0  ;;  %v8333_v1 = vmax.f32 %v8269_v5, 0.0 }
 0x3cf   : > { %v8334_v6 = vmax.f32 %v8270_v58, 0.0  ;;  %v9351_v60 = vadd.f32 %v8043_v59, %v12590_v24  ;;  %v8045_v54 = vpop.f32.mrb[13].mxu0 }
 0x3d0   : > { %v8335_v61 = vmax.f32 %v8271_v46, 0.0  ;;  %v9352_v38 = vadd.f32 %v8045_v54, %v12592_v19  ;;  %v8047_v37 = vpop.f32.mrb[14].mxu0 }
 0x3d1   : > { %v9285_v11 = vpack.c.bf16 %v8334_v6, %v8332_v2  ;;  %v8196_v21 = vmul.f32 %v9351_v60, %v12706_v25  ;;  %v9353_v14 = vadd.f32 %v8047_v37, %v12594_v10  ;;  %v8049_v40 = vpop.f32.mrb[15].mxu0 }
 0x3d2   : > { %v8197_v48 = vmul.f32 %v9352_v38, %v12708_v16  ;;  %v9354_v23 = vadd.f32 %v8049_v40, %v12600_v15  ;;  %v9283_v43 = vpack.c.bf16 %v8335_v61, %v8333_v1 }
 0x3d3   : > { %v8272_v45 = vadd.f32 %v12712_v22, %v8196_v21  ;;  %v8198_v24 = vmul.f32 %v9353_v14, %v12706_v25 }
 0x3d4   : > { %v8273_v12 = vadd.f32 %v12715_v31, %v8197_v48  ;;  %v8199_v19 = vmul.f32 %v9354_v23, %v12708_v16  ;;  %9284 = vmatprep.subr.bf16.mxu1 %v9283_v43 }
 0x3d5   : > { %v8274_v44 = vadd.f32 %v12712_v22, %v8198_v24  ;;  %9286 = vmatpush1.bf16.xpose.msra.mxu1 %v9285_v11  ;;  %v8336_v34 = vmax.f32 %v8272_v45, 0.0 }
 0x3d6   : > { %v8275_v10 = vadd.f32 %v12715_v31, %v8199_v19  ;;  %v8053_v29 = vpop.f32.mrb[16].mxu0  ;;  %v8337_v35 = vmax.f32 %v8273_v12, 0.0 }
 0x3d7   : > { %v8338_v62 = vmax.f32 %v8274_v44, 0.0  ;;  %v9355_v15 = vadd.f32 %v8053_v29, %v12602_v53  ;;  %v8055_v20 = vpop.f32.mrb[17].mxu0 }
 0x3d8   : > { %v8339_v5 = vmax.f32 %v8275_v10, 0.0  ;;  %v9356_v51 = vadd.f32 %v8055_v20, %v12604_v55  ;;  %v8057_v58 = vpop.f32.mrb[18].mxu0 }
 0x3d9   : > { %v9289_v46 = vpack.c.bf16 %v8338_v62, %v8336_v34  ;;  %v8200_v59 = vmul.f32 %v9355_v15, %v12706_v25  ;;  %v9357_v2 = vadd.f32 %v8057_v58, %v12606_v36  ;;  %v8059_v6 = vpop.f32.mrb[19].mxu0 }
 0x3da   : > { %v8201_v60 = vmul.f32 %v9356_v51, %v12708_v16  ;;  %v9358_v54 = vadd.f32 %v8059_v6, %v12608_v28  ;;  %v9287_v1 = vpack.c.bf16 %v8339_v5, %v8337_v35 }
 0x3db   : > { %v8276_v61 = vadd.f32 %v12712_v22, %v8200_v59  ;;  %v8202_v53 = vmul.f32 %v9357_v2, %v12706_v25 }
 0x3dc   : > { %v8277_v38 = vadd.f32 %v12715_v31, %v8201_v60  ;;  %v8203_v55 = vmul.f32 %v9358_v54, %v12708_v16  ;;  %9288 = vmatprep.subr.bf16.mxu1 %v9287_v1 }
 0x3dd   : > { %v8278_v37 = vadd.f32 %v12712_v22, %v8202_v53  ;;  %9290 = vmatpush1.bf16.xpose.msra.mxu1 %v9289_v46  ;;  %v8340_v21 = vmax.f32 %v8276_v61, 0.0 }
 0x3de   : > { %v8279_v36 = vadd.f32 %v12715_v31, %v8203_v55  ;;  %v8063_v11 = vpop.f32.mrb[20].mxu0  ;;  %v8341_v48 = vmax.f32 %v8277_v38, 0.0 }
 0x3df   : > { %v8342_v14 = vmax.f32 %v8278_v37, 0.0  ;;  %v9359_v28 = vadd.f32 %v8063_v11, %v12610_v13  ;;  %v8065_v40 = vpop.f32.mrb[21].mxu0 }
 0x3e0   : > { %v8343_v23 = vmax.f32 %v8279_v36, 0.0  ;;  %v9360_v43 = vadd.f32 %v8065_v40, %v12612_v18  ;;  %v8067_v45 = vpop.f32.mrb[22].mxu0 }
 0x3e1   : > { %v9293_v24 = vpack.c.bf16 %v8342_v14, %v8340_v21  ;;  %v8204_v12 = vmul.f32 %v9359_v28, %v12706_v25  ;;  %v9361_v19 = vadd.f32 %v8067_v45, %v12614_v42  ;;  %v8069_v44 = vpop.f32.mrb[23].mxu0 }
 0x3e2   : > { %v8205_v10 = vmul.f32 %v9360_v43, %v12708_v16  ;;  %v9362_v29 = vadd.f32 %v8069_v44, %v12616_v41  ;;  %v9291_v34 = vpack.c.bf16 %v8343_v23, %v8341_v48 }
 0x3e3   : > { %v8280_v62 = vadd.f32 %v12712_v22, %v8204_v12  ;;  %v8206_v13 = vmul.f32 %v9361_v19, %v12706_v25 }
 0x3e4   : > { %v8281_v15 = vadd.f32 %v12715_v31, %v8205_v10  ;;  %v8207_v18 = vmul.f32 %v9362_v29, %v12708_v16  ;;  %9292 = vmatprep.subr.bf16.mxu1 %v9291_v34 }
 0x3e5   : > { %v8282_v20 = vadd.f32 %v12712_v22, %v8206_v13  ;;  %9294 = vmatpush1.bf16.xpose.msra.mxu1 %v9293_v24  ;;  %v8344_v5 = vmax.f32 %v8280_v62, 0.0 }
 0x3e6   : > { %v8283_v42 = vadd.f32 %v12715_v31, %v8207_v18  ;;  %v8073_v35 = vpop.f32.mrb[24].mxu0  ;;  %v8345_v46 = vmax.f32 %v8281_v15, 0.0 }
 0x3e7   : > { %v8346_v51 = vmax.f32 %v8282_v20, 0.0  ;;  %v9363_v41 = vadd.f32 %v8073_v35, %v12618_v30  ;;  %v8075_v58 = vpop.f32.mrb[25].mxu0 }
 0x3e8   : > { %v8347_v59 = vmax.f32 %v8283_v42, 0.0  ;;  %v9364_v2 = vadd.f32 %v8075_v58, %v12620_v50  ;;  %v8077_v6 = vpop.f32.mrb[26].mxu0 }
 0x3e9   : > { %v9297_v60 = vpack.c.bf16 %v8346_v51, %v8344_v5  ;;  %v8208_v54 = vmul.f32 %v9363_v41, %v12706_v25  ;;  %v9365_v1 = vadd.f32 %v8077_v6, %v12622_v26  ;;  %v8079_v61 = vpop.f32.mrb[27].mxu0 }
 0x3ea   : > { %v8209_v53 = vmul.f32 %v9364_v2, %v12708_v16  ;;  %v9366_v38 = vadd.f32 %v8079_v61, %v12624_v63  ;;  %v9295_v55 = vpack.c.bf16 %v8347_v59, %v8345_v46 }
 0x3eb   : > { %v8284_v37 = vadd.f32 %v12712_v22, %v8208_v54  ;;  %v8210_v30 = vmul.f32 %v9365_v1, %v12706_v25 }
 0x3ec   : > { %v8285_v36 = vadd.f32 %v12715_v31, %v8209_v53  ;;  %v8211_v50 = vmul.f32 %v9366_v38, %v12708_v16  ;;  %9296 = vmatprep.subr.bf16.mxu1 %v9295_v55 }
 0x3ed   : > { %v8286_v11 = vadd.f32 %v12712_v22, %v8210_v30  ;;  %9298 = vmatpush1.bf16.xpose.msra.mxu1 %v9297_v60  ;;  %v8348_v14 = vmax.f32 %v8284_v37, 0.0 }
 0x3ee   : > { %v8287_v26 = vadd.f32 %v12715_v31, %v8211_v50  ;;  %v8083_v21 = vpop.f32.mrb[28].mxu0  ;;  %v8349_v48 = vmax.f32 %v8285_v36, 0.0 }
 0x3ef   : > { %v8350_v28 = vmax.f32 %v8286_v11, 0.0  ;;  %v9367_v63 = vadd.f32 %v8083_v21, %v12626_v39  ;;  %v8085_v40 = vpop.f32.mrb[29].mxu0 }
 0x3f0   : > { %v8351_v23 = vmax.f32 %v8287_v26, 0.0  ;;  %v9368_v43 = vadd.f32 %v8085_v40, %v12628_v52  ;;  %v8087_v45 = vpop.f32.mrb[30].mxu0 }
 0x3f1   : > { %v9301_v24 = vpack.c.bf16 %v8350_v28, %v8348_v14  ;;  %v8212_v12 = vmul.f32 %v9367_v63, %v12706_v25  ;;  %v9369_v19 = vadd.f32 %v8087_v45, %v12630_v4  ;;  %v8089_v44 = vpop.f32.mrb[31].mxu0 }
 0x3f2   : > { %v8213_v10 = vmul.f32 %v9368_v43, %v12708_v16  ;;  %v9370_v29 = vadd.f32 %v8089_v44, %v12632_v9  ;;  %v9299_v34 = vpack.c.bf16 %v8351_v23, %v8349_v48 }
 0x3f3   : > { %v8288_v62 = vadd.f32 %v12712_v22, %v8212_v12  ;;  %v8214_v39 = vmul.f32 %v9369_v19, %v12706_v25 }
 0x3f4   : > { %v8289_v13 = vadd.f32 %v12715_v31, %v8213_v10  ;;  %v8215_v52 = vmul.f32 %v9370_v29, %v12708_v16  ;;  %9300 = vmatprep.subr.bf16.mxu1 %v9299_v34 }
 0x3f5   : > { %v8290_v15 = vadd.f32 %v12712_v22, %v8214_v39  ;;  %9302 = vmatpush1.bf16.xpose.msra.mxu1 %v9301_v24  ;;  %v8352_v20 = vmax.f32 %v8288_v62, 0.0 }
 0x3f6   : > { %v8291_v4 = vadd.f32 %v12715_v31, %v8215_v52  ;;  %v8093_v18 = vpop.f32.mrb[32].mxu0  ;;  %v8353_v5 = vmax.f32 %v8289_v13, 0.0 }
 0x3f7   : > { %v8354_v42 = vmax.f32 %v8290_v15, 0.0  ;;  %v9371_v9 = vadd.f32 %v8093_v18, %v12634_v57  ;;  %v8095_v35 = vpop.f32.mrb[33].mxu0 }
 0x3f8   : > { %v8355_v51 = vmax.f32 %v8291_v4, 0.0  ;;  %v9372_v41 = vadd.f32 %v8095_v35, %v12636_v32  ;;  %v8097_v58 = vpop.f32.mrb[34].mxu0 }
 0x3f9   : > { %v9305_v46 = vpack.c.bf16 %v8354_v42, %v8352_v20  ;;  %v8216_v59 = vmul.f32 %v9371_v9, %v12706_v25  ;;  %v9373_v2 = vadd.f32 %v8097_v58, %v12638_v33  ;;  %v8099_v6 = vpop.f32.mrb[35].mxu0  ;;  %v13033_v42 = vld [vmem:[#allocation19_spill] sm:$0xff] }
 0x3fa   : > { %v8217_v60 = vmul.f32 %v9372_v41, %v12708_v16  ;;  %v9374_v54 = vadd.f32 %v8099_v6, %v12640_v8  ;;  %v9303_v1 = vpack.c.bf16 %v8355_v51, %v8353_v5 }
 0x3fb   : > { %v8292_v61 = vadd.f32 %v12712_v22, %v8216_v59  ;;  %v8218_v57 = vmul.f32 %v9373_v2, %v12706_v25  ;;  %v13034_v2 = vld [vmem:[#allocation20_spill] sm:$0xff] }
 0x3fc   : > { %v8293_v53 = vadd.f32 %v12715_v31, %v8217_v60  ;;  %v8219_v32 = vmul.f32 %v9374_v54, %v12708_v16  ;;  %9304 = vmatprep.subr.bf16.mxu1 %v9303_v1 }
 0x3fd   : > { %v8294_v38 = vadd.f32 %v12712_v22, %v8218_v57  ;;  %9306 = vmatpush1.bf16.xpose.msra.mxu1 %v9305_v46  ;;  %v8356_v37 = vmax.f32 %v8292_v61, 0.0  ;;  %v13035_v61 = vld [vmem:[#allocation21_spill] sm:$0xff] }
 0x3fe   : > { %v8295_v33 = vadd.f32 %v12715_v31, %v8219_v32  ;;  %v8103_v55 = vpop.f32.mrb[36].mxu0  ;;  %v8357_v50 = vmax.f32 %v8293_v53, 0.0 }
 0x3ff   : > { %v8358_v30 = vmax.f32 %v8294_v38, 0.0  ;;  %v9375_v8 = vadd.f32 %v8103_v55, %v12642_v56  ;;  %v8105_v36 = vpop.f32.mrb[37].mxu0 }
 0x400   : > { %v8359_v11 = vmax.f32 %v8295_v33, 0.0  ;;  %v9376_v26 = vadd.f32 %v8105_v36, %v12644_v27  ;;  %v8107_v21 = vpop.f32.mrb[38].mxu0  ;;  %v13036_v33 = vld [vmem:[#allocation22_spill] sm:$0xff] }
 0x401   : > { %v9309_v14 = vpack.c.bf16 %v8358_v30, %v8356_v37  ;;  %v8220_v28 = vmul.f32 %v9375_v8, %v12706_v25  ;;  %v9377_v63 = vadd.f32 %v8107_v21, %v12646_v7  ;;  %v8109_v40 = vpop.f32.mrb[39].mxu0  ;;  %v13037_v8 = vld [vmem:[#allocation23_spill] sm:$0xff] }
 0x402   : > { %v8221_v48 = vmul.f32 %v9376_v26, %v12708_v16  ;;  %v9378_v23 = vadd.f32 %v8109_v40, %v12648_v0  ;;  %v9307_v43 = vpack.c.bf16 %v8359_v11, %v8357_v50 }
 0x403   : > { %v8296_v45 = vadd.f32 %v12712_v22, %v8220_v28  ;;  %v8222_v56 = vmul.f32 %v9377_v63, %v12706_v25 }
 0x404   : > { %v8297_v24 = vadd.f32 %v12715_v31, %v8221_v48  ;;  %v8223_v27 = vmul.f32 %v9378_v23, %v12708_v16  ;;  %9308 = vmatprep.subr.bf16.mxu1 %v9307_v43  ;;  %v13038_v43 = vld [vmem:[#allocation24_spill] sm:$0xff] }
 0x405   : > { %v8298_v12 = vadd.f32 %v12712_v22, %v8222_v56  ;;  %9310 = vmatpush1.bf16.xpose.msra.mxu1 %v9309_v14  ;;  %v8360_v44 = vmax.f32 %v8296_v45, 0.0 }
 0x406   : > { %v8299_v7 = vadd.f32 %v12715_v31, %v8223_v27  ;;  %v8113_v19 = vpop.f32.mrb[40].mxu0  ;;  %v8361_v34 = vmax.f32 %v8297_v24, 0.0 }
 0x407   : > { %v8362_v10 = vmax.f32 %v8298_v12, 0.0  ;;  %v9379_v0 = vadd.f32 %v8113_v19, %v12650_v17  ;;  %v8115_v29 = vpop.f32.mrb[41].mxu0  ;;  %v13039_v12 = vld [vmem:[#allocation25_spill] sm:$0xff] }
 0x408   : > { %v8363_v62 = vmax.f32 %v8299_v7, 0.0  ;;  %v9380_v39 = vadd.f32 %v8115_v29, %v12652_v47  ;;  %v8117_v13 = vpop.f32.mrb[42].mxu0 }
 0x409   : > { %v9313_v52 = vpack.c.bf16 %v8362_v10, %v8360_v44  ;;  %v8224_v15 = vmul.f32 %v9379_v0, %v12706_v25  ;;  %v9381_v4 = vadd.f32 %v8117_v13, %v12654_v49  ;;  %v8119_v18 = vpop.f32.mrb[43].mxu0  ;;  %v13040_v0 = vld [vmem:[#allocation26_spill] sm:$0xff] }
 0x40a   : > { %v8225_v20 = vmul.f32 %v9380_v39, %v12708_v16  ;;  %v9382_v9 = vadd.f32 %v8119_v18, %v13033_v42  ;;  %v9311_v35 = vpack.c.bf16 %v8363_v62, %v8361_v34  ;;  %v13041_v39 = vld [vmem:[#allocation27_spill] sm:$0xff] }
 0x40b   : > { %v8300_v5 = vadd.f32 %v12712_v22, %v8224_v15  ;;  %v8226_v17 = vmul.f32 %v9381_v4, %v12706_v25 }
 0x40c   : > { %v8301_v51 = vadd.f32 %v12715_v31, %v8225_v20  ;;  %v8227_v47 = vmul.f32 %v9382_v9, %v12708_v16  ;;  %9312 = vmatprep.subr.bf16.mxu1 %v9311_v35 }
 0x40d   : > { %v8302_v41 = vadd.f32 %v12712_v22, %v8226_v17  ;;  %9314 = vmatpush1.bf16.xpose.msra.mxu1 %v9313_v52  ;;  %v8364_v46 = vmax.f32 %v8300_v5, 0.0 }
 0x40e   : > { %v8303_v49 = vadd.f32 %v12715_v31, %v8227_v47  ;;  %v8123_v58 = vpop.f32.mrb[44].mxu0  ;;  %v8365_v54 = vmax.f32 %v8301_v51, 0.0  ;;  %v13042_v51 = vld [vmem:[#allocation28_spill] sm:$0xff] }
 0x40f   : > { %v8366_v59 = vmax.f32 %v8302_v41, 0.0  ;;  %v9383_v6 = vadd.f32 %v8123_v58, %v13034_v2  ;;  %v8125_v60 = vpop.f32.mrb[45].mxu0 }
 0x410   : > { %v8367_v1 = vmax.f32 %v8303_v49, 0.0  ;;  %v9384_v57 = vadd.f32 %v8125_v60, %v13035_v61  ;;  %v8127_v53 = vpop.f32.mrb[46].mxu0 }
 0x411   : > { %v9317_v32 = vpack.c.bf16 %v8366_v59, %v8364_v46  ;;  %v8228_v38 = vmul.f32 %v9383_v6, %v12706_v25  ;;  %v9385_v55 = vadd.f32 %v8127_v53, %v13036_v33  ;;  %v8129_v37 = vpop.f32.mrb[47].mxu0  ;;  %v13043_v46 = vld [vmem:[#allocation29_spill] sm:$0xff]  ;;  %v13045_v53 = vld [vmem:[#allocation31_spill] sm:$0xff] }
 0x412   : > { %v8229_v30 = vmul.f32 %v9384_v57, %v12708_v16  ;;  %v9386_v36 = vadd.f32 %v8129_v37, %v13037_v8  ;;  %v9315_v50 = vpack.c.bf16 %v8367_v1, %v8365_v54  ;;  %v13044_v54 = vld [vmem:[#allocation30_spill] sm:$0xff] }
 0x413   : > { %v8304_v11 = vadd.f32 %v12712_v22, %v8228_v38  ;;  %v8230_v26 = vmul.f32 %v9385_v55, %v12706_v25 }
 0x414   : > { %v8305_v21 = vadd.f32 %v12715_v31, %v8229_v30  ;;  %v8231_v14 = vmul.f32 %v9386_v36, %v12708_v16  ;;  %9316 = vmatprep.subr.bf16.mxu1 %v9315_v50 }
 0x415   : > { %v8306_v28 = vadd.f32 %v12712_v22, %v8230_v26  ;;  %9318 = vmatpush1.bf16.xpose.msra.mxu1 %v9317_v32  ;;  %v8368_v48 = vmax.f32 %v8304_v11, 0.0 }
 0x416   : > { %v8307_v63 = vadd.f32 %v12715_v31, %v8231_v14  ;;  %v8133_v40 = vpop.f32.mrb[48].mxu0  ;;  %v8369_v24 = vmax.f32 %v8305_v21, 0.0  ;;  %v13046_v21 = vld [vmem:[#allocation32_spill] sm:$0xff] }
 0x417   : > { %v8370_v23 = vmax.f32 %v8306_v28, 0.0  ;;  %v9387_v45 = vadd.f32 %v8133_v40, %v13038_v43  ;;  %v8135_v56 = vpop.f32.mrb[49].mxu0 }
 0x418   : > { %v8371_v27 = vmax.f32 %v8307_v63, 0.0  ;;  %v9388_v7 = vadd.f32 %v8135_v56, %v13039_v12  ;;  %v8137_v19 = vpop.f32.mrb[50].mxu0 }
 0x419   : > { %v9321_v44 = vpack.c.bf16 %v8370_v23, %v8368_v48  ;;  %v8232_v10 = vmul.f32 %v9387_v45, %v12706_v25  ;;  %v9389_v29 = vadd.f32 %v8137_v19, %v13040_v0  ;;  %v8139_v34 = vpop.f32.mrb[51].mxu0  ;;  %v13047_v48 = vld [vmem:[#allocation33_spill] sm:$0xff]  ;;  %v13049_v19 = vld [vmem:[#allocation35_spill] sm:$0xff] }
 0x41a   : > { %v8233_v62 = vmul.f32 %v9388_v7, %v12708_v16  ;;  %v9390_v13 = vadd.f32 %v8139_v34, %v13041_v39  ;;  %v9319_v52 = vpack.c.bf16 %v8371_v27, %v8369_v24  ;;  %v13048_v24 = vld [vmem:[#allocation34_spill] sm:$0xff] }
 0x41b   : > { %v8308_v15 = vadd.f32 %v12712_v22, %v8232_v10  ;;  %v8234_v4 = vmul.f32 %v9389_v29, %v12706_v25 }
 0x41c   : > { %v8309_v18 = vadd.f32 %v12715_v31, %v8233_v62  ;;  %v8235_v20 = vmul.f32 %v9390_v13, %v12708_v16  ;;  %9320 = vmatprep.subr.bf16.mxu1 %v9319_v52 }
 0x41d   : > { %v8310_v42 = vadd.f32 %v12712_v22, %v8234_v4  ;;  %9322 = vmatpush1.bf16.xpose.msra.mxu1 %v9321_v44  ;;  %v8372_v5 = vmax.f32 %v8308_v15, 0.0 }
 0x41e   : > { %v8311_v9 = vadd.f32 %v12715_v31, %v8235_v20  ;;  %v8143_v35 = vpop.f32.mrb[52].mxu0  ;;  %v8373_v49 = vmax.f32 %v8309_v18, 0.0  ;;  %v13050_v18 = vld [vmem:[#allocation36_spill] sm:$0xff] }
 0x41f   : > { %v8374_v17 = vmax.f32 %v8310_v42, 0.0  ;;  %v9391_v47 = vadd.f32 %v8143_v35, %v13042_v51  ;;  %v8145_v41 = vpop.f32.mrb[53].mxu0 }
 0x420   : > { %v8375_v58 = vmax.f32 %v8311_v9, 0.0  ;;  %v9392_v59 = vadd.f32 %v8145_v41, %v13043_v46  ;;  %v8147_v2 = vpop.f32.mrb[54].mxu0 }
 0x421   : > { %v9325_v6 = vpack.c.bf16 %v8374_v17, %v8372_v5  ;;  %v8236_v60 = vmul.f32 %v9391_v47, %v12706_v25  ;;  %v9393_v1 = vadd.f32 %v8147_v2, %v13044_v54  ;;  %v8149_v61 = vpop.f32.mrb[55].mxu0  ;;  %v13051_v5 = vld [vmem:[#allocation37_spill] sm:$0xff]  ;;  %v13053_v2 = vld [vmem:[#allocation40_spill] sm:$0xff] }
 0x422   : > { %v8237_v57 = vmul.f32 %v9392_v59, %v12708_v16  ;;  %v9394_v32 = vadd.f32 %v8149_v61, %v13045_v53  ;;  %v9323_v38 = vpack.c.bf16 %v8375_v58, %v8373_v49  ;;  %v13052_v49 = vld [vmem:[#allocation38_spill] sm:$0xff] }
 0x423   : > { %v8312_v33 = vadd.f32 %v12712_v22, %v8236_v60  ;;  %v8238_v55 = vmul.f32 %v9393_v1, %v12706_v25 }
 0x424   : > { %v8313_v37 = vadd.f32 %v12715_v31, %v8237_v57  ;;  %v8239_v30 = vmul.f32 %v9394_v32, %v12708_v16  ;;  %9324 = vmatprep.subr.bf16.mxu1 %v9323_v38 }
 0x425   : > { %v8314_v8 = vadd.f32 %v12712_v22, %v8238_v55  ;;  %9326 = vmatpush1.bf16.xpose.msra.mxu1 %v9325_v6  ;;  %v8376_v11 = vmax.f32 %v8312_v33, 0.0 }
 0x426   : > { %v8315_v36 = vadd.f32 %v12715_v31, %v8239_v30  ;;  %v8153_v50 = vpop.f32.mrb[56].mxu0  ;;  %v8377_v63 = vmax.f32 %v8313_v37, 0.0 }
 0x427   : > { %v8378_v26 = vmax.f32 %v8314_v8, 0.0  ;;  %v9395_v14 = vadd.f32 %v8153_v50, %v13046_v21  ;;  %v8155_v28 = vpop.f32.mrb[57].mxu0  ;;  %v10671_v50 = vmov 1966171168  }
 0x428   : > { %v8379_v40 = vmax.f32 %v8315_v36, 0.0  ;;  %v9396_v23 = vadd.f32 %v8155_v28, %v13047_v48  ;;  %v8157_v43 = vpop.f32.mrb[58].mxu0 }
 0x429   : > { %v9329_v45 = vpack.c.bf16 %v8378_v26, %v8376_v11  ;;  %v8240_v56 = vmul.f32 %v9395_v14, %v12706_v25  ;;  %v9397_v27 = vadd.f32 %v8157_v43, %v13048_v24  ;;  %v8159_v12 = vpop.f32.mrb[59].mxu0 }
 0x42a   : > { %v8241_v7 = vmul.f32 %v9396_v23, %v12708_v16  ;;  %v9398_v44 = vadd.f32 %v8159_v12, %v13049_v19  ;;  %v9327_v10 = vpack.c.bf16 %v8379_v40, %v8377_v63  ;;  %v13055_v63 = vld [vmem:[#allocation39_spill] sm:$0xff]  ;;  %v13056_v23 = vlaneseq }
 0x42b   : > { %v8316_v0 = vadd.f32 %v12712_v22, %v8240_v56  ;;  %v8242_v29 = vmul.f32 %v9397_v27, %v12706_v25 }
 0x42c   : > { %v8317_v34 = vadd.f32 %v12715_v31, %v8241_v7  ;;  %v8243_v62 = vmul.f32 %v9398_v44, %v12708_v16  ;;  %9328 = vmatprep.subr.bf16.mxu1 %v9327_v10  ;;  %vm8501_vm6 = vcmp.lt.s32.totalorder %v13056_v23, 256 }
 0x42d   : > { %v8318_v39 = vadd.f32 %v12712_v22, %v8242_v29  ;;  %9330 = vmatpush1.bf16.xpose.msra.mxu1 %v9329_v45  ;;  %v8380_v15 = vmax.f32 %v8316_v0, 0.0 }
 0x42e   : > { %v8319_v13 = vadd.f32 %v12715_v31, %v8243_v62  ;;  %v8163_v52 = vpop.f32.mrb[60].mxu0  ;;  %v8381_v9 = vmax.f32 %v8317_v34, 0.0 }
 0x42f   : > { %v8382_v4 = vmax.f32 %v8318_v39, 0.0  ;;  %v9399_v20 = vadd.f32 %v8163_v52, %v13050_v18  ;;  %v8165_v42 = vpop.f32.mrb[61].mxu0 }
 0x430   : > { %v8383_v35 = vmax.f32 %v8319_v13, 0.0  ;;  %v9400_v17 = vadd.f32 %v8165_v42, %v13051_v5  ;;  %v8167_v51 = vpop.f32.mrb[62].mxu0 }
 0x431   : > { %v9333_v47 = vpack.c.bf16 %v8382_v4, %v8380_v15  ;;  %v8244_v41 = vmul.f32 %v9399_v20, %v12706_v25  ;;  %v9401_v58 = vadd.f32 %v8167_v51, %v13052_v49  ;;  %v8169_v46 = vpop.f32.mrb[63].mxu0 }
 0x432   : > { %v8245_v59 = vmul.f32 %v9400_v17, %v12708_v16  ;;  %v9402_v6 = vadd.f32 %v8169_v46, %v13053_v2  ;;  %v9331_v60 = vpack.c.bf16 %v8383_v35, %v8381_v9 }
 0x433   : > { %v8320_v54 = vadd.f32 %v12712_v22, %v8244_v41  ;;  %v8246_v1 = vmul.f32 %v9401_v58, %v12706_v25  ;;  %v13054_v25 = vld [vmem:[#allocation41_spill] sm:$0xff] }
 0x434   : > { %v8321_v61 = vadd.f32 %v12715_v31, %v8245_v59  ;;  %v8247_v57 = vmul.f32 %v9402_v6, %v12708_v16  ;;  %9332 = vmatprep.subr.bf16.mxu1 %v9331_v60  ;;  %v8403_v36 = vrot.slane %v12726_v3, %v13054_v25 }
 0x435   : > { %v8322_v53 = vadd.f32 %v12712_v22, %v8246_v1  ;;  %9334 = vmatpush1.bf16.xpose.msra.mxu1 %v9333_v47  ;;  %v8384_v38 = vmax.f32 %v8320_v54, 0.0  ;;  %v8485_v22 = vunpack.c.l.s4 %v10671_v50 }
 0x436   : > { %v8323_v32 = vadd.f32 %v12715_v31, %v8247_v57  ;;  %v8385_v55 = vmax.f32 %v8321_v61, 0.0 }
 0x437   : > { %v8386_v33 = vmax.f32 %v8322_v53, 0.0  ;;  %v8486_v31 = vunpack.c.0.s8 %v8485_v22 }
 0x438   : > { %v8387_v37 = vmax.f32 %v8323_v32, 0.0 }
 0x439   : > { %v9337_v30 = vpack.c.bf16 %v8386_v33, %v8384_v38  ;;  %v8489_v40 = vsub.s32 %v8486_v31, %v13055_v63 }
 0x43a   : > { %v9335_v8 = vpack.c.bf16 %v8387_v37, %v8385_v55 }
 0x43c   : > { %9336 = vmatprep.subr.bf16.mxu1 %v9335_v8 }
 0x43d   : > { %9338 = vmatpush1.bf16.xpose.msra.mxu1 %v9337_v30 }
 0x441   : > { %v8393_v16 = vpop.permute.xlu0 %8392 }
 0x442   : > { %v8398_v11 = vrot.slane %v8393_v16, %v13054_v25 }
 0x444   : > { %8475 = vmatmul.mubr.f32.vlgmr.msra.gmra.mrb[64].mxu1 %v8403_v36 }
 0x517   : > { %v8476_v26 = vpop.f32.mrb[64].mxu1 }
 0x518   : > { %v8477_v21 = vadd.f32 %v8476_v26, %v8398_v11  ;;  %v8478_v14 = vpop.f32.mrb[65].mxu1 }
 0x519   : > { %v8479_v28 = vadd.f32 %v8478_v14, %v8398_v11 }
 0x51b   : > { %v8483_v48 = vcombine.low %v8477_v21, %v8479_v28 }
 0x51d   : > { %v8490_v3 = vrot.slane %v8483_v48, %v8489_v40 }
 0x51f   : > { %v8497_v43 = vrot.slane %v8490_v3, %v8489_v40 }
 0x521   : > { %8503 = vst.msk [vmem:[%s323_s27] sm:$0x3] %vm8501_vm6, %v8497_v43 }
 0x522   : > { %10600 = shalt.err (!%p10597_p13)
}
 0x523   : > { %s10601_s15 = scalar_lea.hbm %s12920_s21, 32  ;;  %s10605_s16 = scalar_lea.hbm %s12970_s6, 64 }
 0x524   : > { %p10602_p9 = scmp.ne.s32.totalorder %s12920_s21, %s10601_s15  ;;  %p10606_p6 = scmp.lt.u32.totalorder %s12920_s21, %s12970_s6 }
 0x525   : > { %p10607_p4 = scmp.lt.u32.totalorder %s10605_s16, %s10601_s15  ;;  %p10609_p3 = scmp.lt.u32.totalorder %s10601_s15, %s12920_s21 }
 0x526   : > { %p10603_p0 = pnand %p10602_p9, %p10873_p10 }
 0x527   : > { %p10608_p8 = por %p10607_p4, %p10606_p6 }
 0x528   : > { %p10604_p11 = pneg %p10603_p0 }
 0x529   : > { %p10610_p5 = por %p10609_p3, %p10608_p8 }
 0x52b   : > { %p10611_p7 = pnand %p10610_p5, %p10604_p11 }
 0x52d   : > { %10614 = shalt.err (!%p10611_p7)
}
 0x52e   : > { %9869 = dma.vmem_to_hbm [thread:$0]  (%p10873_p10), %s12922_s7, 32, %s12920_s21, %s8505_s11  }
 0x52f PF: > { %s8531_s30 = sand.u32 1, %s10649_s23   ;;  %p13057_p12 = scmp.ne.s32.totalorder %s12979_s29, 0 }
 0x530   : > { %p13058_p1 = scmp.ge.s32.totalorder %s10661_s26, 2  ;;  %s8532_s27 = scalar_lea.sflag [#allocation7], %s8531_s30 }
 0x532   : > { %p9889_p2 = pnand %p13058_p1, %p13057_p12 }
 0x534   : > { %10644 = dma.done.wait (!%p9889_p2), %s8532_s27, 32  }
 0x535   : > { %10646 = vsyncadd (!%p9889_p2), %s8532_s27, 4294967264  ;;  %p23_p13 = scmp.ge.s32.totalorder %s10863_s19, 4   ;;  %s13059_s23 = smov %s10653_s24 }
 0x536   : > { %s13060_s24 = smov %s10657_s25  ;;  %s13061_s25 = smov %s10879_s12 }
 0x537   : > { %s13062_s26 = smov %s10863_s19  ;;  %25 = sbr.rel (!%p23_p13) target bundleno = 10 (0xa), region = 107 }
 0x53e   :  { %8537 = vsyncpa [#allocation6], 1 }
 0x53f   :  { %8539 = vsyncpa [#allocation6 + $0x1], 1 }
 0x540   :  { %8540 = vsyncpa [#allocation9], 1 }
 0x541   :  { %8541 = vsyncpa [#allocation12], 1 }
 0x542   :  { %8542 = vsyncpa [#allocation7], 1 }
 0x543   :  { %8544 = vsyncpa [#allocation7 + $0x1], 1 }

</bundles_post_ra>
